<compile_context>
chip_gen: v5e
topology: v5e:2x2
jax: 0.10.0
libtpu: 0.0.40
codegen_flags: <defaults>
</compile_context>

<pallas_src>
import math
from functools import partial

import jax
import jax.numpy as jnp
from jax.experimental import pallas as pl
from jax.experimental.pallas import tpu as pltpu

# ----------------------------- model configuration -----------------------------
VOCAB       = 64       # synthetic vocab
MAX_POS     = 16
HIDDEN      = 128      # real ClinicalBERT: 768
NUM_HEADS   = 4        # real: 12
HEAD_DIM    = HIDDEN // NUM_HEADS
FFN         = 512      # 4 * HIDDEN (real: 3072)
NUM_LAYERS  = 2        # real: 12
LN_EPS_BERT = 1e-12    # BERT layer-norm eps
LN_EPS_PROJ = 1e-5     # nn.LayerNorm default eps
_INV_SQRT2  = 1.0 / math.sqrt(2.0)

# Fused per-layer bf16 weight blob, column (lane) layout — every boundary is 128-aligned:
#   [0              : 3*HIDDEN      ) -> W_qkv (q columns pre-scaled by 1/sqrt(HEAD_DIM))
#   [3*HIDDEN       : 4*HIDDEN      ) -> W_o
#   [4*HIDDEN       : 4*HIDDEN+FFN  ) -> W_1
_WBLOB_COLS = 4 * HIDDEN + FFN   # 1024
# Per-layer f32 vector blob rows (L, 6, H):   0 bo | 1 ln1_g | 2 ln1_b | 3 b2 | 4 ln2_g | 5 ln2_b
# Global   f32 vector blob rows (5, H):       0 emb_ln_g | 1 emb_ln_b | 2 proj_b | 3 proj_g | 4 proj_beta


# ----------------------------- in-kernel math helpers (f32) -----------------------------
def _layernorm(x, gamma, beta, eps):
    mean = jnp.mean(x, axis=-1, keepdims=True)
    var = jnp.mean(jnp.square(x - mean), axis=-1, keepdims=True)
    return (x - mean) * jax.lax.rsqrt(var + eps) * gamma + beta


def _erf(x):
    # Abramowitz & Stegun 7.1.26 rational approximation, |err| <= 1.5e-7 -- used so the
    # exact-erf GELU (PyTorch/HF default) is matched with only Mosaic-supported ops.
    # TODO(synk): switch to lax.erf if/when erf_p gets a Mosaic TPU lowering.
    a1, a2, a3, a4, a5 = 0.254829592, -0.284496736, 1.421413741, -1.453152027, 1.061405429
    p = 0.3275911
    ax = jnp.abs(x)
    t = 1.0 / (1.0 + p * ax)
    poly = ((((a5 * t + a4) * t + a3) * t + a2) * t + a1) * t
    y = 1.0 - poly * jnp.exp(-ax * ax)
    return jnp.where(x >= 0.0, y, -y)


def _gelu_exact(x):
    return 0.5 * x * (1.0 + _erf(x * _INV_SQRT2))


# ----------------------------- fused forward kernel -----------------------------
def fused_forward_kernel(emb_ref, mask_ref, wblob_ref, w2_ref, bqkv_ref, b1_ref,
                         lvec_ref, pw_ref, gvec_ref, o_ref, x_scratch, *, batch, seq):
    bs = batch * seq
    H = HIDDEN

    # Embedding LayerNorm (f32).
    x = _layernorm(emb_ref[...], gvec_ref[0:1, :], gvec_ref[1:2, :], LN_EPS_BERT)  # (B*S, H)

    # Additive attention mask, broadcast over query rows: (B, 1, S).
    bias = mask_ref[...][:, None, :]

    for l in range(NUM_LAYERS):                                       # static unrolled loop
        xb = x.astype(jnp.bfloat16)

        # Fused QKV projection: one MXU pass with N = 3H = 384 (scale folded into q cols).
        qkv = jnp.dot(xb, wblob_ref[l, :, 0:3 * H],
                      preferred_element_type=jnp.float32) + bqkv_ref[l]            # (B*S, 3H)

        # 128-lane-aligned splits (vreg-boundary selections, no relayout), then
        # (B*S, H) -> (B, S, H) leading-dim reshape.
        q3 = qkv[:, 0:H].reshape(batch, seq, H)
        k3 = qkv[:, H:2 * H].reshape(batch, seq, H)
        v3 = qkv[:, 2 * H:3 * H].reshape(batch, seq, H)

        # Per-head attention; output projection accumulated per head against a sublane
        # slice of W_o (no activation lane-concatenate).
        attn = None
        for h in range(NUM_HEADS):                                    # static, NUM_HEADS small
            lo = h * HEAD_DIM
            qh = q3[:, :, lo:lo + HEAD_DIM].astype(jnp.bfloat16)
            kh = k3[:, :, lo:lo + HEAD_DIM].astype(jnp.bfloat16)
            vh = v3[:, :, lo:lo + HEAD_DIM].astype(jnp.bfloat16)
            s = jnp.einsum('bqd,bkd->bqk', qh, kh,
                           preferred_element_type=jnp.float32) + bias              # (B, S, S)
            s = s - jnp.max(s, axis=-1, keepdims=True)
            p = jnp.exp(s)
            p = p * pl.reciprocal(jnp.sum(p, axis=-1, keepdims=True), approx=True)
            ctx = jnp.einsum('bqk,bkd->bqd', p.astype(jnp.bfloat16), vh,
                             preferred_element_type=jnp.float32).reshape(bs, HEAD_DIM)
            wo_h = wblob_ref[l, lo:lo + HEAD_DIM, 3 * H:4 * H]                     # (HD, H)
            part = jnp.dot(ctx.astype(jnp.bfloat16), wo_h,
                           preferred_element_type=jnp.float32)
            attn = part if attn is None else attn + part

        attn = attn + lvec_ref[l, 0:1, :]                              # + bo
        h1 = _layernorm(x + attn, lvec_ref[l, 1:2, :], lvec_ref[l, 2:3, :], LN_EPS_BERT)

        # FFN: Linear(H, FFN) -> GELU(exact erf) -> Linear(FFN, H).
        ff = _gelu_exact(jnp.dot(h1.astype(jnp.bfloat16), wblob_ref[l, :, 4 * H:],
                                 preferred_element_type=jnp.float32) + b1_ref[l])
        ff = jnp.dot(ff.astype(jnp.bfloat16), w2_ref[l],
                     preferred_element_type=jnp.float32) + lvec_ref[l, 3:4, :]
        x = _layernorm(h1 + ff, lvec_ref[l, 4:5, :], lvec_ref[l, 5:6, :], LN_EPS_BERT)

    # CLS pooling via a strided sublane read (rows 0, S, 2S, ...) of the flat activation,
    # avoiding the reshape+index gather relayout.
    x_scratch[...] = x
    cls = x_scratch[pl.ds(0, batch, stride=seq), :]                    # (B, H)

    # Projection head: Linear(H,H) -> LayerNorm(H).  (nn.Dropout(0.1) is identity at eval.)
    y = jnp.dot(cls.astype(jnp.bfloat16), pw_ref[...],
                preferred_element_type=jnp.float32) + gvec_ref[2:3, :]
    o_ref[...] = _layernorm(y, gvec_ref[3:4, :], gvec_ref[4:5, :], LN_EPS_PROJ
                            ).astype(o_ref.dtype)


# ----------------------------- parameter init (deterministic, synthetic) -----------------------------
def init_params(key):
    keys = iter(jax.random.split(key, 256))

    def normal(shape):
        return 0.02 * jax.random.normal(next(keys), shape, jnp.float32)

    params = {
        "word_emb": normal((VOCAB, HIDDEN)),
        "pos_emb": normal((MAX_POS, HIDDEN)),
        "type_emb": normal((2, HIDDEN)),
        "emb_ln_g": jnp.ones((1, HIDDEN), jnp.float32),
        "emb_ln_b": jnp.zeros((1, HIDDEN), jnp.float32),
        "layers": [],
        "proj": {
            "w": normal((HIDDEN, HIDDEN)),
            "b": jnp.zeros((1, HIDDEN), jnp.float32),
            "g": jnp.ones((1, HIDDEN), jnp.float32),
            "beta": jnp.zeros((1, HIDDEN), jnp.float32),
        },
    }
    for _ in range(NUM_LAYERS):
        params["layers"].append({
            "wq": normal((HIDDEN, HIDDEN)), "bq": jnp.zeros((1, HIDDEN), jnp.float32),
            "wk": normal((HIDDEN, HIDDEN)), "bk": jnp.zeros((1, HIDDEN), jnp.float32),
            "wv": normal((HIDDEN, HIDDEN)), "bv": jnp.zeros((1, HIDDEN), jnp.float32),
            "wo": normal((HIDDEN, HIDDEN)), "bo": jnp.zeros((1, HIDDEN), jnp.float32),
            "ln1_g": jnp.ones((1, HIDDEN), jnp.float32),
            "ln1_b": jnp.zeros((1, HIDDEN), jnp.float32),
            "w1": normal((HIDDEN, FFN)), "b1": jnp.zeros((1, FFN), jnp.float32),
            "w2": normal((FFN, HIDDEN)), "b2": jnp.zeros((1, HIDDEN), jnp.float32),
            "ln2_g": jnp.ones((1, HIDDEN), jnp.float32),
            "ln2_b": jnp.zeros((1, HIDDEN), jnp.float32),
        })
    return params


# ----------------------------- parameter packing -----------------------------
def _pack_params(params):
    """Pack per-layer params into a few large blobs (fewer DMAs, bf16 matmul weights)."""
    scale = 1.0 / math.sqrt(HEAD_DIM)
    wblob_l, w2_l, bqkv_l, b1_l, lvec_l = [], [], [], [], []
    for lyr in params["layers"]:
        wqkv = jnp.concatenate([lyr["wq"] * scale, lyr["wk"], lyr["wv"]], axis=1)   # (H, 3H)
        wblob_l.append(jnp.concatenate([wqkv, lyr["wo"], lyr["w1"]], axis=1))        # (H, 1024)
        w2_l.append(lyr["w2"])
        bqkv_l.append(jnp.concatenate([lyr["bq"] * scale, lyr["bk"], lyr["bv"]], axis=1))
        b1_l.append(lyr["b1"])
        lvec_l.append(jnp.concatenate([lyr["bo"], lyr["ln1_g"], lyr["ln1_b"],
                                       lyr["b2"], lyr["ln2_g"], lyr["ln2_b"]], axis=0))
    wblob = jnp.stack(wblob_l, axis=0).astype(jnp.bfloat16)    # (L, H, 1024)
    w2 = jnp.stack(w2_l, axis=0).astype(jnp.bfloat16)          # (L, FFN, H)
    bqkv = jnp.stack(bqkv_l, axis=0)                           # (L, 1, 3H) f32
    b1 = jnp.stack(b1_l, axis=0)                               # (L, 1, FFN) f32
    lvec = jnp.stack(lvec_l, axis=0)                           # (L, 6, H)  f32
    proj = params["proj"]
    gvec = jnp.concatenate([params["emb_ln_g"], params["emb_ln_b"],
                            proj["b"], proj["g"], proj["beta"]], axis=0)  # (5, H) f32
    pw = proj["w"].astype(jnp.bfloat16)                        # (H, H)
    return wblob, w2, bqkv, b1, lvec, pw, gvec


# ----------------------------- forward pass -----------------------------
def clinical_text_processor_forward(params, input_ids, attention_mask):
    B, S = input_ids.shape

    # Embedding gather (glue in plain JAX); LayerNorm happens inside the fused kernel.
    word = jnp.take(params["word_emb"], input_ids, axis=0)             # (B, S, H)
    pos = params["pos_emb"][None, :S, :]                               # (1, S, H)
    tok = params["type_emb"][0][None, None, :]                         # token_type_ids == 0
    emb = (word + pos + tok).astype(jnp.float32).reshape(B * S, HIDDEN)

    addmask = (1.0 - attention_mask.astype(jnp.float32)) * -1e9        # (B, S) additive mask

    wblob, w2, bqkv, b1, lvec, pw, gvec = _pack_params(params)
    inputs = [emb, addmask, wblob, w2, bqkv, b1, lvec, pw, gvec]

    # Advisory cost estimate so XLA can schedule neighbouring ops around the custom call.
    flops = NUM_LAYERS * (
        2 * B * S * HIDDEN * 3 * HIDDEN          # fused QKV
        + 2 * 2 * B * S * S * HIDDEN             # scores + ctx (all heads)
        + 2 * B * S * HIDDEN * HIDDEN            # attention output proj
        + 2 * 2 * B * S * HIDDEN * FFN           # FFN
    ) + 2 * B * HIDDEN * HIDDEN                  # projection head
    transcendentals = NUM_LAYERS * (B * NUM_HEADS * S * S + B * S * FFN)
    bytes_accessed = sum(int(a.size) * a.dtype.itemsize for a in inputs) + B * HIDDEN * 4
    cost = pl.CostEstimate(flops=flops, transcendentals=transcendentals,
                           bytes_accessed=bytes_accessed)

    # Grid-less call: single program, whole arrays resident in VMEM, no double-buffering
    # of weights (~0.5 MB bf16 weights + tiny activations fit comfortably on all chips).
    vmem_spec = pl.BlockSpec(memory_space=pltpu.MemorySpace.VMEM)
    return pl.pallas_call(
        partial(fused_forward_kernel, batch=B, seq=S),
        out_shape=jax.ShapeDtypeStruct((B, HIDDEN), jnp.float32),
        in_specs=[vmem_spec] * len(inputs),
        out_specs=vmem_spec,
        scratch_shapes=[pltpu.VMEM((B * S, HIDDEN), jnp.float32)],
        cost_estimate=cost,
    )(*inputs)


# ----------------------------- demo -----------------------------
if __name__ == "__main__":
    key = jax.random.PRNGKey(0)
    k_param, k_ids = jax.random.split(key)

    B, S = 2, 8
    params = init_params(k_param)
    input_ids = jax.random.randint(k_ids, (B, S), 0, VOCAB, dtype=jnp.int32)
    attention_mask = jnp.array([[1, 1, 1, 1, 1, 1, 1, 1],
                                [1, 1, 1, 1, 1, 1, 0, 0]], dtype=jnp.int32)

    fwd = jax.jit(clinical_text_processor_forward)
    out = jax.block_until_ready(fwd(params, input_ids, attention_mask))
    assert out.shape == (B, HIDDEN) and out.dtype == jnp.float32
    assert bool(jnp.all(jnp.isfinite(out)))
    print("KERNEL_OK")
</pallas_src>

<mosaic_0001>
module attributes {stable_mosaic.version = 11 : i64} {
  func.func @fused_forward_kernel(%arg0: memref<16x128xf32, #tpu.memory_space<vmem>>, %arg1: memref<2x8xf32, #tpu.memory_space<vmem>>, %arg2: memref<2x128x1024xbf16, #tpu.memory_space<vmem>>, %arg3: memref<2x512x128xbf16, #tpu.memory_space<vmem>>, %arg4: memref<2x1x384xf32, #tpu.memory_space<vmem>>, %arg5: memref<2x1x512xf32, #tpu.memory_space<vmem>>, %arg6: memref<2x6x128xf32, #tpu.memory_space<vmem>>, %arg7: memref<128x128xbf16, #tpu.memory_space<vmem>>, %arg8: memref<5x128xf32, #tpu.memory_space<vmem>>, %arg9: memref<2x128xf32, #tpu.memory_space<vmem>>, %arg10: memref<16x128xf32, #tpu.memory_space<vmem>>) attributes {dimension_semantics = [], scalar_prefetch = 0 : i64, scratch_operands = 1 : i64, tpu.core_type = #tpu.core_type<tc>} {
    %c0 = arith.constant 0 : index
    %c0_0 = arith.constant 0 : index
    %0 = vector.load %arg0[%c0, %c0_0] : memref<16x128xf32, #tpu.memory_space<vmem>>, vector<16x128xf32>
    %c0_1 = arith.constant 0 : index
    %c0_2 = arith.constant 0 : index
    %1 = vector.load %arg8[%c0_1, %c0_2] : memref<5x128xf32, #tpu.memory_space<vmem>>, vector<1x128xf32>
    %c1 = arith.constant 1 : index
    %c0_3 = arith.constant 0 : index
    %2 = vector.load %arg8[%c1, %c0_3] : memref<5x128xf32, #tpu.memory_space<vmem>>, vector<1x128xf32>
    %cst = arith.constant dense<0.000000e+00> : vector<16xf32>
    %3 = vector.multi_reduction <add>, %0, %cst [1] : vector<16x128xf32> to vector<16xf32>
    %4 = vector.shape_cast %3 : vector<16xf32> to vector<16x1xf32>
    %cst_4 = arith.constant 1.280000e+02 : f32
    %5 = vector.broadcast %cst_4 : f32 to vector<16x1xf32>
    %6 = arith.divf %4, %5 : vector<16x1xf32>
    %7 = vector.broadcast %6 : vector<16x1xf32> to vector<16x128xf32>
    %8 = arith.subf %0, %7 : vector<16x128xf32>
    %9 = arith.mulf %8, %8 : vector<16x128xf32>
    %cst_5 = arith.constant dense<0.000000e+00> : vector<16xf32>
    %10 = vector.multi_reduction <add>, %9, %cst_5 [1] : vector<16x128xf32> to vector<16xf32>
    %11 = vector.shape_cast %10 : vector<16xf32> to vector<16x1xf32>
    %cst_6 = arith.constant 1.280000e+02 : f32
    %12 = vector.broadcast %cst_6 : f32 to vector<16x1xf32>
    %13 = arith.divf %11, %12 : vector<16x1xf32>
    %14 = vector.broadcast %6 : vector<16x1xf32> to vector<16x128xf32>
    %15 = arith.subf %0, %14 : vector<16x128xf32>
    %cst_7 = arith.constant 9.99999996E-13 : f32
    %16 = vector.broadcast %cst_7 : f32 to vector<16x1xf32>
    %17 = arith.addf %13, %16 : vector<16x1xf32>
    %18 = math.rsqrt %17 : vector<16x1xf32>
    %19 = vector.broadcast %18 : vector<16x1xf32> to vector<16x128xf32>
    %20 = arith.mulf %15, %19 : vector<16x128xf32>
    %21 = vector.broadcast %1 : vector<1x128xf32> to vector<16x128xf32>
    %22 = arith.mulf %20, %21 : vector<16x128xf32>
    %23 = vector.broadcast %2 : vector<1x128xf32> to vector<16x128xf32>
    %24 = arith.addf %22, %23 : vector<16x128xf32>
    %c0_8 = arith.constant 0 : index
    %c0_9 = arith.constant 0 : index
    %25 = vector.load %arg1[%c0_8, %c0_9] : memref<2x8xf32, #tpu.memory_space<vmem>>, vector<2x8xf32>
    %26 = vector.shape_cast %25 : vector<2x8xf32> to vector<2x1x8xf32>
    %27 = arith.truncf %24 : vector<16x128xf32> to vector<16x128xbf16>
    %c0_10 = arith.constant 0 : index
    %c0_11 = arith.constant 0 : index
    %c0_12 = arith.constant 0 : index
    %28 = vector.load %arg2[%c0_10, %c0_11, %c0_12] : memref<2x128x1024xbf16, #tpu.memory_space<vmem>>, vector<1x128x384xbf16>
    %29 = vector.shape_cast %28 : vector<1x128x384xbf16> to vector<128x384xbf16>
    %cst_13 = arith.constant dense<0.000000e+00> : vector<16x384xf32>
    %30 = tpu.matmul %27, %29, %cst_13 {dimension_numbers = #tpu.dot_dimension_numbers<[1], [0], [0], [1], [0, 0, 1, 1], [], []>} : vector<16x128xbf16>, vector<128x384xbf16>, vector<16x384xf32> -> vector<16x384xf32>
    %c0_14 = arith.constant 0 : index
    %c0_15 = arith.constant 0 : index
    %c0_16 = arith.constant 0 : index
    %31 = vector.load %arg4[%c0_14, %c0_15, %c0_16] : memref<2x1x384xf32, #tpu.memory_space<vmem>>, vector<1x1x384xf32>
    %32 = vector.shape_cast %31 : vector<1x1x384xf32> to vector<1x384xf32>
    %33 = vector.broadcast %32 : vector<1x384xf32> to vector<16x384xf32>
    %34 = arith.addf %30, %33 : vector<16x384xf32>
    %35 = vector.extract_strided_slice %34 {offsets = [0, 0], sizes = [16, 128], strides = [1, 1]} : vector<16x384xf32> to vector<16x128xf32>
    %36 = vector.shape_cast %35 : vector<16x128xf32> to vector<2x8x128xf32>
    %37 = vector.extract_strided_slice %34 {offsets = [0, 128], sizes = [16, 128], strides = [1, 1]} : vector<16x384xf32> to vector<16x128xf32>
    %38 = vector.shape_cast %37 : vector<16x128xf32> to vector<2x8x128xf32>
    %39 = vector.extract_strided_slice %34 {offsets = [0, 256], sizes = [16, 128], strides = [1, 1]} : vector<16x384xf32> to vector<16x128xf32>
    %40 = vector.shape_cast %39 : vector<16x128xf32> to vector<2x8x128xf32>
    %41 = vector.extract_strided_slice %36 {offsets = [0, 0, 0], sizes = [2, 8, 32], strides = [1, 1, 1]} : vector<2x8x128xf32> to vector<2x8x32xf32>
    %42 = arith.truncf %41 : vector<2x8x32xf32> to vector<2x8x32xbf16>
    %43 = vector.extract_strided_slice %38 {offsets = [0, 0, 0], sizes = [2, 8, 32], strides = [1, 1, 1]} : vector<2x8x128xf32> to vector<2x8x32xf32>
    %44 = arith.truncf %43 : vector<2x8x32xf32> to vector<2x8x32xbf16>
    %45 = vector.extract_strided_slice %40 {offsets = [0, 0, 0], sizes = [2, 8, 32], strides = [1, 1, 1]} : vector<2x8x128xf32> to vector<2x8x32xf32>
    %46 = arith.truncf %45 : vector<2x8x32xf32> to vector<2x8x32xbf16>
    "tpu.trace_start"() <{level = 10 : i32, message = "bqd,bkd->bqk"}> : () -> ()
    %cst_17 = arith.constant dense<0.000000e+00> : vector<2x8x8xf32>
    %47 = tpu.matmul %42, %44, %cst_17 {dimension_numbers = #tpu.dot_dimension_numbers<[2], [2], [1], [1], [0, 0, 0, 1, 1, 1], [0], [0]>} : vector<2x8x32xbf16>, vector<2x8x32xbf16>, vector<2x8x8xf32> -> vector<2x8x8xf32>
    "tpu.trace_stop"() : () -> ()
    %48 = vector.broadcast %26 : vector<2x1x8xf32> to vector<2x8x8xf32>
    %49 = arith.addf %47, %48 : vector<2x8x8xf32>
    %cst_18 = arith.constant dense<0xFF800000> : vector<2x8xf32>
    %50 = vector.multi_reduction <maximumf>, %49, %cst_18 [2] : vector<2x8x8xf32> to vector<2x8xf32>
    %51 = vector.shape_cast %50 : vector<2x8xf32> to vector<2x8x1xf32>
    %52 = vector.broadcast %51 : vector<2x8x1xf32> to vector<2x8x8xf32>
    %53 = arith.subf %49, %52 : vector<2x8x8xf32>
    %54 = math.exp %53 : vector<2x8x8xf32>
    %cst_19 = arith.constant dense<0.000000e+00> : vector<2x8xf32>
    %55 = vector.multi_reduction <add>, %54, %cst_19 [2] : vector<2x8x8xf32> to vector<2x8xf32>
    %56 = vector.shape_cast %55 : vector<2x8xf32> to vector<2x8x1xf32>
    %57 = tpu.reciprocal %56 {approx = true} : vector<2x8x1xf32> -> vector<2x8x1xf32>
    %58 = vector.broadcast %57 : vector<2x8x1xf32> to vector<2x8x8xf32>
    %59 = arith.mulf %54, %58 : vector<2x8x8xf32>
    %60 = arith.truncf %59 : vector<2x8x8xf32> to vector<2x8x8xbf16>
    "tpu.trace_start"() <{level = 10 : i32, message = "bqk,bkd->bqd"}> : () -> ()
    %cst_20 = arith.constant dense<0.000000e+00> : vector<2x8x32xf32>
    %61 = tpu.matmul %60, %46, %cst_20 {dimension_numbers = #tpu.dot_dimension_numbers<[2], [1], [1], [2], [0, 0, 0, 1, 1, 2], [0], [0]>} : vector<2x8x8xbf16>, vector<2x8x32xbf16>, vector<2x8x32xf32> -> vector<2x8x32xf32>
    "tpu.trace_stop"() : () -> ()
    %62 = vector.shape_cast %61 : vector<2x8x32xf32> to vector<16x32xf32>
    %c0_21 = arith.constant 0 : index
    %c0_22 = arith.constant 0 : index
    %c384 = arith.constant 384 : index
    %63 = vector.load %arg2[%c0_21, %c0_22, %c384] : memref<2x128x1024xbf16, #tpu.memory_space<vmem>>, vector<1x32x128xbf16>
    %64 = vector.shape_cast %63 : vector<1x32x128xbf16> to vector<32x128xbf16>
    %65 = arith.truncf %62 : vector<16x32xf32> to vector<16x32xbf16>
    %cst_23 = arith.constant dense<0.000000e+00> : vector<16x128xf32>
    %66 = tpu.matmul %65, %64, %cst_23 {dimension_numbers = #tpu.dot_dimension_numbers<[1], [0], [0], [1], [0, 0, 1, 1], [], []>} : vector<16x32xbf16>, vector<32x128xbf16>, vector<16x128xf32> -> vector<16x128xf32>
    %67 = vector.extract_strided_slice %36 {offsets = [0, 0, 32], sizes = [2, 8, 32], strides = [1, 1, 1]} : vector<2x8x128xf32> to vector<2x8x32xf32>
    %68 = arith.truncf %67 : vector<2x8x32xf32> to vector<2x8x32xbf16>
    %69 = vector.extract_strided_slice %38 {offsets = [0, 0, 32], sizes = [2, 8, 32], strides = [1, 1, 1]} : vector<2x8x128xf32> to vector<2x8x32xf32>
    %70 = arith.truncf %69 : vector<2x8x32xf32> to vector<2x8x32xbf16>
    %71 = vector.extract_strided_slice %40 {offsets = [0, 0, 32], sizes = [2, 8, 32], strides = [1, 1, 1]} : vector<2x8x128xf32> to vector<2x8x32xf32>
    %72 = arith.truncf %71 : vector<2x8x32xf32> to vector<2x8x32xbf16>
    "tpu.trace_start"() <{level = 10 : i32, message = "bqd,bkd->bqk"}> : () -> ()
    %cst_24 = arith.constant dense<0.000000e+00> : vector<2x8x8xf32>
    %73 = tpu.matmul %68, %70, %cst_24 {dimension_numbers = #tpu.dot_dimension_numbers<[2], [2], [1], [1], [0, 0, 0, 1, 1, 1], [0], [0]>} : vector<2x8x32xbf16>, vector<2x8x32xbf16>, vector<2x8x8xf32> -> vector<2x8x8xf32>
    "tpu.trace_stop"() : () -> ()
    %74 = vector.broadcast %26 : vector<2x1x8xf32> to vector<2x8x8xf32>
    %75 = arith.addf %73, %74 : vector<2x8x8xf32>
    %cst_25 = arith.constant dense<0xFF800000> : vector<2x8xf32>
    %76 = vector.multi_reduction <maximumf>, %75, %cst_25 [2] : vector<2x8x8xf32> to vector<2x8xf32>
    %77 = vector.shape_cast %76 : vector<2x8xf32> to vector<2x8x1xf32>
    %78 = vector.broadcast %77 : vector<2x8x1xf32> to vector<2x8x8xf32>
    %79 = arith.subf %75, %78 : vector<2x8x8xf32>
    %80 = math.exp %79 : vector<2x8x8xf32>
    %cst_26 = arith.constant dense<0.000000e+00> : vector<2x8xf32>
    %81 = vector.multi_reduction <add>, %80, %cst_26 [2] : vector<2x8x8xf32> to vector<2x8xf32>
    %82 = vector.shape_cast %81 : vector<2x8xf32> to vector<2x8x1xf32>
    %83 = tpu.reciprocal %82 {approx = true} : vector<2x8x1xf32> -> vector<2x8x1xf32>
    %84 = vector.broadcast %83 : vector<2x8x1xf32> to vector<2x8x8xf32>
    %85 = arith.mulf %80, %84 : vector<2x8x8xf32>
    %86 = arith.truncf %85 : vector<2x8x8xf32> to vector<2x8x8xbf16>
    "tpu.trace_start"() <{level = 10 : i32, message = "bqk,bkd->bqd"}> : () -> ()
    %cst_27 = arith.constant dense<0.000000e+00> : vector<2x8x32xf32>
    %87 = tpu.matmul %86, %72, %cst_27 {dimension_numbers = #tpu.dot_dimension_numbers<[2], [1], [1], [2], [0, 0, 0, 1, 1, 2], [0], [0]>} : vector<2x8x8xbf16>, vector<2x8x32xbf16>, vector<2x8x32xf32> -> vector<2x8x32xf32>
    "tpu.trace_stop"() : () -> ()
    %88 = vector.shape_cast %87 : vector<2x8x32xf32> to vector<16x32xf32>
    %c0_28 = arith.constant 0 : index
    %c32 = arith.constant 32 : index
    %c384_29 = arith.constant 384 : index
    %89 = vector.load %arg2[%c0_28, %c32, %c384_29] : memref<2x128x1024xbf16, #tpu.memory_space<vmem>>, vector<1x32x128xbf16>
    %90 = vector.shape_cast %89 : vector<1x32x128xbf16> to vector<32x128xbf16>
    %91 = arith.truncf %88 : vector<16x32xf32> to vector<16x32xbf16>
    %cst_30 = arith.constant dense<0.000000e+00> : vector<16x128xf32>
    %92 = tpu.matmul %91, %90, %cst_30 {dimension_numbers = #tpu.dot_dimension_numbers<[1], [0], [0], [1], [0, 0, 1, 1], [], []>} : vector<16x32xbf16>, vector<32x128xbf16>, vector<16x128xf32> -> vector<16x128xf32>
    %93 = arith.addf %66, %92 : vector<16x128xf32>
    %94 = vector.extract_strided_slice %36 {offsets = [0, 0, 64], sizes = [2, 8, 32], strides = [1, 1, 1]} : vector<2x8x128xf32> to vector<2x8x32xf32>
    %95 = arith.truncf %94 : vector<2x8x32xf32> to vector<2x8x32xbf16>
    %96 = vector.extract_strided_slice %38 {offsets = [0, 0, 64], sizes = [2, 8, 32], strides = [1, 1, 1]} : vector<2x8x128xf32> to vector<2x8x32xf32>
    %97 = arith.truncf %96 : vector<2x8x32xf32> to vector<2x8x32xbf16>
    %98 = vector.extract_strided_slice %40 {offsets = [0, 0, 64], sizes = [2, 8, 32], strides = [1, 1, 1]} : vector<2x8x128xf32> to vector<2x8x32xf32>
    %99 = arith.truncf %98 : vector<2x8x32xf32> to vector<2x8x32xbf16>
    "tpu.trace_start"() <{level = 10 : i32, message = "bqd,bkd->bqk"}> : () -> ()
    %cst_31 = arith.constant dense<0.000000e+00> : vector<2x8x8xf32>
    %100 = tpu.matmul %95, %97, %cst_31 {dimension_numbers = #tpu.dot_dimension_numbers<[2], [2], [1], [1], [0, 0, 0, 1, 1, 1], [0], [0]>} : vector<2x8x32xbf16>, vector<2x8x32xbf16>, vector<2x8x8xf32> -> vector<2x8x8xf32>
    "tpu.trace_stop"() : () -> ()
    %101 = vector.broadcast %26 : vector<2x1x8xf32> to vector<2x8x8xf32>
    %102 = arith.addf %100, %101 : vector<2x8x8xf32>
    %cst_32 = arith.constant dense<0xFF800000> : vector<2x8xf32>
    %103 = vector.multi_reduction <maximumf>, %102, %cst_32 [2] : vector<2x8x8xf32> to vector<2x8xf32>
    %104 = vector.shape_cast %103 : vector<2x8xf32> to vector<2x8x1xf32>
    %105 = vector.broadcast %104 : vector<2x8x1xf32> to vector<2x8x8xf32>
    %106 = arith.subf %102, %105 : vector<2x8x8xf32>
    %107 = math.exp %106 : vector<2x8x8xf32>
    %cst_33 = arith.constant dense<0.000000e+00> : vector<2x8xf32>
    %108 = vector.multi_reduction <add>, %107, %cst_33 [2] : vector<2x8x8xf32> to vector<2x8xf32>
    %109 = vector.shape_cast %108 : vector<2x8xf32> to vector<2x8x1xf32>
    %110 = tpu.reciprocal %109 {approx = true} : vector<2x8x1xf32> -> vector<2x8x1xf32>
    %111 = vector.broadcast %110 : vector<2x8x1xf32> to vector<2x8x8xf32>
    %112 = arith.mulf %107, %111 : vector<2x8x8xf32>
    %113 = arith.truncf %112 : vector<2x8x8xf32> to vector<2x8x8xbf16>
    "tpu.trace_start"() <{level = 10 : i32, message = "bqk,bkd->bqd"}> : () -> ()
    %cst_34 = arith.constant dense<0.000000e+00> : vector<2x8x32xf32>
    %114 = tpu.matmul %113, %99, %cst_34 {dimension_numbers = #tpu.dot_dimension_numbers<[2], [1], [1], [2], [0, 0, 0, 1, 1, 2], [0], [0]>} : vector<2x8x8xbf16>, vector<2x8x32xbf16>, vector<2x8x32xf32> -> vector<2x8x32xf32>
    "tpu.trace_stop"() : () -> ()
    %115 = vector.shape_cast %114 : vector<2x8x32xf32> to vector<16x32xf32>
    %c0_35 = arith.constant 0 : index
    %c64 = arith.constant 64 : index
    %c384_36 = arith.constant 384 : index
    %116 = vector.load %arg2[%c0_35, %c64, %c384_36] : memref<2x128x1024xbf16, #tpu.memory_space<vmem>>, vector<1x32x128xbf16>
    %117 = vector.shape_cast %116 : vector<1x32x128xbf16> to vector<32x128xbf16>
    %118 = arith.truncf %115 : vector<16x32xf32> to vector<16x32xbf16>
    %cst_37 = arith.constant dense<0.000000e+00> : vector<16x128xf32>
    %119 = tpu.matmul %118, %117, %cst_37 {dimension_numbers = #tpu.dot_dimension_numbers<[1], [0], [0], [1], [0, 0, 1, 1], [], []>} : vector<16x32xbf16>, vector<32x128xbf16>, vector<16x128xf32> -> vector<16x128xf32>
    %120 = arith.addf %93, %119 : vector<16x128xf32>
    %121 = vector.extract_strided_slice %36 {offsets = [0, 0, 96], sizes = [2, 8, 32], strides = [1, 1, 1]} : vector<2x8x128xf32> to vector<2x8x32xf32>
    %122 = arith.truncf %121 : vector<2x8x32xf32> to vector<2x8x32xbf16>
    %123 = vector.extract_strided_slice %38 {offsets = [0, 0, 96], sizes = [2, 8, 32], strides = [1, 1, 1]} : vector<2x8x128xf32> to vector<2x8x32xf32>
    %124 = arith.truncf %123 : vector<2x8x32xf32> to vector<2x8x32xbf16>
    %125 = vector.extract_strided_slice %40 {offsets = [0, 0, 96], sizes = [2, 8, 32], strides = [1, 1, 1]} : vector<2x8x128xf32> to vector<2x8x32xf32>
    %126 = arith.truncf %125 : vector<2x8x32xf32> to vector<2x8x32xbf16>
    "tpu.trace_start"() <{level = 10 : i32, message = "bqd,bkd->bqk"}> : () -> ()
    %cst_38 = arith.constant dense<0.000000e+00> : vector<2x8x8xf32>
    %127 = tpu.matmul %122, %124, %cst_38 {dimension_numbers = #tpu.dot_dimension_numbers<[2], [2], [1], [1], [0, 0, 0, 1, 1, 1], [0], [0]>} : vector<2x8x32xbf16>, vector<2x8x32xbf16>, vector<2x8x8xf32> -> vector<2x8x8xf32>
    "tpu.trace_stop"() : () -> ()
    %128 = vector.broadcast %26 : vector<2x1x8xf32> to vector<2x8x8xf32>
    %129 = arith.addf %127, %128 : vector<2x8x8xf32>
    %cst_39 = arith.constant dense<0xFF800000> : vector<2x8xf32>
    %130 = vector.multi_reduction <maximumf>, %129, %cst_39 [2] : vector<2x8x8xf32> to vector<2x8xf32>
    %131 = vector.shape_cast %130 : vector<2x8xf32> to vector<2x8x1xf32>
    %132 = vector.broadcast %131 : vector<2x8x1xf32> to vector<2x8x8xf32>
    %133 = arith.subf %129, %132 : vector<2x8x8xf32>
    %134 = math.exp %133 : vector<2x8x8xf32>
    %cst_40 = arith.constant dense<0.000000e+00> : vector<2x8xf32>
    %135 = vector.multi_reduction <add>, %134, %cst_40 [2] : vector<2x8x8xf32> to vector<2x8xf32>
    %136 = vector.shape_cast %135 : vector<2x8xf32> to vector<2x8x1xf32>
    %137 = tpu.reciprocal %136 {approx = true} : vector<2x8x1xf32> -> vector<2x8x1xf32>
    %138 = vector.broadcast %137 : vector<2x8x1xf32> to vector<2x8x8xf32>
    %139 = arith.mulf %134, %138 : vector<2x8x8xf32>
    %140 = arith.truncf %139 : vector<2x8x8xf32> to vector<2x8x8xbf16>
    "tpu.trace_start"() <{level = 10 : i32, message = "bqk,bkd->bqd"}> : () -> ()
    %cst_41 = arith.constant dense<0.000000e+00> : vector<2x8x32xf32>
    %141 = tpu.matmul %140, %126, %cst_41 {dimension_numbers = #tpu.dot_dimension_numbers<[2], [1], [1], [2], [0, 0, 0, 1, 1, 2], [0], [0]>} : vector<2x8x8xbf16>, vector<2x8x32xbf16>, vector<2x8x32xf32> -> vector<2x8x32xf32>
    "tpu.trace_stop"() : () -> ()
    %142 = vector.shape_cast %141 : vector<2x8x32xf32> to vector<16x32xf32>
    %c0_42 = arith.constant 0 : index
    %c96 = arith.constant 96 : index
    %c384_43 = arith.constant 384 : index
    %143 = vector.load %arg2[%c0_42, %c96, %c384_43] : memref<2x128x1024xbf16, #tpu.memory_space<vmem>>, vector<1x32x128xbf16>
    %144 = vector.shape_cast %143 : vector<1x32x128xbf16> to vector<32x128xbf16>
    %145 = arith.truncf %142 : vector<16x32xf32> to vector<16x32xbf16>
    %cst_44 = arith.constant dense<0.000000e+00> : vector<16x128xf32>
    %146 = tpu.matmul %145, %144, %cst_44 {dimension_numbers = #tpu.dot_dimension_numbers<[1], [0], [0], [1], [0, 0, 1, 1], [], []>} : vector<16x32xbf16>, vector<32x128xbf16>, vector<16x128xf32> -> vector<16x128xf32>
    %147 = arith.addf %120, %146 : vector<16x128xf32>
    %c0_45 = arith.constant 0 : index
    %c0_46 = arith.constant 0 : index
    %c0_47 = arith.constant 0 : index
    %148 = vector.load %arg6[%c0_45, %c0_46, %c0_47] : memref<2x6x128xf32, #tpu.memory_space<vmem>>, vector<1x1x128xf32>
    %149 = vector.shape_cast %148 : vector<1x1x128xf32> to vector<1x128xf32>
    %150 = vector.broadcast %149 : vector<1x128xf32> to vector<16x128xf32>
    %151 = arith.addf %147, %150 : vector<16x128xf32>
    %152 = arith.addf %24, %151 : vector<16x128xf32>
    %c0_48 = arith.constant 0 : index
    %c1_49 = arith.constant 1 : index
    %c0_50 = arith.constant 0 : index
    %153 = vector.load %arg6[%c0_48, %c1_49, %c0_50] : memref<2x6x128xf32, #tpu.memory_space<vmem>>, vector<1x1x128xf32>
    %154 = vector.shape_cast %153 : vector<1x1x128xf32> to vector<1x128xf32>
    %c0_51 = arith.constant 0 : index
    %c2 = arith.constant 2 : index
    %c0_52 = arith.constant 0 : index
    %155 = vector.load %arg6[%c0_51, %c2, %c0_52] : memref<2x6x128xf32, #tpu.memory_space<vmem>>, vector<1x1x128xf32>
    %156 = vector.shape_cast %155 : vector<1x1x128xf32> to vector<1x128xf32>
    %cst_53 = arith.constant dense<0.000000e+00> : vector<16xf32>
    %157 = vector.multi_reduction <add>, %152, %cst_53 [1] : vector<16x128xf32> to vector<16xf32>
    %158 = vector.shape_cast %157 : vector<16xf32> to vector<16x1xf32>
    %cst_54 = arith.constant 1.280000e+02 : f32
    %159 = vector.broadcast %cst_54 : f32 to vector<16x1xf32>
    %160 = arith.divf %158, %159 : vector<16x1xf32>
    %161 = vector.broadcast %160 : vector<16x1xf32> to vector<16x128xf32>
    %162 = arith.subf %152, %161 : vector<16x128xf32>
    %163 = arith.mulf %162, %162 : vector<16x128xf32>
    %cst_55 = arith.constant dense<0.000000e+00> : vector<16xf32>
    %164 = vector.multi_reduction <add>, %163, %cst_55 [1] : vector<16x128xf32> to vector<16xf32>
    %165 = vector.shape_cast %164 : vector<16xf32> to vector<16x1xf32>
    %cst_56 = arith.constant 1.280000e+02 : f32
    %166 = vector.broadcast %cst_56 : f32 to vector<16x1xf32>
    %167 = arith.divf %165, %166 : vector<16x1xf32>
    %168 = vector.broadcast %160 : vector<16x1xf32> to vector<16x128xf32>
    %169 = arith.subf %152, %168 : vector<16x128xf32>
    %cst_57 = arith.constant 9.99999996E-13 : f32
    %170 = vector.broadcast %cst_57 : f32 to vector<16x1xf32>
    %171 = arith.addf %167, %170 : vector<16x1xf32>
    %172 = math.rsqrt %171 : vector<16x1xf32>
    %173 = vector.broadcast %172 : vector<16x1xf32> to vector<16x128xf32>
    %174 = arith.mulf %169, %173 : vector<16x128xf32>
    %175 = vector.broadcast %154 : vector<1x128xf32> to vector<16x128xf32>
    %176 = arith.mulf %174, %175 : vector<16x128xf32>
    %177 = vector.broadcast %156 : vector<1x128xf32> to vector<16x128xf32>
    %178 = arith.addf %176, %177 : vector<16x128xf32>
    %179 = arith.truncf %178 : vector<16x128xf32> to vector<16x128xbf16>
    %c0_58 = arith.constant 0 : index
    %c0_59 = arith.constant 0 : index
    %c512 = arith.constant 512 : index
    %180 = vector.load %arg2[%c0_58, %c0_59, %c512] : memref<2x128x1024xbf16, #tpu.memory_space<vmem>>, vector<1x128x512xbf16>
    %181 = vector.shape_cast %180 : vector<1x128x512xbf16> to vector<128x512xbf16>
    %cst_60 = arith.constant dense<0.000000e+00> : vector<16x512xf32>
    %182 = tpu.matmul %179, %181, %cst_60 {dimension_numbers = #tpu.dot_dimension_numbers<[1], [0], [0], [1], [0, 0, 1, 1], [], []>} : vector<16x128xbf16>, vector<128x512xbf16>, vector<16x512xf32> -> vector<16x512xf32>
    %c0_61 = arith.constant 0 : index
    %c0_62 = arith.constant 0 : index
    %c0_63 = arith.constant 0 : index
    %183 = vector.load %arg5[%c0_61, %c0_62, %c0_63] : memref<2x1x512xf32, #tpu.memory_space<vmem>>, vector<1x1x512xf32>
    %184 = vector.shape_cast %183 : vector<1x1x512xf32> to vector<1x512xf32>
    %185 = vector.broadcast %184 : vector<1x512xf32> to vector<16x512xf32>
    %186 = arith.addf %182, %185 : vector<16x512xf32>
    %cst_64 = arith.constant 5.000000e-01 : f32
    %187 = vector.broadcast %cst_64 : f32 to vector<16x512xf32>
    %188 = arith.mulf %187, %186 : vector<16x512xf32>
    %cst_65 = arith.constant 0.707106769 : f32
    %189 = vector.broadcast %cst_65 : f32 to vector<16x512xf32>
    %190 = arith.mulf %186, %189 : vector<16x512xf32>
    %191 = math.absf %190 : vector<16x512xf32>
    %cst_66 = arith.constant 0.327591091 : f32
    %192 = vector.broadcast %cst_66 : f32 to vector<16x512xf32>
    %193 = arith.mulf %192, %191 : vector<16x512xf32>
    %cst_67 = arith.constant 1.000000e+00 : f32
    %194 = vector.broadcast %cst_67 : f32 to vector<16x512xf32>
    %195 = arith.addf %194, %193 : vector<16x512xf32>
    %cst_68 = arith.constant 1.000000e+00 : f32
    %196 = vector.broadcast %cst_68 : f32 to vector<16x512xf32>
    %197 = arith.divf %196, %195 : vector<16x512xf32>
    %cst_69 = arith.constant 1.06140542 : f32
    %198 = vector.broadcast %cst_69 : f32 to vector<16x512xf32>
    %199 = arith.mulf %198, %197 : vector<16x512xf32>
    %cst_70 = arith.constant -1.45315206 : f32
    %200 = vector.broadcast %cst_70 : f32 to vector<16x512xf32>
    %201 = arith.addf %199, %200 : vector<16x512xf32>
    %202 = arith.mulf %201, %197 : vector<16x512xf32>
    %cst_71 = arith.constant 1.42141378 : f32
    %203 = vector.broadcast %cst_71 : f32 to vector<16x512xf32>
    %204 = arith.addf %202, %203 : vector<16x512xf32>
    %205 = arith.mulf %204, %197 : vector<16x512xf32>
    %cst_72 = arith.constant -0.284496725 : f32
    %206 = vector.broadcast %cst_72 : f32 to vector<16x512xf32>
    %207 = arith.addf %205, %206 : vector<16x512xf32>
    %208 = arith.mulf %207, %197 : vector<16x512xf32>
    %cst_73 = arith.constant 0.254829586 : f32
    %209 = vector.broadcast %cst_73 : f32 to vector<16x512xf32>
    %210 = arith.addf %208, %209 : vector<16x512xf32>
    %211 = arith.mulf %210, %197 : vector<16x512xf32>
    %cst_74 = arith.constant 0.000000e+00 : f32
    %212 = vector.broadcast %cst_74 : f32 to vector<16x512xf32>
    %213 = arith.subf %212, %191 : vector<16x512xf32>
    %214 = arith.mulf %213, %191 : vector<16x512xf32>
    %215 = math.exp %214 : vector<16x512xf32>
    %216 = arith.mulf %211, %215 : vector<16x512xf32>
    %cst_75 = arith.constant 1.000000e+00 : f32
    %217 = vector.broadcast %cst_75 : f32 to vector<16x512xf32>
    %218 = arith.subf %217, %216 : vector<16x512xf32>
    %cst_76 = arith.constant 0.000000e+00 : f32
    %219 = vector.broadcast %cst_76 : f32 to vector<16x512xf32>
    %220 = arith.cmpf oge, %190, %219 : vector<16x512xf32>
    %cst_77 = arith.constant 0.000000e+00 : f32
    %221 = vector.broadcast %cst_77 : f32 to vector<16x512xf32>
    %222 = arith.subf %221, %218 : vector<16x512xf32>
    %223 = arith.select %220, %218, %222 : vector<16x512xi1>, vector<16x512xf32>
    %cst_78 = arith.constant 1.000000e+00 : f32
    %224 = vector.broadcast %cst_78 : f32 to vector<16x512xf32>
    %225 = arith.addf %224, %223 : vector<16x512xf32>
    %226 = arith.mulf %188, %225 : vector<16x512xf32>
    %227 = arith.truncf %226 : vector<16x512xf32> to vector<16x512xbf16>
    %c0_79 = arith.constant 0 : index
    %c0_80 = arith.constant 0 : index
    %c0_81 = arith.constant 0 : index
    %228 = vector.load %arg3[%c0_79, %c0_80, %c0_81] : memref<2x512x128xbf16, #tpu.memory_space<vmem>>, vector<1x512x128xbf16>
    %229 = vector.shape_cast %228 : vector<1x512x128xbf16> to vector<512x128xbf16>
    %cst_82 = arith.constant dense<0.000000e+00> : vector<16x128xf32>
    %230 = tpu.matmul %227, %229, %cst_82 {dimension_numbers = #tpu.dot_dimension_numbers<[1], [0], [0], [1], [0, 0, 1, 1], [], []>} : vector<16x512xbf16>, vector<512x128xbf16>, vector<16x128xf32> -> vector<16x128xf32>
    %c0_83 = arith.constant 0 : index
    %c3 = arith.constant 3 : index
    %c0_84 = arith.constant 0 : index
    %231 = vector.load %arg6[%c0_83, %c3, %c0_84] : memref<2x6x128xf32, #tpu.memory_space<vmem>>, vector<1x1x128xf32>
    %232 = vector.shape_cast %231 : vector<1x1x128xf32> to vector<1x128xf32>
    %233 = vector.broadcast %232 : vector<1x128xf32> to vector<16x128xf32>
    %234 = arith.addf %230, %233 : vector<16x128xf32>
    %235 = arith.addf %178, %234 : vector<16x128xf32>
    %c0_85 = arith.constant 0 : index
    %c4 = arith.constant 4 : index
    %c0_86 = arith.constant 0 : index
    %236 = vector.load %arg6[%c0_85, %c4, %c0_86] : memref<2x6x128xf32, #tpu.memory_space<vmem>>, vector<1x1x128xf32>
    %237 = vector.shape_cast %236 : vector<1x1x128xf32> to vector<1x128xf32>
    %c0_87 = arith.constant 0 : index
    %c5 = arith.constant 5 : index
    %c0_88 = arith.constant 0 : index
    %238 = vector.load %arg6[%c0_87, %c5, %c0_88] : memref<2x6x128xf32, #tpu.memory_space<vmem>>, vector<1x1x128xf32>
    %239 = vector.shape_cast %238 : vector<1x1x128xf32> to vector<1x128xf32>
    %cst_89 = arith.constant dense<0.000000e+00> : vector<16xf32>
    %240 = vector.multi_reduction <add>, %235, %cst_89 [1] : vector<16x128xf32> to vector<16xf32>
    %241 = vector.shape_cast %240 : vector<16xf32> to vector<16x1xf32>
    %cst_90 = arith.constant 1.280000e+02 : f32
    %242 = vector.broadcast %cst_90 : f32 to vector<16x1xf32>
    %243 = arith.divf %241, %242 : vector<16x1xf32>
    %244 = vector.broadcast %243 : vector<16x1xf32> to vector<16x128xf32>
    %245 = arith.subf %235, %244 : vector<16x128xf32>
    %246 = arith.mulf %245, %245 : vector<16x128xf32>
    %cst_91 = arith.constant dense<0.000000e+00> : vector<16xf32>
    %247 = vector.multi_reduction <add>, %246, %cst_91 [1] : vector<16x128xf32> to vector<16xf32>
    %248 = vector.shape_cast %247 : vector<16xf32> to vector<16x1xf32>
    %cst_92 = arith.constant 1.280000e+02 : f32
    %249 = vector.broadcast %cst_92 : f32 to vector<16x1xf32>
    %250 = arith.divf %248, %249 : vector<16x1xf32>
    %251 = vector.broadcast %243 : vector<16x1xf32> to vector<16x128xf32>
    %252 = arith.subf %235, %251 : vector<16x128xf32>
    %cst_93 = arith.constant 9.99999996E-13 : f32
    %253 = vector.broadcast %cst_93 : f32 to vector<16x1xf32>
    %254 = arith.addf %250, %253 : vector<16x1xf32>
    %255 = math.rsqrt %254 : vector<16x1xf32>
    %256 = vector.broadcast %255 : vector<16x1xf32> to vector<16x128xf32>
    %257 = arith.mulf %252, %256 : vector<16x128xf32>
    %258 = vector.broadcast %237 : vector<1x128xf32> to vector<16x128xf32>
    %259 = arith.mulf %257, %258 : vector<16x128xf32>
    %260 = vector.broadcast %239 : vector<1x128xf32> to vector<16x128xf32>
    %261 = arith.addf %259, %260 : vector<16x128xf32>
    %262 = arith.truncf %261 : vector<16x128xf32> to vector<16x128xbf16>
    %c1_94 = arith.constant 1 : index
    %c0_95 = arith.constant 0 : index
    %c0_96 = arith.constant 0 : index
    %263 = vector.load %arg2[%c1_94, %c0_95, %c0_96] : memref<2x128x1024xbf16, #tpu.memory_space<vmem>>, vector<1x128x384xbf16>
    %264 = vector.shape_cast %263 : vector<1x128x384xbf16> to vector<128x384xbf16>
    %cst_97 = arith.constant dense<0.000000e+00> : vector<16x384xf32>
    %265 = tpu.matmul %262, %264, %cst_97 {dimension_numbers = #tpu.dot_dimension_numbers<[1], [0], [0], [1], [0, 0, 1, 1], [], []>} : vector<16x128xbf16>, vector<128x384xbf16>, vector<16x384xf32> -> vector<16x384xf32>
    %c1_98 = arith.constant 1 : index
    %c0_99 = arith.constant 0 : index
    %c0_100 = arith.constant 0 : index
    %266 = vector.load %arg4[%c1_98, %c0_99, %c0_100] : memref<2x1x384xf32, #tpu.memory_space<vmem>>, vector<1x1x384xf32>
    %267 = vector.shape_cast %266 : vector<1x1x384xf32> to vector<1x384xf32>
    %268 = vector.broadcast %267 : vector<1x384xf32> to vector<16x384xf32>
    %269 = arith.addf %265, %268 : vector<16x384xf32>
    %270 = vector.extract_strided_slice %269 {offsets = [0, 0], sizes = [16, 128], strides = [1, 1]} : vector<16x384xf32> to vector<16x128xf32>
    %271 = vector.shape_cast %270 : vector<16x128xf32> to vector<2x8x128xf32>
    %272 = vector.extract_strided_slice %269 {offsets = [0, 128], sizes = [16, 128], strides = [1, 1]} : vector<16x384xf32> to vector<16x128xf32>
    %273 = vector.shape_cast %272 : vector<16x128xf32> to vector<2x8x128xf32>
    %274 = vector.extract_strided_slice %269 {offsets = [0, 256], sizes = [16, 128], strides = [1, 1]} : vector<16x384xf32> to vector<16x128xf32>
    %275 = vector.shape_cast %274 : vector<16x128xf32> to vector<2x8x128xf32>
    %276 = vector.extract_strided_slice %271 {offsets = [0, 0, 0], sizes = [2, 8, 32], strides = [1, 1, 1]} : vector<2x8x128xf32> to vector<2x8x32xf32>
    %277 = arith.truncf %276 : vector<2x8x32xf32> to vector<2x8x32xbf16>
    %278 = vector.extract_strided_slice %273 {offsets = [0, 0, 0], sizes = [2, 8, 32], strides = [1, 1, 1]} : vector<2x8x128xf32> to vector<2x8x32xf32>
    %279 = arith.truncf %278 : vector<2x8x32xf32> to vector<2x8x32xbf16>
    %280 = vector.extract_strided_slice %275 {offsets = [0, 0, 0], sizes = [2, 8, 32], strides = [1, 1, 1]} : vector<2x8x128xf32> to vector<2x8x32xf32>
    %281 = arith.truncf %280 : vector<2x8x32xf32> to vector<2x8x32xbf16>
    "tpu.trace_start"() <{level = 10 : i32, message = "bqd,bkd->bqk"}> : () -> ()
    %cst_101 = arith.constant dense<0.000000e+00> : vector<2x8x8xf32>
    %282 = tpu.matmul %277, %279, %cst_101 {dimension_numbers = #tpu.dot_dimension_numbers<[2], [2], [1], [1], [0, 0, 0, 1, 1, 1], [0], [0]>} : vector<2x8x32xbf16>, vector<2x8x32xbf16>, vector<2x8x8xf32> -> vector<2x8x8xf32>
    "tpu.trace_stop"() : () -> ()
    %283 = vector.broadcast %26 : vector<2x1x8xf32> to vector<2x8x8xf32>
    %284 = arith.addf %282, %283 : vector<2x8x8xf32>
    %cst_102 = arith.constant dense<0xFF800000> : vector<2x8xf32>
    %285 = vector.multi_reduction <maximumf>, %284, %cst_102 [2] : vector<2x8x8xf32> to vector<2x8xf32>
    %286 = vector.shape_cast %285 : vector<2x8xf32> to vector<2x8x1xf32>
    %287 = vector.broadcast %286 : vector<2x8x1xf32> to vector<2x8x8xf32>
    %288 = arith.subf %284, %287 : vector<2x8x8xf32>
    %289 = math.exp %288 : vector<2x8x8xf32>
    %cst_103 = arith.constant dense<0.000000e+00> : vector<2x8xf32>
    %290 = vector.multi_reduction <add>, %289, %cst_103 [2] : vector<2x8x8xf32> to vector<2x8xf32>
    %291 = vector.shape_cast %290 : vector<2x8xf32> to vector<2x8x1xf32>
    %292 = tpu.reciprocal %291 {approx = true} : vector<2x8x1xf32> -> vector<2x8x1xf32>
    %293 = vector.broadcast %292 : vector<2x8x1xf32> to vector<2x8x8xf32>
    %294 = arith.mulf %289, %293 : vector<2x8x8xf32>
    %295 = arith.truncf %294 : vector<2x8x8xf32> to vector<2x8x8xbf16>
    "tpu.trace_start"() <{level = 10 : i32, message = "bqk,bkd->bqd"}> : () -> ()
    %cst_104 = arith.constant dense<0.000000e+00> : vector<2x8x32xf32>
    %296 = tpu.matmul %295, %281, %cst_104 {dimension_numbers = #tpu.dot_dimension_numbers<[2], [1], [1], [2], [0, 0, 0, 1, 1, 2], [0], [0]>} : vector<2x8x8xbf16>, vector<2x8x32xbf16>, vector<2x8x32xf32> -> vector<2x8x32xf32>
    "tpu.trace_stop"() : () -> ()
    %297 = vector.shape_cast %296 : vector<2x8x32xf32> to vector<16x32xf32>
    %c1_105 = arith.constant 1 : index
    %c0_106 = arith.constant 0 : index
    %c384_107 = arith.constant 384 : index
    %298 = vector.load %arg2[%c1_105, %c0_106, %c384_107] : memref<2x128x1024xbf16, #tpu.memory_space<vmem>>, vector<1x32x128xbf16>
    %299 = vector.shape_cast %298 : vector<1x32x128xbf16> to vector<32x128xbf16>
    %300 = arith.truncf %297 : vector<16x32xf32> to vector<16x32xbf16>
    %cst_108 = arith.constant dense<0.000000e+00> : vector<16x128xf32>
    %301 = tpu.matmul %300, %299, %cst_108 {dimension_numbers = #tpu.dot_dimension_numbers<[1], [0], [0], [1], [0, 0, 1, 1], [], []>} : vector<16x32xbf16>, vector<32x128xbf16>, vector<16x128xf32> -> vector<16x128xf32>
    %302 = vector.extract_strided_slice %271 {offsets = [0, 0, 32], sizes = [2, 8, 32], strides = [1, 1, 1]} : vector<2x8x128xf32> to vector<2x8x32xf32>
    %303 = arith.truncf %302 : vector<2x8x32xf32> to vector<2x8x32xbf16>
    %304 = vector.extract_strided_slice %273 {offsets = [0, 0, 32], sizes = [2, 8, 32], strides = [1, 1, 1]} : vector<2x8x128xf32> to vector<2x8x32xf32>
    %305 = arith.truncf %304 : vector<2x8x32xf32> to vector<2x8x32xbf16>
    %306 = vector.extract_strided_slice %275 {offsets = [0, 0, 32], sizes = [2, 8, 32], strides = [1, 1, 1]} : vector<2x8x128xf32> to vector<2x8x32xf32>
    %307 = arith.truncf %306 : vector<2x8x32xf32> to vector<2x8x32xbf16>
    "tpu.trace_start"() <{level = 10 : i32, message = "bqd,bkd->bqk"}> : () -> ()
    %cst_109 = arith.constant dense<0.000000e+00> : vector<2x8x8xf32>
    %308 = tpu.matmul %303, %305, %cst_109 {dimension_numbers = #tpu.dot_dimension_numbers<[2], [2], [1], [1], [0, 0, 0, 1, 1, 1], [0], [0]>} : vector<2x8x32xbf16>, vector<2x8x32xbf16>, vector<2x8x8xf32> -> vector<2x8x8xf32>
    "tpu.trace_stop"() : () -> ()
    %309 = vector.broadcast %26 : vector<2x1x8xf32> to vector<2x8x8xf32>
    %310 = arith.addf %308, %309 : vector<2x8x8xf32>
    %cst_110 = arith.constant dense<0xFF800000> : vector<2x8xf32>
    %311 = vector.multi_reduction <maximumf>, %310, %cst_110 [2] : vector<2x8x8xf32> to vector<2x8xf32>
    %312 = vector.shape_cast %311 : vector<2x8xf32> to vector<2x8x1xf32>
    %313 = vector.broadcast %312 : vector<2x8x1xf32> to vector<2x8x8xf32>
    %314 = arith.subf %310, %313 : vector<2x8x8xf32>
    %315 = math.exp %314 : vector<2x8x8xf32>
    %cst_111 = arith.constant dense<0.000000e+00> : vector<2x8xf32>
    %316 = vector.multi_reduction <add>, %315, %cst_111 [2] : vector<2x8x8xf32> to vector<2x8xf32>
    %317 = vector.shape_cast %316 : vector<2x8xf32> to vector<2x8x1xf32>
    %318 = tpu.reciprocal %317 {approx = true} : vector<2x8x1xf32> -> vector<2x8x1xf32>
    %319 = vector.broadcast %318 : vector<2x8x1xf32> to vector<2x8x8xf32>
    %320 = arith.mulf %315, %319 : vector<2x8x8xf32>
    %321 = arith.truncf %320 : vector<2x8x8xf32> to vector<2x8x8xbf16>
    "tpu.trace_start"() <{level = 10 : i32, message = "bqk,bkd->bqd"}> : () -> ()
    %cst_112 = arith.constant dense<0.000000e+00> : vector<2x8x32xf32>
    %322 = tpu.matmul %321, %307, %cst_112 {dimension_numbers = #tpu.dot_dimension_numbers<[2], [1], [1], [2], [0, 0, 0, 1, 1, 2], [0], [0]>} : vector<2x8x8xbf16>, vector<2x8x32xbf16>, vector<2x8x32xf32> -> vector<2x8x32xf32>
    "tpu.trace_stop"() : () -> ()
    %323 = vector.shape_cast %322 : vector<2x8x32xf32> to vector<16x32xf32>
    %c1_113 = arith.constant 1 : index
    %c32_114 = arith.constant 32 : index
    %c384_115 = arith.constant 384 : index
    %324 = vector.load %arg2[%c1_113, %c32_114, %c384_115] : memref<2x128x1024xbf16, #tpu.memory_space<vmem>>, vector<1x32x128xbf16>
    %325 = vector.shape_cast %324 : vector<1x32x128xbf16> to vector<32x128xbf16>
    %326 = arith.truncf %323 : vector<16x32xf32> to vector<16x32xbf16>
    %cst_116 = arith.constant dense<0.000000e+00> : vector<16x128xf32>
    %327 = tpu.matmul %326, %325, %cst_116 {dimension_numbers = #tpu.dot_dimension_numbers<[1], [0], [0], [1], [0, 0, 1, 1], [], []>} : vector<16x32xbf16>, vector<32x128xbf16>, vector<16x128xf32> -> vector<16x128xf32>
    %328 = arith.addf %301, %327 : vector<16x128xf32>
    %329 = vector.extract_strided_slice %271 {offsets = [0, 0, 64], sizes = [2, 8, 32], strides = [1, 1, 1]} : vector<2x8x128xf32> to vector<2x8x32xf32>
    %330 = arith.truncf %329 : vector<2x8x32xf32> to vector<2x8x32xbf16>
    %331 = vector.extract_strided_slice %273 {offsets = [0, 0, 64], sizes = [2, 8, 32], strides = [1, 1, 1]} : vector<2x8x128xf32> to vector<2x8x32xf32>
    %332 = arith.truncf %331 : vector<2x8x32xf32> to vector<2x8x32xbf16>
    %333 = vector.extract_strided_slice %275 {offsets = [0, 0, 64], sizes = [2, 8, 32], strides = [1, 1, 1]} : vector<2x8x128xf32> to vector<2x8x32xf32>
    %334 = arith.truncf %333 : vector<2x8x32xf32> to vector<2x8x32xbf16>
    "tpu.trace_start"() <{level = 10 : i32, message = "bqd,bkd->bqk"}> : () -> ()
    %cst_117 = arith.constant dense<0.000000e+00> : vector<2x8x8xf32>
    %335 = tpu.matmul %330, %332, %cst_117 {dimension_numbers = #tpu.dot_dimension_numbers<[2], [2], [1], [1], [0, 0, 0, 1, 1, 1], [0], [0]>} : vector<2x8x32xbf16>, vector<2x8x32xbf16>, vector<2x8x8xf32> -> vector<2x8x8xf32>
    "tpu.trace_stop"() : () -> ()
    %336 = vector.broadcast %26 : vector<2x1x8xf32> to vector<2x8x8xf32>
    %337 = arith.addf %335, %336 : vector<2x8x8xf32>
    %cst_118 = arith.constant dense<0xFF800000> : vector<2x8xf32>
    %338 = vector.multi_reduction <maximumf>, %337, %cst_118 [2] : vector<2x8x8xf32> to vector<2x8xf32>
    %339 = vector.shape_cast %338 : vector<2x8xf32> to vector<2x8x1xf32>
    %340 = vector.broadcast %339 : vector<2x8x1xf32> to vector<2x8x8xf32>
    %341 = arith.subf %337, %340 : vector<2x8x8xf32>
    %342 = math.exp %341 : vector<2x8x8xf32>
    %cst_119 = arith.constant dense<0.000000e+00> : vector<2x8xf32>
    %343 = vector.multi_reduction <add>, %342, %cst_119 [2] : vector<2x8x8xf32> to vector<2x8xf32>
    %344 = vector.shape_cast %343 : vector<2x8xf32> to vector<2x8x1xf32>
    %345 = tpu.reciprocal %344 {approx = true} : vector<2x8x1xf32> -> vector<2x8x1xf32>
    %346 = vector.broadcast %345 : vector<2x8x1xf32> to vector<2x8x8xf32>
    %347 = arith.mulf %342, %346 : vector<2x8x8xf32>
    %348 = arith.truncf %347 : vector<2x8x8xf32> to vector<2x8x8xbf16>
    "tpu.trace_start"() <{level = 10 : i32, message = "bqk,bkd->bqd"}> : () -> ()
    %cst_120 = arith.constant dense<0.000000e+00> : vector<2x8x32xf32>
    %349 = tpu.matmul %348, %334, %cst_120 {dimension_numbers = #tpu.dot_dimension_numbers<[2], [1], [1], [2], [0, 0, 0, 1, 1, 2], [0], [0]>} : vector<2x8x8xbf16>, vector<2x8x32xbf16>, vector<2x8x32xf32> -> vector<2x8x32xf32>
    "tpu.trace_stop"() : () -> ()
    %350 = vector.shape_cast %349 : vector<2x8x32xf32> to vector<16x32xf32>
    %c1_121 = arith.constant 1 : index
    %c64_122 = arith.constant 64 : index
    %c384_123 = arith.constant 384 : index
    %351 = vector.load %arg2[%c1_121, %c64_122, %c384_123] : memref<2x128x1024xbf16, #tpu.memory_space<vmem>>, vector<1x32x128xbf16>
    %352 = vector.shape_cast %351 : vector<1x32x128xbf16> to vector<32x128xbf16>
    %353 = arith.truncf %350 : vector<16x32xf32> to vector<16x32xbf16>
    %cst_124 = arith.constant dense<0.000000e+00> : vector<16x128xf32>
    %354 = tpu.matmul %353, %352, %cst_124 {dimension_numbers = #tpu.dot_dimension_numbers<[1], [0], [0], [1], [0, 0, 1, 1], [], []>} : vector<16x32xbf16>, vector<32x128xbf16>, vector<16x128xf32> -> vector<16x128xf32>
    %355 = arith.addf %328, %354 : vector<16x128xf32>
    %356 = vector.extract_strided_slice %271 {offsets = [0, 0, 96], sizes = [2, 8, 32], strides = [1, 1, 1]} : vector<2x8x128xf32> to vector<2x8x32xf32>
    %357 = arith.truncf %356 : vector<2x8x32xf32> to vector<2x8x32xbf16>
    %358 = vector.extract_strided_slice %273 {offsets = [0, 0, 96], sizes = [2, 8, 32], strides = [1, 1, 1]} : vector<2x8x128xf32> to vector<2x8x32xf32>
    %359 = arith.truncf %358 : vector<2x8x32xf32> to vector<2x8x32xbf16>
    %360 = vector.extract_strided_slice %275 {offsets = [0, 0, 96], sizes = [2, 8, 32], strides = [1, 1, 1]} : vector<2x8x128xf32> to vector<2x8x32xf32>
    %361 = arith.truncf %360 : vector<2x8x32xf32> to vector<2x8x32xbf16>
    "tpu.trace_start"() <{level = 10 : i32, message = "bqd,bkd->bqk"}> : () -> ()
    %cst_125 = arith.constant dense<0.000000e+00> : vector<2x8x8xf32>
    %362 = tpu.matmul %357, %359, %cst_125 {dimension_numbers = #tpu.dot_dimension_numbers<[2], [2], [1], [1], [0, 0, 0, 1, 1, 1], [0], [0]>} : vector<2x8x32xbf16>, vector<2x8x32xbf16>, vector<2x8x8xf32> -> vector<2x8x8xf32>
    "tpu.trace_stop"() : () -> ()
    %363 = vector.broadcast %26 : vector<2x1x8xf32> to vector<2x8x8xf32>
    %364 = arith.addf %362, %363 : vector<2x8x8xf32>
    %cst_126 = arith.constant dense<0xFF800000> : vector<2x8xf32>
    %365 = vector.multi_reduction <maximumf>, %364, %cst_126 [2] : vector<2x8x8xf32> to vector<2x8xf32>
    %366 = vector.shape_cast %365 : vector<2x8xf32> to vector<2x8x1xf32>
    %367 = vector.broadcast %366 : vector<2x8x1xf32> to vector<2x8x8xf32>
    %368 = arith.subf %364, %367 : vector<2x8x8xf32>
    %369 = math.exp %368 : vector<2x8x8xf32>
    %cst_127 = arith.constant dense<0.000000e+00> : vector<2x8xf32>
    %370 = vector.multi_reduction <add>, %369, %cst_127 [2] : vector<2x8x8xf32> to vector<2x8xf32>
    %371 = vector.shape_cast %370 : vector<2x8xf32> to vector<2x8x1xf32>
    %372 = tpu.reciprocal %371 {approx = true} : vector<2x8x1xf32> -> vector<2x8x1xf32>
    %373 = vector.broadcast %372 : vector<2x8x1xf32> to vector<2x8x8xf32>
    %374 = arith.mulf %369, %373 : vector<2x8x8xf32>
    %375 = arith.truncf %374 : vector<2x8x8xf32> to vector<2x8x8xbf16>
    "tpu.trace_start"() <{level = 10 : i32, message = "bqk,bkd->bqd"}> : () -> ()
    %cst_128 = arith.constant dense<0.000000e+00> : vector<2x8x32xf32>
    %376 = tpu.matmul %375, %361, %cst_128 {dimension_numbers = #tpu.dot_dimension_numbers<[2], [1], [1], [2], [0, 0, 0, 1, 1, 2], [0], [0]>} : vector<2x8x8xbf16>, vector<2x8x32xbf16>, vector<2x8x32xf32> -> vector<2x8x32xf32>
    "tpu.trace_stop"() : () -> ()
    %377 = vector.shape_cast %376 : vector<2x8x32xf32> to vector<16x32xf32>
    %c1_129 = arith.constant 1 : index
    %c96_130 = arith.constant 96 : index
    %c384_131 = arith.constant 384 : index
    %378 = vector.load %arg2[%c1_129, %c96_130, %c384_131] : memref<2x128x1024xbf16, #tpu.memory_space<vmem>>, vector<1x32x128xbf16>
    %379 = vector.shape_cast %378 : vector<1x32x128xbf16> to vector<32x128xbf16>
    %380 = arith.truncf %377 : vector<16x32xf32> to vector<16x32xbf16>
    %cst_132 = arith.constant dense<0.000000e+00> : vector<16x128xf32>
    %381 = tpu.matmul %380, %379, %cst_132 {dimension_numbers = #tpu.dot_dimension_numbers<[1], [0], [0], [1], [0, 0, 1, 1], [], []>} : vector<16x32xbf16>, vector<32x128xbf16>, vector<16x128xf32> -> vector<16x128xf32>
    %382 = arith.addf %355, %381 : vector<16x128xf32>
    %c1_133 = arith.constant 1 : index
    %c0_134 = arith.constant 0 : index
    %c0_135 = arith.constant 0 : index
    %383 = vector.load %arg6[%c1_133, %c0_134, %c0_135] : memref<2x6x128xf32, #tpu.memory_space<vmem>>, vector<1x1x128xf32>
    %384 = vector.shape_cast %383 : vector<1x1x128xf32> to vector<1x128xf32>
    %385 = vector.broadcast %384 : vector<1x128xf32> to vector<16x128xf32>
    %386 = arith.addf %382, %385 : vector<16x128xf32>
    %387 = arith.addf %261, %386 : vector<16x128xf32>
    %c1_136 = arith.constant 1 : index
    %c1_137 = arith.constant 1 : index
    %c0_138 = arith.constant 0 : index
    %388 = vector.load %arg6[%c1_136, %c1_137, %c0_138] : memref<2x6x128xf32, #tpu.memory_space<vmem>>, vector<1x1x128xf32>
    %389 = vector.shape_cast %388 : vector<1x1x128xf32> to vector<1x128xf32>
    %c1_139 = arith.constant 1 : index
    %c2_140 = arith.constant 2 : index
    %c0_141 = arith.constant 0 : index
    %390 = vector.load %arg6[%c1_139, %c2_140, %c0_141] : memref<2x6x128xf32, #tpu.memory_space<vmem>>, vector<1x1x128xf32>
    %391 = vector.shape_cast %390 : vector<1x1x128xf32> to vector<1x128xf32>
    %cst_142 = arith.constant dense<0.000000e+00> : vector<16xf32>
    %392 = vector.multi_reduction <add>, %387, %cst_142 [1] : vector<16x128xf32> to vector<16xf32>
    %393 = vector.shape_cast %392 : vector<16xf32> to vector<16x1xf32>
    %cst_143 = arith.constant 1.280000e+02 : f32
    %394 = vector.broadcast %cst_143 : f32 to vector<16x1xf32>
    %395 = arith.divf %393, %394 : vector<16x1xf32>
    %396 = vector.broadcast %395 : vector<16x1xf32> to vector<16x128xf32>
    %397 = arith.subf %387, %396 : vector<16x128xf32>
    %398 = arith.mulf %397, %397 : vector<16x128xf32>
    %cst_144 = arith.constant dense<0.000000e+00> : vector<16xf32>
    %399 = vector.multi_reduction <add>, %398, %cst_144 [1] : vector<16x128xf32> to vector<16xf32>
    %400 = vector.shape_cast %399 : vector<16xf32> to vector<16x1xf32>
    %cst_145 = arith.constant 1.280000e+02 : f32
    %401 = vector.broadcast %cst_145 : f32 to vector<16x1xf32>
    %402 = arith.divf %400, %401 : vector<16x1xf32>
    %403 = vector.broadcast %395 : vector<16x1xf32> to vector<16x128xf32>
    %404 = arith.subf %387, %403 : vector<16x128xf32>
    %cst_146 = arith.constant 9.99999996E-13 : f32
    %405 = vector.broadcast %cst_146 : f32 to vector<16x1xf32>
    %406 = arith.addf %402, %405 : vector<16x1xf32>
    %407 = math.rsqrt %406 : vector<16x1xf32>
    %408 = vector.broadcast %407 : vector<16x1xf32> to vector<16x128xf32>
    %409 = arith.mulf %404, %408 : vector<16x128xf32>
    %410 = vector.broadcast %389 : vector<1x128xf32> to vector<16x128xf32>
    %411 = arith.mulf %409, %410 : vector<16x128xf32>
    %412 = vector.broadcast %391 : vector<1x128xf32> to vector<16x128xf32>
    %413 = arith.addf %411, %412 : vector<16x128xf32>
    %414 = arith.truncf %413 : vector<16x128xf32> to vector<16x128xbf16>
    %c1_147 = arith.constant 1 : index
    %c0_148 = arith.constant 0 : index
    %c512_149 = arith.constant 512 : index
    %415 = vector.load %arg2[%c1_147, %c0_148, %c512_149] : memref<2x128x1024xbf16, #tpu.memory_space<vmem>>, vector<1x128x512xbf16>
    %416 = vector.shape_cast %415 : vector<1x128x512xbf16> to vector<128x512xbf16>
    %cst_150 = arith.constant dense<0.000000e+00> : vector<16x512xf32>
    %417 = tpu.matmul %414, %416, %cst_150 {dimension_numbers = #tpu.dot_dimension_numbers<[1], [0], [0], [1], [0, 0, 1, 1], [], []>} : vector<16x128xbf16>, vector<128x512xbf16>, vector<16x512xf32> -> vector<16x512xf32>
    %c1_151 = arith.constant 1 : index
    %c0_152 = arith.constant 0 : index
    %c0_153 = arith.constant 0 : index
    %418 = vector.load %arg5[%c1_151, %c0_152, %c0_153] : memref<2x1x512xf32, #tpu.memory_space<vmem>>, vector<1x1x512xf32>
    %419 = vector.shape_cast %418 : vector<1x1x512xf32> to vector<1x512xf32>
    %420 = vector.broadcast %419 : vector<1x512xf32> to vector<16x512xf32>
    %421 = arith.addf %417, %420 : vector<16x512xf32>
    %cst_154 = arith.constant 5.000000e-01 : f32
    %422 = vector.broadcast %cst_154 : f32 to vector<16x512xf32>
    %423 = arith.mulf %422, %421 : vector<16x512xf32>
    %cst_155 = arith.constant 0.707106769 : f32
    %424 = vector.broadcast %cst_155 : f32 to vector<16x512xf32>
    %425 = arith.mulf %421, %424 : vector<16x512xf32>
    %426 = math.absf %425 : vector<16x512xf32>
    %cst_156 = arith.constant 0.327591091 : f32
    %427 = vector.broadcast %cst_156 : f32 to vector<16x512xf32>
    %428 = arith.mulf %427, %426 : vector<16x512xf32>
    %cst_157 = arith.constant 1.000000e+00 : f32
    %429 = vector.broadcast %cst_157 : f32 to vector<16x512xf32>
    %430 = arith.addf %429, %428 : vector<16x512xf32>
    %cst_158 = arith.constant 1.000000e+00 : f32
    %431 = vector.broadcast %cst_158 : f32 to vector<16x512xf32>
    %432 = arith.divf %431, %430 : vector<16x512xf32>
    %cst_159 = arith.constant 1.06140542 : f32
    %433 = vector.broadcast %cst_159 : f32 to vector<16x512xf32>
    %434 = arith.mulf %433, %432 : vector<16x512xf32>
    %cst_160 = arith.constant -1.45315206 : f32
    %435 = vector.broadcast %cst_160 : f32 to vector<16x512xf32>
    %436 = arith.addf %434, %435 : vector<16x512xf32>
    %437 = arith.mulf %436, %432 : vector<16x512xf32>
    %cst_161 = arith.constant 1.42141378 : f32
    %438 = vector.broadcast %cst_161 : f32 to vector<16x512xf32>
    %439 = arith.addf %437, %438 : vector<16x512xf32>
    %440 = arith.mulf %439, %432 : vector<16x512xf32>
    %cst_162 = arith.constant -0.284496725 : f32
    %441 = vector.broadcast %cst_162 : f32 to vector<16x512xf32>
    %442 = arith.addf %440, %441 : vector<16x512xf32>
    %443 = arith.mulf %442, %432 : vector<16x512xf32>
    %cst_163 = arith.constant 0.254829586 : f32
    %444 = vector.broadcast %cst_163 : f32 to vector<16x512xf32>
    %445 = arith.addf %443, %444 : vector<16x512xf32>
    %446 = arith.mulf %445, %432 : vector<16x512xf32>
    %cst_164 = arith.constant 0.000000e+00 : f32
    %447 = vector.broadcast %cst_164 : f32 to vector<16x512xf32>
    %448 = arith.subf %447, %426 : vector<16x512xf32>
    %449 = arith.mulf %448, %426 : vector<16x512xf32>
    %450 = math.exp %449 : vector<16x512xf32>
    %451 = arith.mulf %446, %450 : vector<16x512xf32>
    %cst_165 = arith.constant 1.000000e+00 : f32
    %452 = vector.broadcast %cst_165 : f32 to vector<16x512xf32>
    %453 = arith.subf %452, %451 : vector<16x512xf32>
    %cst_166 = arith.constant 0.000000e+00 : f32
    %454 = vector.broadcast %cst_166 : f32 to vector<16x512xf32>
    %455 = arith.cmpf oge, %425, %454 : vector<16x512xf32>
    %cst_167 = arith.constant 0.000000e+00 : f32
    %456 = vector.broadcast %cst_167 : f32 to vector<16x512xf32>
    %457 = arith.subf %456, %453 : vector<16x512xf32>
    %458 = arith.select %455, %453, %457 : vector<16x512xi1>, vector<16x512xf32>
    %cst_168 = arith.constant 1.000000e+00 : f32
    %459 = vector.broadcast %cst_168 : f32 to vector<16x512xf32>
    %460 = arith.addf %459, %458 : vector<16x512xf32>
    %461 = arith.mulf %423, %460 : vector<16x512xf32>
    %462 = arith.truncf %461 : vector<16x512xf32> to vector<16x512xbf16>
    %c1_169 = arith.constant 1 : index
    %c0_170 = arith.constant 0 : index
    %c0_171 = arith.constant 0 : index
    %463 = vector.load %arg3[%c1_169, %c0_170, %c0_171] : memref<2x512x128xbf16, #tpu.memory_space<vmem>>, vector<1x512x128xbf16>
    %464 = vector.shape_cast %463 : vector<1x512x128xbf16> to vector<512x128xbf16>
    %cst_172 = arith.constant dense<0.000000e+00> : vector<16x128xf32>
    %465 = tpu.matmul %462, %464, %cst_172 {dimension_numbers = #tpu.dot_dimension_numbers<[1], [0], [0], [1], [0, 0, 1, 1], [], []>} : vector<16x512xbf16>, vector<512x128xbf16>, vector<16x128xf32> -> vector<16x128xf32>
    %c1_173 = arith.constant 1 : index
    %c3_174 = arith.constant 3 : index
    %c0_175 = arith.constant 0 : index
    %466 = vector.load %arg6[%c1_173, %c3_174, %c0_175] : memref<2x6x128xf32, #tpu.memory_space<vmem>>, vector<1x1x128xf32>
    %467 = vector.shape_cast %466 : vector<1x1x128xf32> to vector<1x128xf32>
    %468 = vector.broadcast %467 : vector<1x128xf32> to vector<16x128xf32>
    %469 = arith.addf %465, %468 : vector<16x128xf32>
    %470 = arith.addf %413, %469 : vector<16x128xf32>
    %c1_176 = arith.constant 1 : index
    %c4_177 = arith.constant 4 : index
    %c0_178 = arith.constant 0 : index
    %471 = vector.load %arg6[%c1_176, %c4_177, %c0_178] : memref<2x6x128xf32, #tpu.memory_space<vmem>>, vector<1x1x128xf32>
    %472 = vector.shape_cast %471 : vector<1x1x128xf32> to vector<1x128xf32>
    %c1_179 = arith.constant 1 : index
    %c5_180 = arith.constant 5 : index
    %c0_181 = arith.constant 0 : index
    %473 = vector.load %arg6[%c1_179, %c5_180, %c0_181] : memref<2x6x128xf32, #tpu.memory_space<vmem>>, vector<1x1x128xf32>
    %474 = vector.shape_cast %473 : vector<1x1x128xf32> to vector<1x128xf32>
    %cst_182 = arith.constant dense<0.000000e+00> : vector<16xf32>
    %475 = vector.multi_reduction <add>, %470, %cst_182 [1] : vector<16x128xf32> to vector<16xf32>
    %476 = vector.shape_cast %475 : vector<16xf32> to vector<16x1xf32>
    %cst_183 = arith.constant 1.280000e+02 : f32
    %477 = vector.broadcast %cst_183 : f32 to vector<16x1xf32>
    %478 = arith.divf %476, %477 : vector<16x1xf32>
    %479 = vector.broadcast %478 : vector<16x1xf32> to vector<16x128xf32>
    %480 = arith.subf %470, %479 : vector<16x128xf32>
    %481 = arith.mulf %480, %480 : vector<16x128xf32>
    %cst_184 = arith.constant dense<0.000000e+00> : vector<16xf32>
    %482 = vector.multi_reduction <add>, %481, %cst_184 [1] : vector<16x128xf32> to vector<16xf32>
    %483 = vector.shape_cast %482 : vector<16xf32> to vector<16x1xf32>
    %cst_185 = arith.constant 1.280000e+02 : f32
    %484 = vector.broadcast %cst_185 : f32 to vector<16x1xf32>
    %485 = arith.divf %483, %484 : vector<16x1xf32>
    %486 = vector.broadcast %478 : vector<16x1xf32> to vector<16x128xf32>
    %487 = arith.subf %470, %486 : vector<16x128xf32>
    %cst_186 = arith.constant 9.99999996E-13 : f32
    %488 = vector.broadcast %cst_186 : f32 to vector<16x1xf32>
    %489 = arith.addf %485, %488 : vector<16x1xf32>
    %490 = math.rsqrt %489 : vector<16x1xf32>
    %491 = vector.broadcast %490 : vector<16x1xf32> to vector<16x128xf32>
    %492 = arith.mulf %487, %491 : vector<16x128xf32>
    %493 = vector.broadcast %472 : vector<1x128xf32> to vector<16x128xf32>
    %494 = arith.mulf %492, %493 : vector<16x128xf32>
    %495 = vector.broadcast %474 : vector<1x128xf32> to vector<16x128xf32>
    %496 = arith.addf %494, %495 : vector<16x128xf32>
    %c0_187 = arith.constant 0 : index
    %c0_188 = arith.constant 0 : index
    %497 = vector.load %arg10[%c0_187, %c0_188] : memref<16x128xf32, #tpu.memory_space<vmem>>, vector<16x128xf32>
    tpu.vector_store %arg10[%c0_187, %c0_188], %496 {strides = array<i32>} : memref<16x128xf32, #tpu.memory_space<vmem>>, vector<16x128xf32>,
    %c0_189 = arith.constant 0 : index
    %c0_190 = arith.constant 0 : index
    %498 = tpu.strided_load %arg10[%c0_189, %c0_190] {strides = array<i32: 8, 1>} : memref<16x128xf32, #tpu.memory_space<vmem>>, vector<2x128xf32>
    %499 = arith.truncf %498 : vector<2x128xf32> to vector<2x128xbf16>
    %c0_191 = arith.constant 0 : index
    %c0_192 = arith.constant 0 : index
    %500 = vector.load %arg7[%c0_191, %c0_192] : memref<128x128xbf16, #tpu.memory_space<vmem>>, vector<128x128xbf16>
    %cst_193 = arith.constant dense<0.000000e+00> : vector<2x128xf32>
    %501 = tpu.matmul %499, %500, %cst_193 {dimension_numbers = #tpu.dot_dimension_numbers<[1], [0], [0], [1], [0, 0, 1, 1], [], []>} : vector<2x128xbf16>, vector<128x128xbf16>, vector<2x128xf32> -> vector<2x128xf32>
    %c2_194 = arith.constant 2 : index
    %c0_195 = arith.constant 0 : index
    %502 = vector.load %arg8[%c2_194, %c0_195] : memref<5x128xf32, #tpu.memory_space<vmem>>, vector<1x128xf32>
    %503 = vector.broadcast %502 : vector<1x128xf32> to vector<2x128xf32>
    %504 = arith.addf %501, %503 : vector<2x128xf32>
    %c3_196 = arith.constant 3 : index
    %c0_197 = arith.constant 0 : index
    %505 = vector.load %arg8[%c3_196, %c0_197] : memref<5x128xf32, #tpu.memory_space<vmem>>, vector<1x128xf32>
    %c4_198 = arith.constant 4 : index
    %c0_199 = arith.constant 0 : index
    %506 = vector.load %arg8[%c4_198, %c0_199] : memref<5x128xf32, #tpu.memory_space<vmem>>, vector<1x128xf32>
    %cst_200 = arith.constant dense<0.000000e+00> : vector<2xf32>
    %507 = vector.multi_reduction <add>, %504, %cst_200 [1] : vector<2x128xf32> to vector<2xf32>
    %508 = vector.shape_cast %507 : vector<2xf32> to vector<2x1xf32>
    %cst_201 = arith.constant 1.280000e+02 : f32
    %509 = vector.broadcast %cst_201 : f32 to vector<2x1xf32>
    %510 = arith.divf %508, %509 : vector<2x1xf32>
    %511 = vector.broadcast %510 : vector<2x1xf32> to vector<2x128xf32>
    %512 = arith.subf %504, %511 : vector<2x128xf32>
    %513 = arith.mulf %512, %512 : vector<2x128xf32>
    %cst_202 = arith.constant dense<0.000000e+00> : vector<2xf32>
    %514 = vector.multi_reduction <add>, %513, %cst_202 [1] : vector<2x128xf32> to vector<2xf32>
    %515 = vector.shape_cast %514 : vector<2xf32> to vector<2x1xf32>
    %cst_203 = arith.constant 1.280000e+02 : f32
    %516 = vector.broadcast %cst_203 : f32 to vector<2x1xf32>
    %517 = arith.divf %515, %516 : vector<2x1xf32>
    %518 = vector.broadcast %510 : vector<2x1xf32> to vector<2x128xf32>
    %519 = arith.subf %504, %518 : vector<2x128xf32>
    %cst_204 = arith.constant 9.99999974E-6 : f32
    %520 = vector.broadcast %cst_204 : f32 to vector<2x1xf32>
    %521 = arith.addf %517, %520 : vector<2x1xf32>
    %522 = math.rsqrt %521 : vector<2x1xf32>
    %523 = vector.broadcast %522 : vector<2x1xf32> to vector<2x128xf32>
    %524 = arith.mulf %519, %523 : vector<2x128xf32>
    %525 = vector.broadcast %505 : vector<1x128xf32> to vector<2x128xf32>
    %526 = arith.mulf %524, %525 : vector<2x128xf32>
    %527 = vector.broadcast %506 : vector<1x128xf32> to vector<2x128xf32>
    %528 = arith.addf %526, %527 : vector<2x128xf32>
    %c0_205 = arith.constant 0 : index
    %c0_206 = arith.constant 0 : index
    %529 = vector.load %arg9[%c0_205, %c0_206] : memref<2x128xf32, #tpu.memory_space<vmem>>, vector<2x128xf32>
    tpu.vector_store %arg9[%c0_205, %c0_206], %528 {strides = array<i32>} : memref<2x128xf32, #tpu.memory_space<vmem>>, vector<2x128xf32>,
    return
  }
}

</mosaic_0001>

<bundles_post_ra>
// kernel: clinical_text_processor_forward.1
= control target key start
LH: loop header
LB: loop body
LE: loop exit
PB: predicated region body
PF: predicated region fallthrough
CT: control target
= control target key end

     0   :  { %s7215_s0 = inlined_call_operand.vmem [shape: f32[16,128], index: 0, kind: input, shape index: {}]   ;;  %s7216_s1 = inlined_call_operand.vmem [shape: f32[2,8], index: 1, kind: input, shape index: {}]   ;;  %s7217_s2 = inlined_call_operand.vmem [shape: bf16[2,128,1024], index: 2, kind: input, shape index: {}]   ;;  %s7218_s3 = inlined_call_operand.vmem [shape: bf16[2,512,128], index: 3, kind: input, shape index: {}]   ;;  %s7219_s4 = inlined_call_operand.vmem [shape: f32[2,1,384], index: 4, kind: input, shape index: {}]   ;;  %s7220_s5 = inlined_call_operand.vmem [shape: f32[2,1,512], index: 5, kind: input, shape index: {}]   ;;  %s7221_s6 = inlined_call_operand.vmem [shape: f32[2,6,128], index: 6, kind: input, shape index: {}]   ;;  %s7222_s7 = inlined_call_operand.vmem [shape: bf16[128,128], index: 7, kind: input, shape index: {}]   ;;  %s7223_s8 = inlined_call_operand.vmem [shape: f32[5,128], index: 8, kind: input, shape index: {}]   ;;  %s7224_s9 = inlined_call_operand.hbm [shape: f32[2,128], index: 9, kind: output, shape index: {}]  }
   0x1   :  { %v34_v0 = vld [vmem:[%s7215_s0] sm:$0xff] }
   0x2   :  { %38 = vadd.xlane.f32.xlu0 %v34_v0 }
   0x3   :  { %14 = vsyncpa [#allocation4], 0  ;;  %v35_v1 = vld [vmem:[%s7215_s0 + $0x8] sm:$0xff]  ;;  %v5251_v2 = vmov 128.0   ;;  %v3945_v17 = vld [vmem:[%s7217_s2 + $0x1c0] sm:$0xf] }
   0x4   :  { %5073 = vrcp.f32 %v5251_v2  ;;  %v4873_v18 = vld [vmem:[%s7217_s2 + $0x1dc] sm:$0xf0]  ;;  %v4872_v19 = vld [vmem:[%s7217_s2 + $0x1c4] sm:$0xf]  ;;  %v3953_v22 = vld [vmem:[%s7217_s2 + $0x1c8] sm:$0xf] }
   0x5   :  { %v3946_v20 = vor.u32 %v4873_v18, %v3945_v17  ;;  %v3947_v21 = vld [vmem:[%s7217_s2 + $0x1e0] sm:$0xf0]  ;;  %v4874_v23 = vld [vmem:[%s7217_s2 + $0x1e4] sm:$0xf0]  ;;  %v3933_v26 = vld [vmem:[%s7217_s2 + $0x180] sm:$0xf] }
   0x6   :  { %v3950_v24 = vor.u32 %v4872_v19, %v3947_v21  ;;  %v3954_v25 = vor.u32 %v4874_v23, %v3953_v22  ;;  %v4870_v27 = vld [vmem:[%s7217_s2 + $0x19c] sm:$0xf0]  ;;  %v4869_v28 = vld [vmem:[%s7217_s2 + $0x184] sm:$0xf]  ;;  %v3941_v31 = vld [vmem:[%s7217_s2 + $0x188] sm:$0xf] }
   0x7   :  { %263 = vmatpush.bf16.msra.mxu0 %v3946_v20  ;;  %v3934_v29 = vor.u32 %v4870_v27, %v3933_v26  ;;  %v3935_v30 = vld [vmem:[%s7217_s2 + $0x1a0] sm:$0xf0]  ;;  %v4871_v32 = vld [vmem:[%s7217_s2 + $0x1a4] sm:$0xf0]  ;;  %v3921_v35 = vld [vmem:[%s7217_s2 + $0x140] sm:$0xf] }
   0x8   :  { %277 = vmatpush.bf16.msra.mxu1 %v3950_v24  ;;  %291 = vmatpush.bf16.msra.mxu2 %v3954_v25  ;;  %v3938_v33 = vor.u32 %v4869_v28, %v3935_v30  ;;  %v3942_v34 = vor.u32 %v4871_v32, %v3941_v31  ;;  %v4867_v36 = vld [vmem:[%s7217_s2 + $0x15c] sm:$0xf0]  ;;  %v4866_v37 = vld [vmem:[%s7217_s2 + $0x144] sm:$0xf]  ;;  %v3929_v40 = vld [vmem:[%s7217_s2 + $0x148] sm:$0xf] }
   0x9   :  { %v3922_v38 = vor.u32 %v4867_v36, %v3921_v35  ;;  %v3923_v39 = vld [vmem:[%s7217_s2 + $0x160] sm:$0xf0]  ;;  %v4868_v41 = vld [vmem:[%s7217_s2 + $0x164] sm:$0xf0]  ;;  %v3909_v44 = vld [vmem:[%s7217_s2 + $0x100] sm:$0xf] }
   0xa   :  { %40 = vadd.xlane.f32.xlu0 %v35_v1  ;;  %v5074_v3 = vpop.eup %5073  ;;  %v3926_v42 = vor.u32 %v4866_v37, %v3923_v39  ;;  %v3930_v43 = vor.u32 %v4868_v41, %v3929_v40  ;;  %v4864_v45 = vld [vmem:[%s7217_s2 + $0x11c] sm:$0xf0]  ;;  %v4863_v46 = vld [vmem:[%s7217_s2 + $0x104] sm:$0xf]  ;;  %v3917_v49 = vld [vmem:[%s7217_s2 + $0x108] sm:$0xf] }
   0xb   :  { %v43_v4 = vmul.f32 128.0, %v5074_v3  ;;  %vm47_vm0 = vweird.f32 %v5074_v3  ;;  %264 = vmatpush.bf16.msra.mxu0 %v3934_v29  ;;  %v3910_v47 = vor.u32 %v4864_v45, %v3909_v44  ;;  %v3911_v48 = vld [vmem:[%s7217_s2 + $0x120] sm:$0xf0]  ;;  %v4865_v50 = vld [vmem:[%s7217_s2 + $0x124] sm:$0xf0]  ;;  %vm315_vm7 = vcmask 261120  }
   0xc   :  { %278 = vmatpush.bf16.msra.mxu1 %v3938_v33  ;;  %292 = vmatpush.bf16.msra.mxu2 %v3942_v34  ;;  %v3914_v51 = vor.u32 %v4863_v46, %v3911_v48  ;;  %v3918_v52 = vor.u32 %v4865_v50, %v3917_v49  ;;  %v3897_v53 = vld [vmem:[%s7217_s2 + $0xc0] sm:$0xf]  ;;  %v4860_v55 = vld [vmem:[%s7217_s2 + $0xc4] sm:$0xf]  ;;  %v3905_v58 = vld [vmem:[%s7217_s2 + $0xc8] sm:$0xf] }
   0xd   :  { %v44_v5 = vsub.f32 1.0, %v43_v4  ;;  %v4861_v54 = vld [vmem:[%s7217_s2 + $0xdc] sm:$0xf0]  ;;  %v3899_v57 = vld [vmem:[%s7217_s2 + $0xe0] sm:$0xf0]  ;;  %s5252_s26 = smov 96  }
   0xe   :  { %v3898_v56 = vor.u32 %v4861_v54, %v3897_v53  ;;  %v4862_v59 = vld [vmem:[%s7217_s2 + $0xe4] sm:$0xf0]  ;;  %v3902_v60 = vor.u32 %v4860_v55, %v3899_v57  ;;  %v3885_v62 = vld [vmem:[%s7217_s2 + $0x80] sm:$0xf]  ;;  %v3887_v2 = vld [vmem:[%s7217_s2 + $0xa0] sm:$0xf0] }
   0xf   :  { %v45_v6 = vmul.f32 %v5074_v3, %v44_v5  ;;  %265 = vmatpush.bf16.msra.mxu0 %v3922_v38  ;;  %v3906_v61 = vor.u32 %v4862_v59, %v3905_v58  ;;  %v4858_v63 = vld [vmem:[%s7217_s2 + $0x9c] sm:$0xf0]  ;;  %v4859_v4 = vld [vmem:[%s7217_s2 + $0xa4] sm:$0xf0]  ;;  %v4851_v21 = vld [vmem:[%s7217_s2 + $0x4] sm:$0xf] }
  0x10   :  { %279 = vmatpush.bf16.msra.mxu1 %v3926_v42  ;;  %293 = vmatpush.bf16.msra.mxu2 %v3930_v43  ;;  %v3861_v19 = vld [vmem:[%s7217_s2] sm:$0xf]  ;;  %v3863_v24 = vld [vmem:[%s7217_s2 + $0x20] sm:$0xf0]  ;;  %v3869_v25 = vld [vmem:[%s7217_s2 + $0x8] sm:$0xf] }
  0x11   :  { %v46_v7 = vadd.f32 %v5074_v3, %v45_v6  ;;  %v4852_v20 = vld [vmem:[%s7217_s2 + $0x1c] sm:$0xf0]  ;;  %v4853_v26 = vld [vmem:[%s7217_s2 + $0x24] sm:$0xf0]  ;;  %v3866_v28 = vor.u32 %v4851_v21, %v3863_v24  ;;  %vm382_vm8 = vcmask 1043456   ;;  %vm354_vm9 = vcmask 64512  }
  0x12   :  { %v3862_v23 = vor.u32 %v4852_v20, %v3861_v19  ;;  %v3870_v29 = vor.u32 %v4853_v26, %v3869_v25  ;;  %s5254_s29 = smov 32   ;;  %s5255_s12 = smov [#allocation3]  }
  0x13   :  { %v5312_v8 = vsel %vm47_vm0, %v5074_v3, %v46_v7  ;;  %266 = vmatpush.bf16.msra.mxu0 %v3910_v47  ;;  %v3893_v3 = vld [vmem:[%s7217_s2 + $0x88] sm:$0xf]  ;;  %v3873_v7 = vld [vmem:[%s7217_s2 + $0x40] sm:$0xf]  ;;  %s3850_s14 = sshll.u32 %s7224_s9, 4  ;;  %s3851_s14 = int_to_ptr.hbm [resolvable:$true] %s3850_s14 }
  0x14   :  { %280 = vmatpush.bf16.msra.mxu1 %v3914_v51  ;;  %294 = vmatpush.bf16.msra.mxu2 %v3918_v52  ;;  %v3894_v6 = vor.u32 %v4859_v4, %v3893_v3  ;;  %v5056_v47 = vld [vmem:[%s7223_s8] ss:$0 sm:$0xff]  ;;  %v5057_v52 = vld [vmem:[%s7223_s8 + $0x1] ss:$0 sm:$0xff] }
  0x17   :  { %267 = vmatpush.bf16.msra.mxu0 %v3898_v56 }
  0x18   :  { %281 = vmatpush.bf16.msra.mxu1 %v3902_v60  ;;  %295 = vmatpush.bf16.msra.mxu2 %v3906_v61 }
  0x1c   :  { %296 = vmatpush.bf16.msra.mxu2 %v3894_v6 }
  0x75   :  { %v39_v9 = vpop.xlane.xlu0 %38 }
  0x76   :  { %v49_v10 = vmul.f32 %v5312_v8, %v39_v9  ;;  %v4855_v9 = vld [vmem:[%s7217_s2 + $0x5c] sm:$0xf0] }
  0x78   :  { %v5315_v11 = vsub.f32 %v34_v0, %v49_v10  ;;  %v4857_v0 = vld [vmem:[%s7217_s2 + $0x84] sm:$0xf] }
  0x79   :  { %v3890_v5 = vor.u32 %v4857_v0, %v3887_v2  ;;  %v4854_v10 = vld [vmem:[%s7217_s2 + $0x44] sm:$0xf] }
  0x7a   :  { %v53_v12 = vmul.f32 %v5315_v11, %v5315_v11 }
  0x7b   :  { %282 = vmatpush.bf16.msra.mxu1 %v3890_v5 }
  0x7c   :  { %55 = vadd.xlane.f32.xlu1 %v53_v12  ;;  %v3874_v12 = vor.u32 %v4855_v9, %v3873_v7 }
  0x7d   :  { %v41_v13 = vpop.xlane.xlu0 %40 }
  0x7e   :  { %v50_v14 = vmul.f32 %v5312_v8, %v41_v13  ;;  %v3875_v13 = vld [vmem:[%s7217_s2 + $0x60] sm:$0xf0] }
  0x7f   :  { %v3878_v17 = vor.u32 %v4854_v10, %v3875_v13 }
  0x80   :  { %v5320_v15 = vsub.f32 %v35_v1, %v50_v14  ;;  %v3886_v1 = vor.u32 %v4858_v63, %v3885_v62  ;;  %v3881_v14 = vld [vmem:[%s7217_s2 + $0x48] sm:$0xf] }
  0x81   :  { %283 = vmatpush.bf16.msra.mxu1 %v3878_v17 }
  0x82   :  { %v54_v16 = vmul.f32 %v5320_v15, %v5320_v15  ;;  %268 = vmatpush.bf16.msra.mxu0 %v3886_v1 }
  0x84   :  { %57 = vadd.xlane.f32.xlu1 %v54_v16  ;;  %v4856_v16 = vld [vmem:[%s7217_s2 + $0x64] sm:$0xf0] }
  0x85   :  { %v3882_v18 = vor.u32 %v4856_v16, %v3881_v14  ;;  %284 = vmatpush.bf16.msra.mxu1 %v3866_v28 }
  0x86   :  { %269 = vmatpush.bf16.msra.mxu0 %v3874_v12 }
  0x87   :  { %297 = vmatpush.bf16.msra.mxu2 %v3882_v18 }
  0x8a   :  { %270 = vmatpush.bf16.msra.mxu0 %v3862_v23 }
  0x8b   :  { %298 = vmatpush.bf16.msra.mxu2 %v3870_v29 }
  0xef   :  { %v56_v22 = vpop.xlane.xlu1 %55 }
  0xf0   :  { %v59_v27 = vmul.f32 %v56_v22, %v5312_v8 }
  0xf2   :  { %v61_v30 = vadd.f32 1e-12, %v59_v27 }
  0xf4   :  { %5075 = vrsqrt.f32 %v61_v30  ;;  %vm69_vm2 = vweird.f32 %v61_v30 }
  0xf7   :  { %v58_v31 = vpop.xlane.xlu1 %57 }
  0xf8   :  { %v60_v32 = vmul.f32 %v58_v31, %v5312_v8 }
  0xfa   :  { %v5076_v33 = vpop.eup %5075  ;;  %v62_v34 = vadd.f32 1e-12, %v60_v32 }
  0xfb   :  { %v64_v35 = vmul.f32 %v5076_v33, %v61_v30  ;;  %vm70_vm1 = vweird.f32 %v5076_v33 }
  0xfc   :  { %5077 = vrsqrt.f32 %v62_v34  ;;  %vm71_vm3 = vmor %vm69_vm2, %vm70_vm1  ;;  %vm79_vm5 = vweird.f32 %v62_v34 }
  0xfd   :  { %v65_v36 = vmul.f32 %v5076_v33, %v64_v35 }
  0xff   :  { %v66_v37 = vmul.f32 0.5, %v65_v36 }
 0x101   :  { %v67_v38 = vsub.f32 1.5, %v66_v37 }
 0x102   :  { %v5078_v39 = vpop.eup %5077 }
 0x103   :  { %v68_v40 = vmul.f32 %v5076_v33, %v67_v38  ;;  %v74_v41 = vmul.f32 %v5078_v39, %v62_v34  ;;  %vm80_vm4 = vweird.f32 %v5078_v39 }
 0x104   :  { %vm81_vm6 = vmor %vm79_vm5, %vm80_vm4 }
 0x105   :  { %v75_v42 = vmul.f32 %v5078_v39, %v74_v41  ;;  %v72_v43 = vsel %vm71_vm3, %v5076_v33, %v68_v40  ;;  %v91_v33 = vld [vmem:[%s7216_s1] sm:$0x3]  ;;  %s5253_s1 = smov 64  }
 0x106   :  { %v83_v46 = vmul.f32 %v72_v43, %v5315_v11  ;;  %v5521_v34 = vperm.slane %v91_v33, 0 }
 0x107   :  { %v76_v44 = vmul.f32 0.5, %v75_v42 }
 0x108   :  { %v86_v51 = vmul.f32 %v5056_v47, %v83_v46 }
 0x109   :  { %v77_v45 = vsub.f32 1.5, %v76_v44 }
 0x10a   :  { %v5478_v54 = vadd.f32 %v5057_v52, %v86_v51 }
 0x10b   :  { %v78_v48 = vmul.f32 %v5078_v39, %v77_v45 }
 0x10d   :  { %v82_v49 = vsel %vm81_vm6, %v5078_v39, %v78_v48 }
 0x10e   :  { %v84_v50 = vmul.f32 %v82_v49, %v5320_v15  ;;  %v127_v15 = vld [vmem:[%s7219_s4] sm:$0x7] }
 0x10f   :  { %v130_v56 = vperm.slane %v127_v15, 1  ;;  %v129_v57 = vperm.slane %v127_v15, 0  ;;  %v131_v63 = vperm.slane %v127_v15, 2 }
 0x110   :  { %v87_v53 = vmul.f32 %v5056_v47, %v84_v50 }
 0x112   :  { %v5480_v55 = vadd.f32 %v5057_v52, %v87_v53  ;;  %v93_v53 = vrot.slane %v91_v33, 1 }
 0x114   :  { %v94_v11 = vpack.c.bf16 %v5480_v55, %v5478_v54 }
 0x116   :  { %271 = vmatmul.bf16.vlgmr.msra.gmra.mxu0 %v94_v11  ;;  %285 = vmatmul.bf16.vlgmr.msra.gmra.mxu1 %v94_v11 }
 0x117   :  { %299 = vmatmul.bf16.vlgmr.msra.gmra.mxu2 %v94_v11  ;;  %v5531_v11 = vperm.slane %v93_v53, 0 }
 0x193   :  { %v272_v58 = vpop.f32.mrf.mxu0  ;;  %v286_v59 = vpop.f32.mrf.mxu1 }
 0x194   :  { %v287_v60 = vadd.f32 %v286_v59, %v130_v56  ;;  %v273_v62 = vadd.f32 %v272_v58, %v129_v57 }
 0x196   :  { %v307_v61 = vpack.c.bf16 %v287_v60, %v287_v60  ;;  %v305_v4 = vpack.c.bf16 %v273_v62, %v273_v62 }
 0x198   :  { %v429_v0 = vunpack.c.l.b16 %v307_v61  ;;  %v320_v1 = vsel %vm315_vm7, %v307_v61, 0  ;;  %v424_v16 = vunpack.c.l.b16 %v305_v4 }
 0x199   :  { %329 = vmatpush.bf16.xpose.msrb.mxu0 %v320_v1 }
 0x19a   :  { %v5488_v2 = vpack.c.b16 %v429_v0, %v429_v0  ;;  %v300_v3 = vpop.f32.mrf.mxu2  ;;  %v5502_v24 = vpack.c.b16 %v424_v16, %v424_v16 }
 0x19b   :  { %v301_v5 = vadd.f32 %v300_v3, %v131_v63  ;;  %v274_v6 = vpop.f32.mrf.mxu0  ;;  %v288_v7 = vpop.f32.mrf.mxu1 }
 0x19c   :  { %v275_v9 = vadd.f32 %v274_v6, %v129_v57  ;;  %v289_v10 = vadd.f32 %v288_v7, %v130_v56  ;;  %431 = vrot.lane.b32.xlu2 %v5488_v2, %s5252_s26 }
 0x19d   :  { %v5492_v12 = vpack.c.bf16 %v301_v5, %v301_v5 }
 0x19e   :  { %v306_v13 = vpack.c.bf16 %v275_v9, %v275_v9  ;;  %v308_v14 = vpack.c.bf16 %v289_v10, %v289_v10 }
 0x19f   :  { %v384_v20 = vsel %vm382_vm8, %v5492_v12, 0  ;;  %v506_v62 = vunpack.c.l.b16 %v5492_v12 }
 0x1a0   :  { %v453_v17 = vunpack.c.l.b16 %v306_v13  ;;  %3955 = vmatmul.msk.bf16.vlgmr.msrb.gmra.mxu0 %vm315_vm7, %v305_v4  ;;  %v339_v18 = vsel %vm315_vm7, %v308_v14, 0  ;;  %v458_v19 = vunpack.c.l.b16 %v308_v14 }
 0x1a1   :  { %348 = vmatpush.bf16.xpose.msra.mxu3 %v339_v18  ;;  %v5541_v0 = vpack.c.b16 %v506_v62, %v506_v62 }
 0x1a2   :  { %v302_v21 = vpop.f32.mrf.mxu2  ;;  %v5498_v22 = vpack.c.b16 %v458_v19, %v458_v19  ;;  %v5500_v23 = vpack.c.b16 %v453_v17, %v453_v17 }
 0x1a3   :  { %v303_v25 = vadd.f32 %v302_v21, %v131_v63 }
 0x1a4   :  { %460 = vrot.lane.b32.xlu0 %v5498_v22, %s5252_s26  ;;  %455 = vrot.lane.b32.xlu1 %v5500_v23, %s5252_s26 }
 0x1a5   :  { %v5508_v26 = vpack.c.bf16 %v303_v25, %v303_v25  ;;  %426 = vrot.lane.b32.xlu2 %v5502_v24, %s5252_s26 }
 0x1a7   :  { %v403_v27 = vsel %vm382_vm8, %v5508_v26, 0  ;;  %v530_v16 = vunpack.c.l.b16 %v5508_v26 }
 0x1a8   :  { %412 = vmatpush.bf16.msra.mxu0 %v403_v27  ;;  %3956 = vmatmul.msk.bf16.vlgmr.msra.gmra.mxu3 %vm315_vm7, %v306_v13 }
 0x1a9   :  { %393 = vmatpush.bf16.msrb.mxu3 %v384_v20  ;;  %v5553_v17 = vpack.c.b16 %v530_v16, %v530_v16 }
 0x1f6   :  { %v432_v28 = vpop.permute.xlu2 %431 }
 0x1f7   :  { %v437_v29 = vsel %vm315_vm7, %v432_v28, 0 }
 0x1f8   :  { %446 = vmatpush.bf16.xpose.msrb.mxu1 %v437_v29 }
 0x1ff   :  { %v427_v30 = vpop.permute.xlu2 %426 }
 0x200   :  { %3959 = vmatmul.msk.bf16.vlgmr.msrb.gmra.mxu1 %vm315_vm7, %v427_v30 }
 0x216   :  { %v461_v31 = vpop.permute.xlu0 %460  ;;  %v456_v36 = vpop.permute.xlu1 %455 }
 0x217   :  { %v466_v32 = vsel %vm315_vm7, %v461_v31, 0 }
 0x218   :  { %475 = vmatpush.bf16.xpose.msrb.mxu2 %v466_v32 }
 0x21d   :  { %v331_v35 = vpop.f32.mrf.mxu0 }
 0x21e   :  { %v332_v37 = vadd.f32 %v331_v35, %v5521_v34 }
 0x21f   :  { %3960 = vmatmul.msk.bf16.vlgmr.msrb.gmra.mxu2 %vm315_vm7, %v456_v36 }
 0x220   :  { %v355_v38 = vsel %vm354_vm9, %v332_v37, -inf }
 0x221   :  { %356 = vmax.xlane.f32.xlu2 %v355_v38 }
 0x225   :  { %v333_v39 = vpop.f32.mrf.mxu0 }
 0x22b   :  { %v350_v40 = vpop.f32.mrf.mxu3 }
 0x22c   :  { %v351_v10 = vadd.f32 %v350_v40, %v5531_v11 }
 0x22e   :  { %v358_v12 = vsel %vm354_vm9, %v351_v10, -inf }
 0x233   :  { %v352_v41 = vpop.f32.mrf.mxu3 }
 0x27d   :  { %v448_v42 = vpop.f32.mrf.mxu1 }
 0x27e   :  { %v449_v43 = vadd.f32 %v448_v42, %v5521_v34 }
 0x280   :  { %v481_v44 = vsel %vm354_vm9, %v449_v43, -inf }
 0x281   :  { %482 = vmax.xlane.f32.xlu0 %v481_v44 }
 0x285   :  { %v450_v45 = vpop.f32.mrf.mxu1 }
 0x294   :  { %v357_v46 = vpop.xlane.xlu2 %356 }
 0x295   :  { %618 = vrot.lane.b32.xlu0 %v5488_v2, %s5253_s1  ;;  %v361_v47 = vsub.f32 %v332_v37, %v357_v46  ;;  %v3965_v46 = vld [vmem:[%s7217_s2 + $0x8c] sm:$0xf] }
 0x297   :  { %v363_v48 = vmul.f32 1.442695, %v361_v47  ;;  %v4877_v47 = vld [vmem:[%s7217_s2 + $0xa8] sm:$0xf0] }
 0x299   :  { %5079 = vpow2.f32 %v363_v48 }
 0x29f   :  { %v5080_v49 = vpop.eup %5079 }
 0x2a0   :  { %v367_v50 = vsel %vm354_vm9, %v5080_v49, 0.0 }
 0x2a1   :  { %368 = vadd.xlane.f32.xlu1 %v367_v50 }
 0x2a2   :  { %v477_v51 = vpop.f32.mrf.mxu2 }
 0x2a3   :  { %v478_v15 = vadd.f32 %v477_v51, %v5531_v11 }
 0x2a5   :  { %v484_v56 = vsel %vm354_vm9, %v478_v15, -inf }
 0x2aa   :  { %v479_v52 = vpop.f32.mrf.mxu2 }
 0x2ba   :  { %616 = vrot.lane.b32.xlu1 %v5502_v24, %s5253_s1 }
 0x2bf   :  { %485 = vmax.xlane.f32.xlu0 %v484_v56 }
 0x2d3   :  { %641 = vrot.lane.b32.xlu0 %v5498_v22, %s5253_s1 }
 0x2f4   :  { %v483_v57 = vpop.xlane.xlu0 %482 }
 0x2f5   :  { %v487_v58 = vsub.f32 %v449_v43, %v483_v57 }
 0x2f7   :  { %v489_v59 = vmul.f32 1.442695, %v487_v58 }
 0x2f9   :  { %5081 = vpow2.f32 %v489_v59 }
 0x2ff   :  { %v5082_v60 = vpop.eup %5081 }
 0x300   :  { %v493_v61 = vsel %vm354_vm9, %v5082_v60, 0.0 }
 0x301   :  { %494 = vadd.xlane.f32.xlu2 %v493_v61 }
 0x307   :  { %v619_v5 = vpop.permute.xlu0 %618 }
 0x308   :  { %v624_v27 = vsel %vm315_vm7, %v619_v5, 0 }
 0x314   :  { %v369_v63 = vpop.xlane.xlu1 %368 }
 0x315   :  { %5083 = vrcp.f32 %v369_v63 }
 0x319   :  { %508 = vrot.lane.b32.xlu2 %v5541_v0, %s5252_s26 }
 0x31b   :  { %v5084_v1 = vpop.eup %5083 }
 0x31c   :  { %v375_v3 = vmul.f32 %v5084_v1, %v5080_v49 }
 0x31e   :  { %v377_v4 = vpack.c.bf16 %v375_v3, %v375_v3  ;;  %v3978_v3 = vld [vmem:[%s7217_s2 + $0x4c] sm:$0xf] }
 0x320   :  { %3957 = vmatmul.msk.bf16.vlgmr.msrb.gmra.mxu3 %vm354_vm9, %v377_v4  ;;  %v4876_v4 = vld [vmem:[%s7217_s2 + $0x68] sm:$0xf0] }
 0x321   :  { %v3979_v5 = vor.u32 %v4876_v4, %v3978_v3 }
 0x323   :  { %608 = vmatpush.bf16.msra.mxu2 %v3979_v5 }
 0x32c   :  { %v617_v26 = vpop.permute.xlu1 %616 }
 0x332   :  { %v486_v6 = vpop.xlane.xlu0 %485 }
 0x333   :  { %v488_v7 = vsub.f32 %v478_v15, %v486_v6 }
 0x335   :  { %v491_v9 = vmul.f32 1.442695, %v488_v7 }
 0x337   :  { %5085 = vpow2.f32 %v491_v9 }
 0x33d   :  { %v5548_v13 = vpop.eup %5085 }
 0x33e   :  { %v496_v14 = vsel %vm354_vm9, %v5548_v13, 0.0 }
 0x342   :  { %359 = vmax.xlane.f32.xlu2 %v358_v12 }
 0x345   :  { %v642_v51 = vpop.permute.xlu0 %641 }
 0x346   :  { %v647_v53 = vsel %vm315_vm7, %v642_v51, 0 }
 0x34a   :  { %497 = vadd.xlane.f32.xlu2 %v496_v14  ;;  %v4875_v14 = vld [vmem:[%s7217_s2 + $0x28] sm:$0xf0] }
 0x362   :  { %532 = vrot.lane.b32.xlu2 %v5553_v17, %s5252_s26 }
 0x374   :  { %v495_v18 = vpop.xlane.xlu2 %494 }
 0x375   :  { %5087 = vrcp.f32 %v495_v18 }
 0x37b   :  { %v5088_v19 = vpop.eup %5087 }
 0x37c   :  { %v501_v20 = vmul.f32 %v5088_v19, %v5082_v60  ;;  %v509_v21 = vpop.permute.xlu2 %508 }
 0x37d   :  { %v514_v25 = vsel %vm382_vm8, %v509_v21, 0 }
 0x37e   :  { %v503_v28 = vpack.c.bf16 %v501_v20, %v501_v20  ;;  %523 = vmatpush.bf16.msra.mxu3 %v514_v25 }
 0x381   :  { %3961 = vmatmul.msk.bf16.vlgmr.msra.gmra.mxu3 %vm354_vm9, %v503_v28 }
 0x382   :  { %633 = vmatpush.bf16.xpose.msrb.mxu3 %v624_v27 }
 0x391   :  { %3981 = vmatmul.msk.bf16.vlgmr.msrb.gmra.mxu3 %vm315_vm7, %v617_v26 }
 0x3a3   :  { %v5561_v29 = vpop.f32.mrf.mxu3 }
 0x3ab   :  { %v397_v30 = vpop.f32.mrf.mxu3 }
 0x3b5   :  { %v360_v31 = vpop.xlane.xlu2 %359 }
 0x3b6   :  { %v362_v32 = vsub.f32 %v351_v10, %v360_v31 }
 0x3b8   :  { %v365_v33 = vmul.f32 1.442695, %v362_v32 }
 0x3ba   :  { %5089 = vpow2.f32 %v365_v33 }
 0x3bd   :  { %v498_v35 = vpop.xlane.xlu2 %497 }
 0x3c0   :  { %v5090_v36 = vpop.eup %5089 }
 0x3c1   :  { %v370_v37 = vsel %vm354_vm9, %v5090_v36, 0.0 }
 0x3c2   :  { %371 = vadd.xlane.f32.xlu1 %v370_v37 }
 0x3c5   :  { %v533_v38 = vpop.permute.xlu2 %532 }
 0x3c6   :  { %v538_v39 = vsel %vm382_vm8, %v533_v38, 0 }
 0x3c7   :  { %547 = vmatpush.bf16.msrb.mxu0 %v538_v39 }
 0x3db   :  { %639 = vrot.lane.b32.xlu1 %v5500_v23, %s5253_s1 }
 0x3e3   :  { %686 = vrot.lane.b32.xlu1 %v5541_v0, %s5253_s1 }
 0x3eb   :  { %766 = vrot.lane.b32.xlu1 %v5488_v2, %s5254_s29  ;;  %v3969_v2 = vld [vmem:[%s7217_s2 + $0xcc] sm:$0xf] }
 0x3f3   :  { %789 = vrot.lane.b32.xlu1 %v5498_v22, %s5254_s29  ;;  %v4878_v22 = vld [vmem:[%s7217_s2 + $0xe8] sm:$0xf0] }
 0x3fb   :  { %764 = vrot.lane.b32.xlu1 %v5502_v24, %s5254_s29  ;;  %v3970_v24 = vor.u32 %v4878_v22, %v3969_v2 }
 0x3fd   :  { %579 = vmatpush.bf16.msra.mxu1 %v3970_v24 }
 0x404   :  { %v5575_v40 = vpop.f32.mrf.mxu3 }
 0x40c   :  { %v527_v41 = vpop.f32.mrf.mxu3 }
 0x414   :  { %v635_v42 = vpop.f32.mrf.mxu3 }
 0x415   :  { %v636_v43 = vadd.f32 %v635_v42, %v5521_v34 }
 0x417   :  { %v662_v44 = vsel %vm354_vm9, %v636_v43, -inf }
 0x418   :  { %663 = vmax.xlane.f32.xlu0 %v662_v44 }
 0x41c   :  { %v637_v45 = vpop.f32.mrf.mxu3 }
 0x42c   :  { %787 = vrot.lane.b32.xlu0 %v5500_v23, %s5254_s29  ;;  %v3966_v23 = vor.u32 %v4877_v47, %v3965_v46 }
 0x42e   :  { %580 = vmatpush.bf16.msra.mxu1 %v3966_v23 }
 0x435   :  { %v372_v48 = vpop.xlane.xlu1 %371 }
 0x436   :  { %5091 = vrcp.f32 %v372_v48 }
 0x437   :  { %5093 = vrcp.f32 %v498_v35 }
 0x43c   :  { %v5092_v49 = vpop.eup %5091 }
 0x43d   :  { %v376_v50 = vmul.f32 %v5092_v49, %v5090_v36  ;;  %v5094_v15 = vpop.eup %5093 }
 0x43e   :  { %v502_v56 = vmul.f32 %v5094_v15, %v5548_v13  ;;  %v3974_v13 = vld [vmem:[%s7217_s2 + $0xc] sm:$0xf] }
 0x43f   :  { %v378_v52 = vpack.c.bf16 %v376_v50, %v376_v50  ;;  %v3975_v16 = vor.u32 %v4875_v14, %v3974_v13  ;;  %v3991_v13 = vld [vmem:[%s7217_s2 + $0x14c] sm:$0xf] }
 0x440   :  { %v504_v58 = vpack.c.bf16 %v502_v56, %v502_v56  ;;  %v4880_v14 = vld [vmem:[%s7217_s2 + $0x168] sm:$0xf0] }
 0x441   :  { %3958 = vmatmul.msk.bf16.vlgmr.msra.gmra.mxu0 %vm354_vm9, %v378_v52  ;;  %609 = vmatpush.bf16.msra.mxu2 %v3975_v16  ;;  %v3992_v16 = vor.u32 %v4880_v14, %v3991_v13  ;;  %v4131_v13 = vld [vmem:[%s7217_s2 + $0x1f8] sm:$0xf0] }
 0x442   :  { %656 = vmatpush.bf16.xpose.msra.mxu0 %v647_v53 }
 0x443   :  { %754 = vmatpush.bf16.msra.mxu3 %v3992_v16  ;;  %v4105_v16 = vld [vmem:[%s7217_s2 + $0x190] sm:$0xf] }
 0x44d   :  { %v640_v57 = vpop.permute.xlu1 %639 }
 0x451   :  { %3962 = vmatmul.msk.bf16.vlgmr.msrb.gmra.mxu0 %vm354_vm9, %v504_v58 }
 0x455   :  { %v687_v59 = vpop.permute.xlu1 %686 }
 0x456   :  { %v692_v60 = vsel %vm382_vm8, %v687_v59, 0 }
 0x457   :  { %701 = vmatpush.bf16.msrb.mxu1 %v692_v60 }
 0x45d   :  { %v767_v61 = vpop.permute.xlu1 %766 }
 0x45e   :  { %v772_v62 = vsel %vm315_vm7, %v767_v61, 0 }
 0x45f   :  { %781 = vmatpush.bf16.xpose.msrb.mxu0 %v772_v62 }
 0x461   :  { %3982 = vmatmul.msk.bf16.vlgmr.msra.gmra.mxu0 %vm315_vm7, %v640_v57 }
 0x465   :  { %v790_v63 = vpop.permute.xlu1 %789 }
 0x466   :  { %v795_v27 = vsel %vm315_vm7, %v790_v63, 0 }
 0x46d   :  { %v765_v1 = vpop.permute.xlu1 %764 }
 0x471   :  { %3994 = vmatmul.msk.bf16.vlgmr.msrb.gmra.mxu0 %vm315_vm7, %v765_v1 }
 0x48b   :  { %v664_v6 = vpop.xlane.xlu0 %663 }
 0x48c   :  { %v668_v7 = vsub.f32 %v636_v43, %v664_v6 }
 0x48e   :  { %v670_v9 = vmul.f32 1.442695, %v668_v7 }
 0x490   :  { %5095 = vpow2.f32 %v670_v9 }
 0x496   :  { %v5096_v10 = vpop.eup %5095 }
 0x497   :  { %v674_v12 = vsel %vm354_vm9, %v5096_v10, 0.0 }
 0x498   :  { %675 = vadd.xlane.f32.xlu2 %v674_v12 }
 0x49e   :  { %v788_v41 = vpop.permute.xlu0 %787 }
 0x4be   :  { %v414_v18 = vpop.f32.mrf.mxu0 }
 0x4bf   :  { %v422_v19 = vpack.c.bf16 %v414_v18, %v5561_v29 }
 0x4c1   :  { %3980 = vmatmul.msk.bf16.vlgmr.msra.gmra.mxu2 %vm315_vm7, %v422_v19 }
 0x4c6   :  { %v416_v20 = vpop.f32.mrf.mxu0 }
 0x4c7   :  { %v3987_v20 = vld [vmem:[%s7217_s2 + $0x10c] sm:$0xf] }
 0x4ce   :  { %v549_v21 = vpop.f32.mrf.mxu0 }
 0x4cf   :  { %v557_v25 = vpack.c.bf16 %v549_v21, %v5575_v40  ;;  %v4879_v21 = vld [vmem:[%s7217_s2 + $0x128] sm:$0xf0] }
 0x4d1   :  { %3971 = vmatmul.msk.bf16.vlgmr.msra.gmra.mxu1 %vm315_vm7, %v557_v25  ;;  %v3988_v25 = vor.u32 %v4879_v21, %v3987_v20  ;;  %v4107_v21 = vld [vmem:[%s7217_s2 + $0x1b0] sm:$0xf0] }
 0x4d2   :  { %804 = vmatpush.bf16.xpose.msra.mxu1 %v795_v27 }
 0x4d3   :  { %755 = vmatpush.bf16.msra.mxu3 %v3988_v25  ;;  %v4113_v25 = vld [vmem:[%s7217_s2 + $0x198] sm:$0xf] }
 0x4d6   :  { %v551_v28 = vpop.f32.mrf.mxu0 }
 0x4de   :  { %v658_v26 = vpop.f32.mrf.mxu0 }
 0x4df   :  { %v659_v30 = vadd.f32 %v658_v26, %v5531_v11 }
 0x4e1   :  { %v665_v31 = vsel %vm354_vm9, %v659_v30, -inf }
 0x4e2   :  { %666 = vmax.xlane.f32.xlu2 %v665_v31 }
 0x4e6   :  { %v660_v32 = vpop.f32.mrf.mxu0 }
 0x4ee   :  { %v783_v29 = vpop.f32.mrf.mxu0 }
 0x4ef   :  { %v784_v33 = vadd.f32 %v783_v29, %v5521_v34 }
 0x4f1   :  { %v810_v35 = vsel %vm354_vm9, %v784_v33, -inf }
 0x4f2   :  { %811 = vmax.xlane.f32.xlu0 %v810_v35 }
 0x4f6   :  { %v785_v36 = vpop.f32.mrf.mxu0 }
 0x4fa   :  { %707 = vrot.lane.b32.xlu2 %v5553_v17, %s5253_s1 }
 0x506   :  { %834 = vrot.lane.b32.xlu0 %v5541_v0, %s5254_s29 }
 0x50b   :  { %v676_v37 = vpop.xlane.xlu2 %675 }
 0x50c   :  { %5097 = vrcp.f32 %v676_v37 }
 0x512   :  { %v5098_v38 = vpop.eup %5097 }
 0x513   :  { %v682_v39 = vmul.f32 %v5098_v38, %v5096_v10  ;;  %v4004_v38 = vld [vmem:[%s7217_s2 + $0x1cc] sm:$0xf] }
 0x515   :  { %v684_v40 = vpack.c.bf16 %v682_v39, %v682_v39  ;;  %v4882_v39 = vld [vmem:[%s7217_s2 + $0x1e8] sm:$0xf0] }
 0x517   :  { %3983 = vmatmul.msk.bf16.vlgmr.msrb.gmra.mxu1 %vm354_vm9, %v684_v40  ;;  %v4005_v40 = vor.u32 %v4882_v39, %v4004_v38  ;;  %v4906_v38 = vld [vmem:[%s7217_s2 + $0x174] sm:$0xf0] }
 0x519   :  { %902 = vmatpush.bf16.msra.mxu0 %v4005_v40 }
 0x527   :  { %3995 = vmatmul.msk.bf16.vlgmr.msra.gmra.mxu1 %vm315_vm7, %v788_v41 }
 0x544   :  { %v611_v42 = vpop.f32.mrf.mxu2 }
 0x54c   :  { %v613_v27 = vpop.f32.mrf.mxu2 }
 0x54e   :  { %v582_v43 = vpop.f32.mrf.mxu1 }
 0x54f   :  { %v5629_v44 = vadd.f32 %v611_v42, %v582_v43  ;;  %v4000_v43 = vld [vmem:[%s7217_s2 + $0x18c] sm:$0xf] }
 0x555   :  { %v667_v45 = vpop.xlane.xlu2 %666 }
 0x556   :  { %v669_v2 = vsub.f32 %v659_v30, %v667_v45  ;;  %v5635_v15 = vpop.f32.mrf.mxu1  ;;  %v4881_v45 = vld [vmem:[%s7217_s2 + $0x1a8] sm:$0xf0] }
 0x558   :  { %v672_v22 = vmul.f32 1.442695, %v669_v2  ;;  %v4001_v2 = vor.u32 %v4881_v45, %v4000_v43  ;;  %v4073_v45 = vld [vmem:[%s7217_s2 + $0x110] sm:$0xf] }
 0x55a   :  { %5099 = vpow2.f32 %v672_v22  ;;  %903 = vmatpush.bf16.msra.mxu0 %v4001_v2  ;;  %v4901_v2 = vld [vmem:[%s7217_s2 + $0x12c] sm:$0xf0] }
 0x55d   :  { %v708_v24 = vpop.permute.xlu2 %707 }
 0x55e   :  { %v713_v0 = vsel %vm382_vm8, %v708_v24, 0 }
 0x55f   :  { %722 = vmatpush.bf16.msrb.mxu2 %v713_v0 }
 0x560   :  { %v5100_v46 = vpop.eup %5099 }
 0x561   :  { %v677_v47 = vsel %vm354_vm9, %v5100_v46, 0.0 }
 0x562   :  { %678 = vadd.xlane.f32.xlu1 %v677_v47 }
 0x565   :  { %v812_v48 = vpop.xlane.xlu0 %811 }
 0x566   :  { %v816_v23 = vsub.f32 %v784_v33, %v812_v48 }
 0x568   :  { %v818_v49 = vmul.f32 1.442695, %v816_v23 }
 0x56a   :  { %5101 = vpow2.f32 %v818_v49  ;;  %v614_v49 = vadd.f32 %v613_v27, %v5635_v15  ;;  %v4910_v27 = vld [vmem:[%s7217_s2 + $0x1b4] sm:$0xf0] }
 0x570   :  { %v5102_v50 = vpop.eup %5101 }
 0x571   :  { %v822_v51 = vsel %vm354_vm9, %v5102_v50, 0.0 }
 0x572   :  { %823 = vadd.xlane.f32.xlu1 %v822_v51 }
 0x578   :  { %v835_v52 = vpop.permute.xlu0 %834 }
 0x579   :  { %v840_v53 = vsel %vm382_vm8, %v835_v52, 0 }
 0x57a   :  { %849 = vmatpush.bf16.msra.mxu2 %v840_v53 }
 0x594   :  { %v703_v56 = vpop.f32.mrf.mxu1 }
 0x59c   :  { %v705_v57 = vpop.f32.mrf.mxu1 }
 0x5a4   :  { %v806_v58 = vpop.f32.mrf.mxu1 }
 0x5a5   :  { %v807_v59 = vadd.f32 %v806_v58, %v5531_v11 }
 0x5a7   :  { %v813_v60 = vsel %vm354_vm9, %v807_v59, -inf }
 0x5a8   :  { %814 = vmax.xlane.f32.xlu2 %v813_v60 }
 0x5ac   :  { %v808_v61 = vpop.f32.mrf.mxu1 }
 0x5d5   :  { %v679_v62 = vpop.xlane.xlu1 %678 }
 0x5d6   :  { %5103 = vrcp.f32 %v679_v62 }
 0x5dc   :  { %v5104_v63 = vpop.eup %5103 }
 0x5dd   :  { %v683_v1 = vmul.f32 %v5104_v63, %v5100_v46 }
 0x5df   :  { %v685_v3 = vpack.c.bf16 %v683_v1, %v683_v1  ;;  %v4913_v1 = vld [vmem:[%s7217_s2 + $0x1ec] sm:$0xf0] }
 0x5e1   :  { %3984 = vmatmul.msk.bf16.vlgmr.msrb.gmra.mxu2 %vm354_vm9, %v685_v3  ;;  %v4911_v3 = vld [vmem:[%s7217_s2 + $0x1d4] sm:$0xf] }
 0x5e5   :  { %v824_v4 = vpop.xlane.xlu1 %823 }
 0x5e6   :  { %5105 = vrcp.f32 %v824_v4 }
 0x5ec   :  { %v5106_v5 = vpop.eup %5105 }
 0x5ed   :  { %v830_v6 = vmul.f32 %v5106_v5, %v5102_v50  ;;  %v4123_v5 = vld [vmem:[%s7217_s2 + $0x1f0] sm:$0xf0] }
 0x5ef   :  { %v832_v7 = vpack.c.bf16 %v830_v6, %v830_v6  ;;  %v4129_v6 = vld [vmem:[%s7217_s2 + $0x1d8] sm:$0xf] }
 0x5f1   :  { %3996 = vmatmul.msk.bf16.vlgmr.msra.gmra.mxu2 %vm354_vm9, %v832_v7  ;;  %v4914_v7 = vld [vmem:[%s7217_s2 + $0x1f4] sm:$0xf0] }
 0x61b   :  { %v815_v9 = vpop.xlane.xlu2 %814 }
 0x61c   :  { %v817_v10 = vsub.f32 %v807_v59, %v815_v9  ;;  %v4126_v9 = vor.u32 %v4911_v3, %v4123_v5  ;;  %v4893_v3 = vld [vmem:[%s7217_s2 + $0xac] sm:$0xf0] }
 0x61e   :  { %v820_v12 = vmul.f32 1.442695, %v817_v10  ;;  %v4130_v10 = vor.u32 %v4914_v7, %v4129_v6  ;;  %1183 = vmatpush.bf16.msrb.mxu2 %v4126_v9  ;;  %v4043_v6 = vld [vmem:[%s7217_s2 + $0xb0] sm:$0xf0]  ;;  %v4049_v7 = vld [vmem:[%s7217_s2 + $0x98] sm:$0xf] }
 0x61f   :  { %v4894_v9 = vld [vmem:[%s7217_s2 + $0xb4] sm:$0xf0] }
 0x620   :  { %5107 = vpow2.f32 %v820_v12  ;;  %v4912_v12 = vld [vmem:[%s7217_s2 + $0x1dc] sm:$0xf] }
 0x621   :  { %v4134_v14 = vor.u32 %v4912_v12, %v4131_v13  ;;  %v4050_v12 = vor.u32 %v4894_v9, %v4049_v7  ;;  %v4892_v13 = vld [vmem:[%s7217_s2 + $0x9c] sm:$0xf] }
 0x623   :  { %1211 = vmatpush.bf16.msrb.mxu0 %v4134_v14  ;;  %v4051_v14 = vld [vmem:[%s7217_s2 + $0xb8] sm:$0xf0] }
 0x626   :  { %v5108_v18 = vpop.eup %5107 }
 0x627   :  { %v825_v19 = vsel %vm354_vm9, %v5108_v18, 0.0 }
 0x628   :  { %826 = vadd.xlane.f32.xlu1 %v825_v19  ;;  %v4907_v19 = vld [vmem:[%s7217_s2 + $0x194] sm:$0xf] }
 0x641   :  { %855 = vrot.lane.b32.xlu1 %v5553_v17, %s5254_s29 }
 0x664   :  { %v724_v28 = vpop.f32.mrf.mxu2 }
 0x665   :  { %v732_v26 = vpack.c.bf16 %v724_v28, %v703_v56  ;;  %v4110_v28 = vor.u32 %v4907_v19, %v4107_v21  ;;  %v4889_v19 = vld [vmem:[%s7217_s2 + $0x6c] sm:$0xf0] }
 0x667   :  { %3993 = vmatmul.msk.bf16.vlgmr.msra.gmra.mxu3 %vm315_vm7, %v732_v26  ;;  %v4114_v26 = vor.u32 %v4910_v27, %v4113_v25  ;;  %1184 = vmatpush.bf16.msrb.mxu2 %v4110_v28  ;;  %v4027_v25 = vld [vmem:[%s7217_s2 + $0x70] sm:$0xf0]  ;;  %v4033_v27 = vld [vmem:[%s7217_s2 + $0x58] sm:$0xf] }
 0x668   :  { %v4890_v28 = vld [vmem:[%s7217_s2 + $0x74] sm:$0xf0] }
 0x66c   :  { %v726_v30 = vpop.f32.mrf.mxu2 }
 0x66d   :  { %v4908_v30 = vld [vmem:[%s7217_s2 + $0x19c] sm:$0xf] }
 0x674   :  { %v851_v31 = vpop.f32.mrf.mxu2 }
 0x67c   :  { %v853_v32 = vpop.f32.mrf.mxu2 }
 0x69b   :  { %v827_v29 = vpop.xlane.xlu1 %826 }
 0x69c   :  { %5109 = vrcp.f32 %v827_v29  ;;  %v4089_v29 = vld [vmem:[%s7217_s2 + $0x150] sm:$0xf] }
 0x6a2   :  { %v5110_v17 = vpop.eup %5109 }
 0x6a3   :  { %v831_v33 = vmul.f32 %v5110_v17, %v5108_v18  ;;  %v4909_v18 = vld [vmem:[%s7217_s2 + $0x1ac] sm:$0xf0] }
 0x6a4   :  { %v4106_v20 = vor.u32 %v4909_v18, %v4105_v16  ;;  %v4905_v17 = vld [vmem:[%s7217_s2 + $0x16c] sm:$0xf0]  ;;  %v4054_v16 = vor.u32 %v4892_v13, %v4051_v14 }
 0x6a5   :  { %v833_v37 = vpack.c.bf16 %v831_v33, %v831_v33  ;;  %v4903_v33 = vld [vmem:[%s7217_s2 + $0x154] sm:$0xf]  ;;  %v4025_v18 = vld [vmem:[%s7217_s2 + $0x50] sm:$0xf] }
 0x6a6   :  { %v4026_v21 = vor.u32 %v4889_v19, %v4025_v18 }
 0x6b3   :  { %v856_v35 = vpop.permute.xlu1 %855 }
 0x6b4   :  { %v861_v36 = vsel %vm382_vm8, %v856_v35, 0  ;;  %v4090_v35 = vor.u32 %v4905_v17, %v4089_v29  ;;  %v4035_v29 = vld [vmem:[%s7217_s2 + $0x78] sm:$0xf0]  ;;  %v4009_v17 = vld [vmem:[%s7217_s2 + $0x10] sm:$0xf] }
 0x6b5   :  { %870 = vmatpush.bf16.msrb.mxu3 %v861_v36  ;;  %v4091_v36 = vld [vmem:[%s7217_s2 + $0x170] sm:$0xf0] }
 0x6b6   :  { %v4094_v39 = vor.u32 %v4903_v33, %v4091_v36  ;;  %v4885_v36 = vld [vmem:[%s7217_s2 + $0x2c] sm:$0xf0] }
 0x6b8   :  { %3997 = vmatmul.msk.bf16.vlgmr.msrb.gmra.mxu3 %vm354_vm9, %v833_v37  ;;  %v4097_v37 = vld [vmem:[%s7217_s2 + $0x158] sm:$0xf]  ;;  %1185 = vmatpush.bf16.msrb.mxu2 %v4094_v39  ;;  %v4010_v39 = vor.u32 %v4885_v36, %v4009_v17 }
 0x6b9   :  { %1197 = vmatpush.bf16.msra.mxu3 %v4130_v10  ;;  %v4098_v40 = vor.u32 %v4906_v38, %v4097_v37  ;;  %v4883_v37 = vld [vmem:[%s7217_s2 + $0x14] sm:$0xf] }
 0x6ba   :  { %v4011_v38 = vld [vmem:[%s7217_s2 + $0x30] sm:$0xf0] }
 0x6bd   :  { %1198 = vmatpush.bf16.msra.mxu3 %v4114_v26 }
 0x6c1   :  { %1199 = vmatpush.bf16.msra.mxu3 %v4098_v40  ;;  %v4014_v40 = vor.u32 %v4883_v37, %v4011_v38 }
 0x6ea   :  { %v757_v41 = vpop.f32.mrf.mxu3 }
 0x6eb   :  { %v762_v42 = vadd.f32 %v757_v41, %v5629_v44  ;;  %v5058_v44 = vld [vmem:[%s7221_s6] ss:$0 sm:$0xff]  ;;  %v4904_v41 = vld [vmem:[%s7217_s2 + $0x15c] sm:$0xf] }
 0x6f2   :  { %v759_v22 = vpop.f32.mrf.mxu3 }
 0x6f3   :  { %v763_v51 = vadd.f32 %v759_v22, %v614_v49  ;;  %v4899_v22 = vld [vmem:[%s7217_s2 + $0x114] sm:$0xf]  ;;  %v4083_v49 = vld [vmem:[%s7217_s2 + $0x138] sm:$0xf0] }
 0x73b   :  { %v872_v24 = vpop.f32.mrf.mxu3 }
 0x73c   :  { %v880_v0 = vpack.c.bf16 %v872_v24, %v851_v31  ;;  %v4115_v31 = vld [vmem:[%s7217_s2 + $0x1b8] sm:$0xf0]  ;;  %v4074_v24 = vor.u32 %v4901_v2, %v4073_v45 }
 0x73d   :  { %v4118_v32 = vor.u32 %v4908_v30, %v4115_v31  ;;  %v4034_v31 = vor.u32 %v4890_v28, %v4033_v27 }
 0x73e   :  { %4006 = vmatmul.msk.bf16.vlgmr.msra.gmra.mxu0 %vm315_vm7, %v880_v0  ;;  %v4075_v0 = vld [vmem:[%s7217_s2 + $0x130] sm:$0xf0] }
 0x73f   :  { %1212 = vmatpush.bf16.msrb.mxu0 %v4118_v32  ;;  %v4888_v32 = vld [vmem:[%s7217_s2 + $0x5c] sm:$0xf] }
 0x743   :  { %v874_v46 = vpop.f32.mrf.mxu3 }
 0x744   :  { %v4081_v46 = vld [vmem:[%s7217_s2 + $0x118] sm:$0xf] }
 0x7bb   :  { %v905_v47 = vpop.f32.mrf.mxu0 }
 0x7bc   :  { %v910_v48 = vadd.f32 %v905_v47, %v762_v42  ;;  %v4099_v42 = vld [vmem:[%s7217_s2 + $0x178] sm:$0xf0]  ;;  %v4078_v47 = vor.u32 %v4899_v22, %v4075_v0 }
 0x7bd   :  { %v4102_v43 = vor.u32 %v4904_v41, %v4099_v42  ;;  %v4017_v41 = vld [vmem:[%s7217_s2 + $0x18] sm:$0xf]  ;;  %v4019_v22 = vld [vmem:[%s7217_s2 + $0x38] sm:$0xf0] }
 0x7be   :  { %v914_v23 = vadd.f32 %v5058_v44, %v910_v48  ;;  %1186 = vmatpush.bf16.msrb.mxu2 %v4078_v47  ;;  %v4886_v42 = vld [vmem:[%s7217_s2 + $0x34] sm:$0xf0] }
 0x7bf   :  { %1213 = vmatpush.bf16.msrb.mxu0 %v4102_v43  ;;  %v4884_v43 = vld [vmem:[%s7217_s2 + $0x1c] sm:$0xf]  ;;  %v4018_v2 = vor.u32 %v4886_v42, %v4017_v41 }
 0x7c0   :  { %v916_v50 = vadd.f32 %v914_v23, %v5478_v54  ;;  %v4900_v23 = vld [vmem:[%s7217_s2 + $0x11c] sm:$0xf] }
 0x7c2   :  { %920 = vadd.xlane.f32.xlu2 %v916_v50 }
 0x7c3   :  { %v907_v52 = vpop.f32.mrf.mxu0 }
 0x7c4   :  { %v911_v53 = vadd.f32 %v907_v52, %v763_v51  ;;  %v4057_v51 = vld [vmem:[%s7217_s2 + $0xd0] sm:$0xf] }
 0x7c5   :  { %v4897_v52 = vld [vmem:[%s7217_s2 + $0xec] sm:$0xf0] }
 0x7c6   :  { %v915_v56 = vadd.f32 %v5058_v44, %v911_v53  ;;  %v4902_v44 = vld [vmem:[%s7217_s2 + $0x134] sm:$0xf0]  ;;  %v4895_v53 = vld [vmem:[%s7217_s2 + $0xd4] sm:$0xf] }
 0x7c7   :  { %v4082_v48 = vor.u32 %v4902_v44, %v4081_v46 }
 0x7c8   :  { %v917_v57 = vadd.f32 %v915_v56, %v5480_v55  ;;  %v4121_v55 = vld [vmem:[%s7217_s2 + $0x1d0] sm:$0xf]  ;;  %v4058_v56 = vor.u32 %v4897_v52, %v4057_v51 }
 0x7c9   :  { %v4122_v4 = vor.u32 %v4913_v1, %v4121_v55  ;;  %1200 = vmatpush.bf16.msra.mxu3 %v4082_v48  ;;  %v4041_v1 = vld [vmem:[%s7217_s2 + $0x90] sm:$0xf] }
 0x7ca   :  { %922 = vadd.xlane.f32.xlu0 %v917_v57  ;;  %v4042_v5 = vor.u32 %v4893_v3, %v4041_v1  ;;  %v5060_v3 = vld [vmem:[%s7221_s6 + $0x2] ss:$0 sm:$0xff] }
 0x7cb   :  { %1169 = vmatpush.bf16.msrb.mxu1 %v4122_v4  ;;  %v4891_v4 = vld [vmem:[%s7217_s2 + $0x94] sm:$0xf] }
 0x7cc   :  { %v4046_v10 = vor.u32 %v4891_v4, %v4043_v6 }
 0x7cf   :  { %1170 = vmatpush.bf16.msrb.mxu1 %v4106_v20  ;;  %v4887_v20 = vld [vmem:[%s7217_s2 + $0x54] sm:$0xf] }
 0x7d0   :  { %v4030_v30 = vor.u32 %v4887_v20, %v4027_v25 }
 0x7d3   :  { %1171 = vmatpush.bf16.msrb.mxu1 %v4090_v35  ;;  %v4038_v35 = vor.u32 %v4888_v32, %v4035_v29 }
 0x7d7   :  { %1172 = vmatpush.bf16.msrb.mxu1 %v4074_v24  ;;  %v4022_v24 = vor.u32 %v4884_v43, %v4019_v22 }
 0x7db   :  { %1173 = vmatpush.bf16.msrb.mxu1 %v4058_v56 }
 0x7df   :  { %1174 = vmatpush.bf16.msrb.mxu1 %v4042_v5 }
 0x7e3   :  { %1175 = vmatpush.bf16.msrb.mxu1 %v4026_v21 }
 0x7e7   :  { %1176 = vmatpush.bf16.msrb.mxu1 %v4010_v39 }
 0x835   :  { %v921_v58 = vpop.xlane.xlu2 %920 }
 0x836   :  { %v924_v59 = vmul.f32 %v921_v58, %v5312_v8  ;;  %v4065_v58 = vld [vmem:[%s7217_s2 + $0xd8] sm:$0xf] }
 0x838   :  { %v5680_v60 = vsub.f32 %v916_v50, %v924_v59  ;;  %v4086_v50 = vor.u32 %v4900_v23, %v4083_v49  ;;  %v4898_v59 = vld [vmem:[%s7217_s2 + $0xf4] sm:$0xf0] }
 0x83a   :  { %v928_v61 = vmul.f32 %v5680_v60, %v5680_v60  ;;  %1214 = vmatpush.bf16.msrb.mxu0 %v4086_v50 }
 0x83c   :  { %930 = vadd.xlane.f32.xlu2 %v928_v61 }
 0x83d   :  { %v923_v15 = vpop.xlane.xlu0 %922 }
 0x83e   :  { %v925_v54 = vmul.f32 %v923_v15, %v5312_v8  ;;  %v4066_v15 = vor.u32 %v4898_v59, %v4065_v58 }
 0x840   :  { %v5685_v62 = vsub.f32 %v917_v57, %v925_v54  ;;  %v4059_v57 = vld [vmem:[%s7217_s2 + $0xf0] sm:$0xf0]  ;;  %v4896_v54 = vld [vmem:[%s7217_s2 + $0xdc] sm:$0xf]  ;;  %1201 = vmatpush.bf16.msra.mxu3 %v4066_v15  ;;  %v5059_v15 = vld [vmem:[%s7221_s6 + $0x1] ss:$0 sm:$0xff] }
 0x841   :  { %v4062_v61 = vor.u32 %v4895_v53, %v4059_v57 }
 0x842   :  { %v929_v63 = vmul.f32 %v5685_v62, %v5685_v62 }
 0x843   :  { %1187 = vmatpush.bf16.msrb.mxu2 %v4062_v61 }
 0x844   :  { %932 = vadd.xlane.f32.xlu1 %v929_v63  ;;  %v4067_v63 = vld [vmem:[%s7217_s2 + $0xf8] sm:$0xf0]  ;;  %1202 = vmatpush.bf16.msra.mxu3 %v4050_v12 }
 0x845   :  { %v4070_v55 = vor.u32 %v4896_v54, %v4067_v63 }
 0x847   :  { %1215 = vmatpush.bf16.msrb.mxu0 %v4070_v55  ;;  %1188 = vmatpush.bf16.msrb.mxu2 %v4046_v10 }
 0x848   :  { %1203 = vmatpush.bf16.msra.mxu3 %v4034_v31 }
 0x84b   :  { %1216 = vmatpush.bf16.msrb.mxu0 %v4054_v16  ;;  %1189 = vmatpush.bf16.msrb.mxu2 %v4030_v30 }
 0x84c   :  { %1204 = vmatpush.bf16.msra.mxu3 %v4018_v2 }
 0x84f   :  { %1217 = vmatpush.bf16.msrb.mxu0 %v4038_v35  ;;  %1190 = vmatpush.bf16.msrb.mxu2 %v4014_v40 }
 0x853   :  { %1218 = vmatpush.bf16.msrb.mxu0 %v4022_v24 }
 0x8af   :  { %v931_v26 = vpop.xlane.xlu2 %930 }
 0x8b0   :  { %v934_v33 = vmul.f32 %v931_v26, %v5312_v8 }
 0x8b2   :  { %v936_v45 = vadd.f32 1e-12, %v934_v33 }
 0x8b4   :  { %5111 = vrsqrt.f32 %v936_v45  ;;  %vm944_vm11 = vweird.f32 %v936_v45 }
 0x8b7   :  { %v933_v0 = vpop.xlane.xlu1 %932 }
 0x8b8   :  { %v935_v46 = vmul.f32 %v933_v0, %v5312_v8 }
 0x8ba   :  { %v5112_v44 = vpop.eup %5111  ;;  %v937_v47 = vadd.f32 1e-12, %v935_v46 }
 0x8bb   :  { %v939_v48 = vmul.f32 %v5112_v44, %v936_v45  ;;  %vm945_vm10 = vweird.f32 %v5112_v44 }
 0x8bc   :  { %5113 = vrsqrt.f32 %v937_v47  ;;  %vm946_vm12 = vmor %vm944_vm11, %vm945_vm10  ;;  %vm954_vm14 = vweird.f32 %v937_v47 }
 0x8bd   :  { %v940_v23 = vmul.f32 %v5112_v44, %v939_v48 }
 0x8bf   :  { %v941_v49 = vmul.f32 0.5, %v940_v23 }
 0x8c1   :  { %v942_v50 = vsub.f32 1.5, %v941_v49 }
 0x8c2   :  { %v5114_v51 = vpop.eup %5113 }
 0x8c3   :  { %v943_v52 = vmul.f32 %v5112_v44, %v942_v50  ;;  %v949_v53 = vmul.f32 %v5114_v51, %v937_v47  ;;  %vm955_vm13 = vweird.f32 %v5114_v51 }
 0x8c4   :  { %vm956_vm15 = vmor %vm954_vm14, %vm955_vm13 }
 0x8c5   :  { %v950_v56 = vmul.f32 %v5114_v51, %v949_v53  ;;  %v947_v57 = vsel %vm946_vm12, %v5112_v44, %v943_v52 }
 0x8c6   :  { %v958_v61 = vmul.f32 %v947_v57, %v5680_v60 }
 0x8c7   :  { %v951_v58 = vmul.f32 0.5, %v950_v56 }
 0x8c8   :  { %v961_v1 = vmul.f32 %v5059_v15, %v958_v61 }
 0x8c9   :  { %v952_v59 = vsub.f32 1.5, %v951_v58 }
 0x8ca   :  { %v5891_v5 = vadd.f32 %v5060_v3, %v961_v1 }
 0x8cb   :  { %v953_v54 = vmul.f32 %v5114_v51, %v952_v59 }
 0x8cd   :  { %v957_v63 = vsel %vm956_vm15, %v5114_v51, %v953_v54 }
 0x8ce   :  { %v959_v55 = vmul.f32 %v957_v63, %v5685_v62  ;;  %v5900_v62 = vld [vmem:[%s7220_s5] sm:$0xf] }
 0x8cf   :  { %v1001_v7 = vperm.slane %v5900_v62, 0  ;;  %v1004_v9 = vperm.slane %v5900_v62, 3  ;;  %v1002_v18 = vperm.slane %v5900_v62, 1  ;;  %v1003_v20 = vperm.slane %v5900_v62, 2 }
 0x8d0   :  { %v962_v4 = vmul.f32 %v5059_v15, %v959_v55 }
 0x8d2   :  { %v5893_v6 = vadd.f32 %v5060_v3, %v962_v4 }
 0x8d4   :  { %v966_v60 = vpack.c.bf16 %v5893_v6, %v5891_v5 }
 0x8d6   :  { %1177 = vmatmul.bf16.vlgmr.msrb.gmra.mxu1 %v966_v60  ;;  %1191 = vmatmul.bf16.vlgmr.msrb.gmra.mxu2 %v966_v60 }
 0x8d7   :  { %1205 = vmatmul.bf16.vlgmr.msra.gmra.mxu3 %v966_v60  ;;  %1219 = vmatmul.bf16.vlgmr.msrb.gmra.mxu0 %v966_v60 }
 0x953   :  { %v1178_v10 = vpop.f32.mrf.mxu1 }
 0x954   :  { %v5904_v12 = vadd.f32 %v1178_v10, %v1001_v7  ;;  %v1220_v13 = vpop.f32.mrf.mxu0 }
 0x955   :  { %v5906_v14 = vadd.f32 %v1220_v13, %v1004_v9 }
 0x956   :  { %v5909_v16 = vmul.f32 0.70710677, %v5904_v12  ;;  %v6082_v62 = vmul.f32 0.5, %v5904_v12 }
 0x957   :  { %v5913_v19 = vmul.f32 0.70710677, %v5906_v14 }
 0x958   :  { %v5917_v21 = vand.u32 2147483647, %v5909_v16 }
 0x959   :  { %v5920_v25 = vand.u32 2147483647, %v5913_v19  ;;  %v1192_v27 = vpop.f32.mrf.mxu2 }
 0x95a   :  { %v1249_v28 = vmul.f32 0.3275911, %v5917_v21  ;;  %v5925_v26 = vadd.f32 %v1192_v27, %v1002_v18  ;;  %v1206_v30 = vpop.f32.mrf.mxu3 }
 0x95b   :  { %v1252_v31 = vmul.f32 0.3275911, %v5920_v25  ;;  %v5930_v32 = vadd.f32 %v1206_v30, %v1003_v20  ;;  %v1180_v45 = vpop.f32.mrf.mxu1 }
 0x95c   :  { %v1257_v29 = vadd.f32 1.0, %v1249_v28  ;;  %v5933_v33 = vmul.f32 0.70710677, %v5925_v26  ;;  %v1222_v24 = vpop.f32.mrf.mxu0  ;;  %v5952_v48 = vadd.f32 %v1180_v45, %v1001_v7 }
 0x95d   :  { %v1260_v17 = vadd.f32 1.0, %v1252_v31  ;;  %v5936_v35 = vmul.f32 0.70710677, %v5930_v32  ;;  %v5954_v50 = vadd.f32 %v1222_v24, %v1004_v9 }
 0x95e   :  { %5115 = vrcp.f32 %v1257_v29  ;;  %v5939_v36 = vand.u32 2147483647, %v5933_v33  ;;  %v1274_v46 = vand.u32 2147483647, %v1257_v29  ;;  %v1276_v44 = vand.u32 2147483648, %v1257_v29 }
 0x95f   :  { %5117 = vrcp.f32 %v1260_v17  ;;  %v5942_v37 = vand.u32 2147483647, %v5936_v35  ;;  %v1321_v49 = vand.u32 2147483648, %v1260_v17  ;;  %v1319_v52 = vand.u32 2147483647, %v1260_v17 }
 0x960   :  { %v1250_v38 = vmul.f32 0.3275911, %v5939_v36  ;;  %vm1270_vm2 = vweird.f32 %v1257_v29  ;;  %v1277_v56 = vor.u32 1.1754944e-38, %v1276_v44  ;;  %vm1315_vm4 = vweird.f32 %v1260_v17 }
 0x961   :  { %v1251_v40 = vmul.f32 0.3275911, %v5942_v37  ;;  %v5957_v58 = vmul.f32 0.70710677, %v5952_v48  ;;  %vm1275_vm5 = vcmp.eq.f32.partialorder %v1274_v46, 8.507059e+37  ;;  %v1322_v15 = vor.u32 1.1754944e-38, %v1321_v49 }
 0x962   :  { %v5946_v43 = vadd.f32 1.0, %v1250_v38  ;;  %v5960_v54 = vmul.f32 0.70710677, %v5954_v50  ;;  %vm1320_vm10 = vcmp.eq.f32.partialorder %v1319_v52, 8.507059e+37 }
 0x963   :  { %v5948_v22 = vadd.f32 1.0, %v1251_v40  ;;  %v5974_v13 = vand.u32 2147483647, %v5957_v58 }
 0x964   :  { %v5116_v39 = vpop.eup %5115  ;;  %5119 = vrcp.f32 %v5946_v43  ;;  %v5977_v30 = vand.u32 2147483647, %v5960_v54  ;;  %v1291_v45 = vand.u32 2147483648, %v5946_v43  ;;  %vm1285_vm12 = vweird.f32 %v5946_v43 }
 0x965   :  { %v5118_v41 = vpop.eup %5117  ;;  %v1266_v42 = vmul.f32 %v5116_v39, %v1257_v29  ;;  %5121 = vrcp.f32 %v5948_v22  ;;  %vm1271_vm0 = vweird.f32 %v5116_v39 }
 0x966   :  { %v1311_v2 = vmul.f32 %v5118_v41, %v1260_v17  ;;  %vm1316_vm1 = vweird.f32 %v5118_v41  ;;  %vm1272_vm3 = vmor %vm1270_vm2, %vm1271_vm0  ;;  %v1253_v17 = vmul.f32 0.3275911, %v5974_v13  ;;  %v1256_v40 = vmul.f32 0.3275911, %v5977_v30 }
 0x967   :  { %v1267_v0 = vsub.f32 1.0, %v1266_v42  ;;  %vm1317_vm6 = vmor %vm1315_vm4, %vm1316_vm1  ;;  %v1289_v42 = vand.u32 2147483647, %v5946_v43  ;;  %vm1300_vm0 = vweird.f32 %v5948_v22 }
 0x968   :  { %v1312_v47 = vsub.f32 1.0, %v1311_v2  ;;  %v5985_v2 = vadd.f32 1.0, %v1253_v17  ;;  %v5990_v46 = vadd.f32 1.0, %v1256_v40 }
 0x969   :  { %v1268_v23 = vmul.f32 %v5116_v39, %v1267_v0  ;;  %vm1290_vm14 = vcmp.eq.f32.partialorder %v1289_v42, 8.507059e+37 }
 0x96a   :  { %v1313_v51 = vmul.f32 %v5118_v41, %v1312_v47  ;;  %v5120_v59 = vpop.eup %5119  ;;  %v1460_v47 = vsub.f32 0.0, %v5920_v25  ;;  %5123 = vrcp.f32 %v5985_v2  ;;  %vm1330_vm4 = vweird.f32 %v5985_v2 }
 0x96b   :  { %v1269_v53 = vadd.f32 %v5116_v39, %v1268_v23  ;;  %v5962_v63 = vpop.eup %5121  ;;  %v1281_v3 = vmul.f32 %v5120_v59, %v5946_v43  ;;  %vm1286_vm11 = vweird.f32 %v5120_v59  ;;  %5125 = vrcp.f32 %v5990_v46 }
 0x96c   :  { %v1314_v57 = vadd.f32 %v5118_v41, %v1313_v51  ;;  %v1296_v7 = vmul.f32 %v5962_v63, %v5948_v22  ;;  %vm1287_vm13 = vmor %vm1285_vm12, %vm1286_vm11  ;;  %v1292_v51 = vor.u32 1.1754944e-38, %v1291_v45  ;;  %vm1301_vm15 = vweird.f32 %v5962_v63 }
 0x96d   :  { %v1273_v61 = vsel %vm1272_vm3, %v5116_v39, %v1269_v53  ;;  %v1282_v10 = vsub.f32 1.0, %v1281_v3  ;;  %v1457_v39 = vsub.f32 0.0, %v5917_v21  ;;  %vm1302_vm1 = vmor %vm1300_vm0, %vm1301_vm15  ;;  %vm1375_vm11 = vweird.f32 %v5990_v46 }
 0x96e   :  { %v5964_v55 = vsel %vm1275_vm5, %v1277_v56, %v1273_v61  ;;  %v1318_v1 = vsel %vm1317_vm6, %v5118_v41, %v1314_v57  ;;  %v1297_v28 = vsub.f32 1.0, %v1296_v7  ;;  %v1468_v56 = vmul.f32 %v1460_v47, %v5920_v25 }
 0x96f   :  { %v1385_v4 = vmul.f32 1.0614054, %v5964_v55  ;;  %v5968_v60 = vsel %vm1320_vm10, %v1322_v15, %v1318_v1  ;;  %v1283_v29 = vmul.f32 %v5120_v59, %v1282_v10  ;;  %v1465_v23 = vmul.f32 %v1457_v39, %v5917_v21 }
 0x970   :  { %v1388_v9 = vmul.f32 1.0614054, %v5968_v60  ;;  %v1298_v0 = vmul.f32 %v5962_v63, %v1297_v28  ;;  %v1306_v61 = vand.u32 2147483648, %v5948_v22  ;;  %v1304_v21 = vand.u32 2147483647, %v5948_v22  ;;  %v5124_v1 = vpop.eup %5123 }
 0x971   :  { %v1393_v27 = vadd.f32 -1.4531521, %v1385_v4  ;;  %v1284_v41 = vadd.f32 %v5120_v59, %v1283_v29  ;;  %v1473_v15 = vmul.f32 1.442695, %v1465_v23  ;;  %v1326_v25 = vmul.f32 %v5124_v1, %v5985_v2 }
 0x972   :  { %v1396_v31 = vadd.f32 -1.4531521, %v1388_v9  ;;  %v1299_v53 = vadd.f32 %v5962_v63, %v1298_v0  ;;  %v1479_v10 = vmul.f32 1.442695, %v1468_v56  ;;  %vm1305_vm2 = vcmp.eq.f32.partialorder %v1304_v21, 8.507059e+37 }
 0x973   :  { %v1401_v38 = vmul.f32 %v1393_v27, %v5964_v55  ;;  %v1288_v49 = vsel %vm1287_vm13, %v5120_v59, %v1284_v41  ;;  %v1194_v59 = vpop.f32.mrf.mxu2  ;;  %v1307_v27 = vor.u32 1.1754944e-38, %v1306_v61  ;;  %5127 = vpow2.f32 %v1473_v15 }
 0x974   :  { %v1404_v24 = vmul.f32 %v1396_v31, %v5968_v60  ;;  %v6000_v57 = vsel %vm1290_vm14, %v1292_v51, %v1288_v49  ;;  %v1303_v7 = vsel %vm1302_vm1, %v5962_v63, %v1299_v53  ;;  %v6011_v28 = vadd.f32 %v1194_v59, %v1002_v18  ;;  %v5126_v31 = vpop.eup %5125  ;;  %v4946_v53 = vld [vmem:[%s7218_s3 + $0xf8] sm:$0xff] }
 0x975   :  { %v1409_v44 = vadd.f32 1.4214138, %v1401_v38  ;;  %v1386_v4 = vmul.f32 1.0614054, %v6000_v57  ;;  %v1327_v22 = vsub.f32 1.0, %v1326_v25  ;;  %v1336_v29 = vand.u32 2147483648, %v5985_v2  ;;  %1849 = vmatpush.bf16.msra.mxu0 %v4946_v53 }
 0x976   :  { %v1412_v52 = vadd.f32 1.4214138, %v1404_v24  ;;  %v6014_v17 = vsel %vm1305_vm2, %v1307_v27, %v1303_v7  ;;  %v1334_v38 = vand.u32 2147483647, %v5985_v2  ;;  %v1461_v63 = vsub.f32 0.0, %v5974_v13  ;;  %v4922_v2 = vld [vmem:[%s7218_s3 + $0x38] sm:$0xff] }
 0x977   :  { %v1417_v43 = vmul.f32 %v1409_v44, %v5964_v55  ;;  %v1371_v39 = vmul.f32 %v5126_v31, %v5990_v46  ;;  %v1394_v41 = vadd.f32 -1.4531521, %v1386_v4  ;;  %v1328_v42 = vmul.f32 %v5124_v1, %v1327_v22  ;;  %1807 = vmatpush.bf16.msra.mxu1 %v4922_v2  ;;  %v4945_v22 = vld [vmem:[%s7218_s3 + $0xf0] sm:$0xff] }
 0x978   :  { %v1420_v3 = vmul.f32 %v1412_v52, %v5968_v60  ;;  %vm1331_vm3 = vweird.f32 %v5124_v1  ;;  %v6022_v24 = vmul.f32 0.70710677, %v6011_v28  ;;  %v1387_v0 = vmul.f32 1.0614054, %v6014_v17 }
 0x979   :  { %v1425_v9 = vadd.f32 -0.28449672, %v1417_v43  ;;  %v1372_v45 = vsub.f32 1.0, %v1371_v39  ;;  %v1329_v44 = vadd.f32 %v5124_v1, %v1328_v42  ;;  %v1337_v47 = vor.u32 1.1754944e-38, %v1336_v29  ;;  %vm1332_vm5 = vmor %vm1330_vm4, %vm1331_vm3  ;;  %v5128_v43 = vpop.eup %5127  ;;  %1850 = vmatpush.bf16.msra.mxu0 %v4945_v22 }
 0x97a   :  { %v1428_v40 = vadd.f32 -0.28449672, %v1420_v3  ;;  %v1381_v23 = vand.u32 2147483648, %v5990_v46  ;;  %vm1376_vm6 = vweird.f32 %v5126_v31  ;;  %v1379_v51 = vand.u32 2147483647, %v5990_v46  ;;  %v4921_v46 = vld [vmem:[%s7218_s3 + $0x30] sm:$0xff] }
 0x97b   :  { %v1433_v18 = vmul.f32 %v1425_v9, %v5964_v55  ;;  %v1373_v49 = vmul.f32 %v5126_v31, %v1372_v45  ;;  %v6028_v52 = vand.u32 2147483647, %v6022_v24  ;;  %v1402_v61 = vmul.f32 %v1394_v41, %v6000_v57  ;;  %vm1377_vm12 = vmor %vm1375_vm11, %vm1376_vm6  ;;  %v1208_v41 = vpop.f32.mrf.mxu3  ;;  %1808 = vmatpush.bf16.msra.mxu1 %v4921_v46  ;;  %v4930_v45 = vld [vmem:[%s7218_s3 + $0x78] sm:$0xff]  ;;  %v4943_v46 = vld [vmem:[%s7218_s3 + $0xe0] sm:$0xff] }
 0x97c   :  { %v1436_v56 = vmul.f32 %v1428_v40, %v5968_v60  ;;  %v1333_v15 = vsel %vm1332_vm5, %v5124_v1, %v1329_v44  ;;  %vm1335_vm10 = vcmp.eq.f32.partialorder %v1334_v38, 8.507059e+37  ;;  %v1458_v4 = vsub.f32 0.0, %v5939_v36  ;;  %v4938_v44 = vld [vmem:[%s7218_s3 + $0xb8] sm:$0xff]  ;;  %1821 = vmatpush.bf16.msra.mxu2 %v4930_v45 }
 0x97d   :  { %v1441_v21 = vadd.f32 0.2548296, %v1433_v18  ;;  %v6038_v59 = vsel %vm1335_vm10, %v1337_v47, %v1333_v15  ;;  %v1374_v3 = vadd.f32 %v5126_v31, %v1373_v49  ;;  %v1382_v25 = vor.u32 1.1754944e-38, %v1381_v23  ;;  %1835 = vmatpush.bf16.msrb.mxu3 %v4938_v44  ;;  %v4929_v15 = vld [vmem:[%s7218_s3 + $0x70] sm:$0xff] }
 0x97e   :  { %v1389_v7 = vmul.f32 1.0614054, %v6038_v59  ;;  %v1254_v9 = vmul.f32 0.3275911, %v6028_v52  ;;  %5129 = vpow2.f32 %v1479_v10  ;;  %vm1380_vm13 = vcmp.eq.f32.partialorder %v1379_v51, 8.507059e+37  ;;  %v4920_v51 = vld [vmem:[%s7218_s3 + $0x28] sm:$0xff] }
 0x97f   :  { %v1378_v1 = vsel %vm1377_vm12, %v5126_v31, %v1374_v3  ;;  %v1464_v27 = vsub.f32 0.0, %v5977_v30  ;;  %v1444_v29 = vadd.f32 0.2548296, %v1436_v56  ;;  %v1410_v38 = vadd.f32 1.4214138, %v1402_v61  ;;  %1809 = vmatpush.bf16.msra.mxu1 %v4920_v51 }
 0x980   :  { %v1397_v39 = vadd.f32 -1.4531521, %v1389_v7  ;;  %v6052_v40 = vsel %vm1380_vm13, %v1382_v25, %v1378_v1  ;;  %v1449_v10 = vmul.f32 %v1441_v21, %v5964_v55  ;;  %v1469_v31 = vmul.f32 %v1461_v63, %v5974_v13  ;;  %1822 = vmatpush.bf16.msra.mxu2 %v4929_v15 }
 0x981   :  { %v1392_v42 = vmul.f32 1.0614054, %v6052_v40  ;;  %v6057_v18 = vadd.f32 1.0, %v1254_v9  ;;  %v1466_v47 = vmul.f32 %v1458_v4, %v5939_v36  ;;  %v1395_v23 = vadd.f32 -1.4531521, %v1387_v0  ;;  %v4944_v36 = vld [vmem:[%s7218_s3 + $0xe8] sm:$0xff] }
 0x982   :  { %v1405_v55 = vmul.f32 %v1397_v39, %v6038_v59  ;;  %v1472_v63 = vmul.f32 %v1464_v27, %v5977_v30  ;;  %v6071_v49 = vadd.f32 %v1208_v41, %v1003_v20  ;;  %v1452_v0 = vmul.f32 %v1444_v29, %v5968_v60  ;;  %1851 = vmatpush.bf16.msra.mxu0 %v4944_v36  ;;  %v4937_v60 = vld [vmem:[%s7218_s3 + $0xb0] sm:$0xff]  ;;  %v4928_v41 = vld [vmem:[%s7218_s3 + $0x68] sm:$0xff] }
 0x983   :  { %v1400_v13 = vadd.f32 -1.4531521, %v1392_v42  ;;  %5131 = vrcp.f32 %v6057_v18  ;;  %v1418_v30 = vmul.f32 %v1410_v38, %v6000_v57  ;;  %v6084_v20 = vmul.f32 %v5128_v43, %v1449_v10  ;;  %1836 = vmatpush.bf16.msrb.mxu3 %v4937_v60  ;;  %v4936_v10 = vld [vmem:[%s7218_s3 + $0xa8] sm:$0xff] }
 0x984   :  { %v1413_v2 = vadd.f32 1.4214138, %v1405_v55  ;;  %v5130_v53 = vpop.eup %5129  ;;  %v1481_v56 = vmul.f32 1.442695, %v1469_v31  ;;  %v6094_v21 = vmul.f32 0.5, %v5906_v14  ;;  %v1403_v43 = vmul.f32 %v1395_v23, %v6014_v17  ;;  %v4919_v14 = vld [vmem:[%s7218_s3 + $0x20] sm:$0xff]  ;;  %1823 = vmatpush.bf16.msra.mxu2 %v4928_v41 }
 0x985   :  { %v1408_v61 = vmul.f32 %v1400_v13, %v6052_v40  ;;  %v1475_v12 = vmul.f32 1.442695, %v1466_v47  ;;  %v1487_v7 = vmul.f32 1.442695, %v1472_v63  ;;  %v6099_v25 = vmul.f32 0.70710677, %v6071_v49  ;;  %1810 = vmatpush.bf16.msra.mxu1 %v4919_v14 }
 0x986   :  { %v1421_v3 = vmul.f32 %v1413_v2, %v6038_v59  ;;  %vm1505_vm14 = vcmp.ge.f32.partialorder %v5909_v16, 0.0  ;;  %v6102_v9 = vmul.f32 %v5130_v53, %v1452_v0  ;;  %v1426_v1 = vadd.f32 -0.28449672, %v1418_v30  ;;  %1852 = vmatpush.bf16.msra.mxu0 %v4943_v46  ;;  %v4918_v55 = vld [vmem:[%s7218_s3 + $0x18] sm:$0xff] }
 0x987   :  { %v1416_v4 = vadd.f32 1.4214138, %v1408_v61  ;;  %v1497_v29 = vsub.f32 1.0, %v6084_v20  ;;  %5133 = vpow2.f32 %v1481_v56  ;;  %v6115_v39 = vand.u32 2147483647, %v6099_v25  ;;  %1837 = vmatpush.bf16.msrb.mxu3 %v4936_v10  ;;  %v4942_v0 = vld [vmem:[%s7218_s3 + $0xd8] sm:$0xff] }
 0x988   :  { %v1429_v27 = vadd.f32 -0.28449672, %v1421_v3  ;;  %5135 = vpow2.f32 %v1475_v12  ;;  %v1411_v31 = vadd.f32 1.4214138, %v1403_v43  ;;  %vm1508_vm15 = vcmp.ge.f32.partialorder %v5913_v19, 0.0  ;;  %v4927_v56 = vld [vmem:[%s7218_s3 + $0x60] sm:$0xff] }
 0x989   :  { %v6110_v22 = vpop.eup %5131  ;;  %v1424_v38 = vmul.f32 %v1416_v4, %v6052_v40  ;;  %v1459_v44 = vsub.f32 0.0, %v5942_v37  ;;  %5137 = vpow2.f32 %v1487_v7  ;;  %v1255_v23 = vmul.f32 0.3275911, %v6115_v39  ;;  %v4935_v61 = vld [vmem:[%s7218_s3 + $0xa0] sm:$0xff]  ;;  %1811 = vmatpush.bf16.msra.mxu1 %v4918_v55  ;;  %1824 = vmatpush.bf16.msra.mxu2 %v4927_v56  ;;  %v4940_v55 = vld [vmem:[%s7218_s3 + $0xc8] sm:$0xff]  ;;  %v4933_v19 = vld [vmem:[%s7218_s3 + $0x90] sm:$0xff] }
 0x98a   :  { %v1437_v42 = vmul.f32 %v1429_v27, %v6038_v59  ;;  %v1341_v45 = vmul.f32 %v6110_v22, %v6057_v18  ;;  %v1500_v13 = vsub.f32 1.0, %v6102_v9  ;;  %v1434_v63 = vmul.f32 %v1426_v1, %v6000_v57  ;;  %1853 = vmatpush.bf16.msra.mxu0 %v4942_v0  ;;  %v4941_v9 = vld [vmem:[%s7218_s3 + $0xd0] sm:$0xff] }
 0x98b   :  { %v1432_v47 = vadd.f32 -0.28449672, %v1424_v38  ;;  %v1513_v30 = vsub.f32 0.0, %v1497_v29  ;;  %v1351_v53 = vand.u32 2147483648, %v6057_v18  ;;  %v6139_v20 = vadd.f32 1.0, %v1255_v23  ;;  %1838 = vmatpush.bf16.msrb.mxu3 %v4935_v61  ;;  %v4916_v23 = vld [vmem:[%s7218_s3 + $0x8] sm:$0xff] }
 0x98c   :  { %v1445_v51 = vadd.f32 0.2548296, %v1437_v42  ;;  %v1342_v36 = vsub.f32 1.0, %v1341_v45  ;;  %vm1346_vm0 = vweird.f32 %v6110_v22  ;;  %v1349_v12 = vand.u32 2147483647, %v6057_v18  ;;  %v4926_v42 = vld [vmem:[%s7218_s3 + $0x58] sm:$0xff] }
 0x98d   :  { %v1440_v2 = vmul.f32 %v1432_v47, %v6052_v40  ;;  %v5134_v43 = vpop.eup %5133  ;;  %v1419_v3 = vmul.f32 %v1411_v31, %v6014_v17  ;;  %v6153_v4 = vmul.f32 %v1459_v44, %v5942_v37  ;;  %5139 = vrcp.f32 %v6139_v20  ;;  %1825 = vmatpush.bf16.msra.mxu2 %v4926_v42 }
 0x98e   :  { %v1453_v15 = vmul.f32 %v1445_v51, %v6038_v59  ;;  %v1343_v60 = vmul.f32 %v6110_v22, %v1342_v36  ;;  %v4917_v59 = vld [vmem:[%s7218_s3 + $0x10] sm:$0xff]  ;;  %v6162_v1 = vpop.eup %5135  ;;  %v1516_v27 = vsub.f32 0.0, %v1500_v13  ;;  %vm1345_vm1 = vweird.f32 %v6057_v18  ;;  %v4934_v18 = vld [vmem:[%s7218_s3 + $0x98] sm:$0xff]  ;;  %1854 = vmatpush.bf16.msra.mxu0 %v4941_v9 }
 0x98f   :  { %v1448_v7 = vadd.f32 0.2548296, %v1440_v2  ;;  %v5138_v46 = vpop.eup %5137  ;;  %v1521_v38 = vsel %vm1505_vm14, %v1497_v29, %v1513_v30  ;;  %v1229_v41 = vmul.f32 0.5, %v5952_v48  ;;  %vm1347_vm2 = vmor %vm1345_vm1, %vm1346_vm0  ;;  %v1352_v31 = vor.u32 1.1754944e-38, %v1351_v53  ;;  %1812 = vmatpush.bf16.msra.mxu1 %v4917_v59  ;;  %1839 = vmatpush.bf16.msrb.mxu3 %v4934_v18  ;;  %v4925_v53 = vld [vmem:[%s7218_s3 + $0x50] sm:$0xff] }
 0x990   :  { %v1493_v14 = vmul.f32 %v5134_v43, %v1453_v15  ;;  %v1344_v37 = vadd.f32 %v6110_v22, %v1343_v60  ;;  %v1442_v45 = vadd.f32 0.2548296, %v1434_v63  ;;  %vm1350_vm3 = vcmp.eq.f32.partialorder %v1349_v12, 8.507059e+37  ;;  %v4915_v43 = vld [vmem:[%s7218_s3] sm:$0xff] }
 0x991   :  { %v1456_v10 = vmul.f32 %v1448_v7, %v6052_v40  ;;  %v1427_v48 = vadd.f32 -0.28449672, %v1419_v3  ;;  %v1462_v47 = vsub.f32 0.0, %v6028_v52  ;;  %v1524_v63 = vsel %vm1508_vm15, %v1500_v13, %v1516_v27  ;;  %1826 = vmatpush.bf16.msra.mxu2 %v4925_v53 }
 0x992   :  { %v1501_v44 = vsub.f32 1.0, %v1493_v14  ;;  %v1348_v16 = vsel %vm1347_vm2, %v6110_v22, %v1344_v37  ;;  %v1529_v22 = vadd.f32 1.0, %v1521_v38  ;;  %vm1509_vm4 = vcmp.ge.f32.partialorder %v5957_v58, 0.0  ;;  %1855 = vmatpush.bf16.msra.mxu0 %v4940_v55 }
 0x993   :  { %v1496_v40 = vmul.f32 %v5138_v46, %v1456_v10  ;;  %v6179_v29 = vsel %vm1350_vm3, %v1352_v31, %v1348_v16  ;;  %v5140_v0 = vpop.eup %5139  ;;  %v1232_v30 = vmul.f32 0.5, %v5954_v50  ;;  %vm1512_vm5 = vcmp.ge.f32.partialorder %v5960_v54, 0.0  ;;  %1813 = vmatpush.bf16.msra.mxu1 %v4916_v23  ;;  %1840 = vmatpush.bf16.msrb.mxu3 %v4933_v19  ;;  %v4924_v46 = vld [vmem:[%s7218_s3 + $0x48] sm:$0xff] }
 0x994   :  { %v1517_v51 = vsub.f32 0.0, %v1501_v44  ;;  %v1390_v36 = vmul.f32 1.0614054, %v6179_v29  ;;  %v1450_v13 = vmul.f32 %v1442_v45, %v6000_v57  ;;  %v1356_v15 = vmul.f32 %v5140_v0, %v6139_v20  ;;  %v4939_v57 = vld [vmem:[%s7218_s3 + $0xc0] sm:$0xff] }
 0x995   :  { %v1504_v2 = vsub.f32 1.0, %v1496_v40  ;;  %v1532_v50 = vadd.f32 1.0, %v1524_v63  ;;  %v1470_v12 = vmul.f32 %v1462_v47, %v6028_v52  ;;  %v1537_v3 = vmul.f32 %v1529_v22, %v6082_v62  ;;  %v4932_v62 = vld [vmem:[%s7218_s3 + $0x88] sm:$0xff]  ;;  %1827 = vmatpush.bf16.msra.mxu2 %v4924_v46 }
 0x996   :  { %v1525_v56 = vsel %vm1509_vm4, %v1501_v44, %v1517_v51  ;;  %v1398_v61 = vadd.f32 -1.4531521, %v1390_v36  ;;  %v1435_v7 = vmul.f32 %v1427_v48, %v6014_v17  ;;  %v1357_v9 = vsub.f32 1.0, %v1356_v15  ;;  %1856 = vmatpush.bf16.msra.mxu0 %v4939_v57 }
 0x997   :  { %v1533_v58 = vadd.f32 1.0, %v1525_v56  ;;  %v1520_v60 = vsub.f32 0.0, %v1504_v2  ;;  %v1364_v14 = vand.u32 2147483647, %v6139_v20  ;;  %v1366_v37 = vand.u32 2147483648, %v6139_v20  ;;  %1814 = vmatpush.bf16.msra.mxu1 %v4915_v43  ;;  %1841 = vmatpush.bf16.msrb.mxu3 %v4932_v62 }
 0x998   :  { %v1406_v59 = vmul.f32 %v1398_v61, %v6179_v29  ;;  %v1358_v31 = vmul.f32 %v5140_v0, %v1357_v9  ;;  %vm1361_vm6 = vweird.f32 %v5140_v0  ;;  %v1540_v54 = vmul.f32 %v1532_v50, %v6094_v21  ;;  %v4923_v21 = vld [vmem:[%s7218_s3 + $0x40] sm:$0xff] }
 0x999   :  { %v1541_v27 = vmul.f32 %v1533_v58, %v1229_v41  ;;  %v1528_v52 = vsel %vm1512_vm5, %v1504_v2, %v1520_v60  ;;  %v1490_v41 = vmul.f32 %v6162_v1, %v1450_v13  ;;  %v1483_v18 = vmul.f32 1.442695, %v1470_v12  ;;  %v4931_v1 = vld [vmem:[%s7218_s3 + $0x80] sm:$0xff]  ;;  %1828 = vmatpush.bf16.msra.mxu2 %v4923_v21 }
 0x99a   :  { %v1536_v38 = vadd.f32 1.0, %v1528_v52  ;;  %v1414_v10 = vadd.f32 1.4214138, %v1406_v59  ;;  %v1359_v16 = vadd.f32 %v5140_v0, %v1358_v31  ;;  %vm1360_vm10 = vweird.f32 %v6139_v20 }
 0x99b   :  { %v1545_v42 = vpack.c.bf16 %v1541_v27, %v1537_v3  ;;  %v1477_v48 = vmul.f32 1.442695, %v6153_v4  ;;  %vm1362_vm11 = vmor %vm1360_vm10, %vm1361_vm6  ;;  %v1367_v40 = vor.u32 1.1754944e-38, %v1366_v37  ;;  %vm1365_vm12 = vcmp.eq.f32.partialorder %v1364_v14, 8.507059e+37  ;;  %1842 = vmatpush.bf16.msrb.mxu3 %v4931_v1 }
 0x99c   :  { %v1544_v45 = vmul.f32 %v1536_v38, %v1232_v30  ;;  %v1422_v44 = vmul.f32 %v1414_v10, %v6179_v29  ;;  %v1363_v55 = vsel %vm1362_vm11, %v5140_v0, %v1359_v16  ;;  %5141 = vpow2.f32 %v1483_v18 }
 0x99d   :  { %1815 = vmatmul.bf16.vlgmr.msra.gmra.mxu1 %v1545_v42  ;;  %v1368_v22 = vsel %vm1365_vm12, %v1367_v40, %v1363_v55  ;;  %v1463_v20 = vsub.f32 0.0, %v6115_v39  ;;  %v1498_v4 = vsub.f32 1.0, %v1490_v41  ;;  %v1443_v63 = vadd.f32 0.2548296, %v1435_v7 }
 0x99e   :  { %v1548_v47 = vpack.c.bf16 %v1544_v45, %v1540_v54  ;;  %v1430_v23 = vadd.f32 -0.28449672, %v1422_v44  ;;  %v1391_v36 = vmul.f32 1.0614054, %v1368_v22  ;;  %5143 = vpow2.f32 %v1477_v48 }
 0x99f   :  { %v1471_v53 = vmul.f32 %v1463_v20, %v6115_v39  ;;  %v1514_v19 = vsub.f32 0.0, %v1498_v4  ;;  %v1451_v0 = vmul.f32 %v1443_v63, %v6014_v17  ;;  %vm1506_vm13 = vcmp.ge.f32.partialorder %v5933_v33, 0.0 }
 0x9a0   :  { %v1438_v51 = vmul.f32 %v1430_v23, %v6179_v29  ;;  %1857 = vmatmul.bf16.vlgmr.msra.gmra.mxu0 %v1548_v47  ;;  %v1399_v2 = vadd.f32 -1.4531521, %v1391_v36  ;;  %vm1510_vm14 = vcmp.ge.f32.partialorder %v6022_v24, 0.0  ;;  %v1226_v27 = vmul.f32 0.5, %v5925_v26 }
 0x9a1   :  { %v1485_v60 = vmul.f32 1.442695, %v1471_v53  ;;  %v1522_v12 = vsel %vm1506_vm13, %v1498_v4, %v1514_v19  ;;  %v1230_v52 = vmul.f32 0.5, %v6011_v28  ;;  %vm1507_vm15 = vcmp.ge.f32.partialorder %v5936_v35, 0.0  ;;  %v5061_v35 = vld [vmem:[%s7221_s6 + $0x3] ss:$0 sm:$0xff] }
 0x9a2   :  { %v1446_v30 = vadd.f32 0.2548296, %v1438_v51  ;;  %v1407_v56 = vmul.f32 %v1399_v2, %v1368_v22  ;;  %v5142_v61 = vpop.eup %5141  ;;  %v1530_v39 = vadd.f32 1.0, %v1522_v12  ;;  %vm1511_vm0 = vcmp.ge.f32.partialorder %v6099_v25, 0.0  ;;  %v4968_v12 = vld [vmem:[%s7217_s2 + $0x3c4] sm:$0xf] }
 0x9a3   :  { %5145 = vpow2.f32 %v1485_v60  ;;  %v1227_v28 = vmul.f32 0.5, %v5930_v32  ;;  %v1231_v45 = vmul.f32 0.5, %v6071_v49  ;;  %v4969_v60 = vld [vmem:[%s7217_s2 + $0x3dc] sm:$0xf0] }
 0x9a4   :  { %v1454_v13 = vmul.f32 %v1446_v30, %v6179_v29  ;;  %v1415_v50 = vadd.f32 1.4214138, %v1407_v56  ;;  %v5144_v58 = vpop.eup %5143  ;;  %v1538_v37 = vmul.f32 %v1530_v39, %v1226_v27 }
 0x9a5   :  { %v1491_v43 = vmul.f32 %v5144_v58, %v1451_v0 }
 0x9a6   :  { %v1494_v15 = vmul.f32 %v5142_v61, %v1454_v13  ;;  %v1423_v3 = vmul.f32 %v1415_v50, %v1368_v22 }
 0x9a7   :  { %v1499_v17 = vsub.f32 1.0, %v1491_v43 }
 0x9a8   :  { %v1502_v57 = vsub.f32 1.0, %v1494_v15  ;;  %v1431_v59 = vadd.f32 -0.28449672, %v1423_v3  ;;  %v4390_v3 = vld [vmem:[%s7217_s2 + $0x3c8] sm:$0xf] }
 0x9a9   :  { %v1515_v62 = vsub.f32 0.0, %v1499_v17  ;;  %v5146_v10 = vpop.eup %5145 }
 0x9aa   :  { %v1518_v7 = vsub.f32 0.0, %v1502_v57  ;;  %v1439_v9 = vmul.f32 %v1431_v59, %v1368_v22 }
 0x9ab   :  { %v1523_v24 = vsel %vm1507_vm15, %v1499_v17, %v1515_v62  ;;  %v4370_v17 = vld [vmem:[%s7217_s2 + $0x380] sm:$0xf] }
 0x9ac   :  { %v1526_v29 = vsel %vm1510_vm14, %v1502_v57, %v1518_v7  ;;  %v1447_v33 = vadd.f32 0.2548296, %v1439_v9  ;;  %v1531_v18 = vadd.f32 1.0, %v1523_v24  ;;  %v4384_v57 = vld [vmem:[%s7217_s2 + $0x3e0] sm:$0xf0] }
 0x9ad   :  { %v1534_v14 = vadd.f32 1.0, %v1526_v29  ;;  %v4970_v7 = vld [vmem:[%s7217_s2 + $0x3e4] sm:$0xf0]  ;;  %v4387_v59 = vor.u32 %v4968_v12, %v4384_v57  ;;  %v4966_v29 = vld [vmem:[%s7217_s2 + $0x39c] sm:$0xf0] }
 0x9ae   :  { %v1455_v38 = vmul.f32 %v1447_v33, %v1368_v22  ;;  %v1539_v16 = vmul.f32 %v1531_v18, %v1227_v28  ;;  %v4391_v39 = vor.u32 %v4970_v7, %v4390_v3  ;;  %v4965_v9 = vld [vmem:[%s7217_s2 + $0x384] sm:$0xf]  ;;  %v4371_v27 = vor.u32 %v4966_v29, %v4370_v17  ;;  %v4967_v33 = vld [vmem:[%s7217_s2 + $0x3a4] sm:$0xf0]  ;;  %v4358_v62 = vld [vmem:[%s7217_s2 + $0x340] sm:$0xf] }
 0x9af   :  { %v1542_v46 = vmul.f32 %v1534_v14, %v1230_v52  ;;  %2098 = vmatpush.bf16.msrb.mxu2 %v4387_v59  ;;  %v4372_v52 = vld [vmem:[%s7217_s2 + $0x3a0] sm:$0xf0]  ;;  %v4378_v14 = vld [vmem:[%s7217_s2 + $0x388] sm:$0xf]  ;;  %v4960_v28 = vld [vmem:[%s7217_s2 + $0x31c] sm:$0xf0] }
 0x9b0   :  { %v1495_v54 = vmul.f32 %v5146_v10, %v1455_v38  ;;  %2112 = vmatpush.bf16.msra.mxu3 %v4391_v39  ;;  %v4963_v38 = vld [vmem:[%s7217_s2 + $0x35c] sm:$0xf0]  ;;  %v4962_v10 = vld [vmem:[%s7217_s2 + $0x344] sm:$0xf]  ;;  %v4366_v24 = vld [vmem:[%s7217_s2 + $0x348] sm:$0xf] }
 0x9b1   :  { %v1546_v31 = vpack.c.bf16 %v1542_v46, %v1538_v37  ;;  %v4375_v37 = vor.u32 %v4965_v9, %v4372_v52  ;;  %v4379_v46 = vor.u32 %v4967_v33, %v4378_v14  ;;  %v4318_v12 = vld [vmem:[%s7217_s2 + $0x248] sm:$0xf]  ;;  %v4298_v7 = vld [vmem:[%s7217_s2 + $0x200] sm:$0xf]  ;;  %v4947_v39 = vld [vmem:[%s7217_s2 + $0x204] sm:$0xf] }
 0x9b2   :  { %v1503_v41 = vsub.f32 1.0, %v1495_v54  ;;  %v4360_v54 = vld [vmem:[%s7217_s2 + $0x360] sm:$0xf0]  ;;  %v4948_v59 = vld [vmem:[%s7217_s2 + $0x21c] sm:$0xf0] }
 0x9b3   :  { %1829 = vmatmul.bf16.vlgmr.msra.gmra.mxu2 %v1546_v31  ;;  %v4359_v31 = vor.u32 %v4963_v38, %v4358_v62  ;;  %v4300_v29 = vld [vmem:[%s7217_s2 + $0x220] sm:$0xf0]  ;;  %v4306_v9 = vld [vmem:[%s7217_s2 + $0x208] sm:$0xf]  ;;  %v4299_v52 = vor.u32 %v4948_v59, %v4298_v7 }
 0x9b4   :  { %v1519_v42 = vsub.f32 0.0, %v1503_v41  ;;  %2099 = vmatpush.bf16.msrb.mxu2 %v4375_v37  ;;  %2113 = vmatpush.bf16.msra.mxu3 %v4379_v46  ;;  %v4303_v14 = vor.u32 %v4947_v39, %v4300_v29 }
 0x9b6   :  { %v1527_v26 = vsel %vm1511_vm0, %v1503_v41, %v1519_v42  ;;  %v4964_v41 = vld [vmem:[%s7217_s2 + $0x364] sm:$0xf0]  ;;  %v4363_v42 = vor.u32 %v4962_v10, %v4360_v54 }
 0x9b7   :  { %v1535_v44 = vadd.f32 1.0, %v1527_v26  ;;  %v4367_v18 = vor.u32 %v4964_v41, %v4366_v24  ;;  %v4346_v26 = vld [vmem:[%s7217_s2 + $0x300] sm:$0xf] }
 0x9b8   :  { %2100 = vmatpush.bf16.msrb.mxu2 %v4363_v42 }
 0x9b9   :  { %v1543_v48 = vmul.f32 %v1535_v44, %v1231_v45  ;;  %2114 = vmatpush.bf16.msra.mxu3 %v4367_v18  ;;  %v4959_v45 = vld [vmem:[%s7217_s2 + $0x304] sm:$0xf]  ;;  %v4347_v44 = vor.u32 %v4960_v28, %v4346_v26 }
 0x9bb   :  { %v1547_v40 = vpack.c.bf16 %v1543_v48, %v1539_v16  ;;  %v4348_v16 = vld [vmem:[%s7217_s2 + $0x320] sm:$0xf0]  ;;  %v4354_v48 = vld [vmem:[%s7217_s2 + $0x308] sm:$0xf] }
 0x9bd   :  { %1843 = vmatmul.bf16.vlgmr.msrb.gmra.mxu3 %v1547_v40  ;;  %v4961_v40 = vld [vmem:[%s7217_s2 + $0x324] sm:$0xf0] }
 0xa1a   :  { %v1816_v21 = vpop.f32.mrf.mxu1 }
 0xa1b   :  { %v1817_v47 = vadd.f32 %v5061_v35, %v1816_v21  ;;  %v4351_v21 = vor.u32 %v4959_v45, %v4348_v16 }
 0xa1d   :  { %v1858_v55 = vpop.f32.mrf.mxu0  ;;  %2101 = vmatpush.bf16.msrb.mxu2 %v4351_v21 }
 0xa22   :  { %v1818_v25 = vpop.f32.mrf.mxu1 }
 0xa23   :  { %v1819_v4 = vadd.f32 %v5061_v35, %v1818_v25  ;;  %v4355_v35 = vor.u32 %v4961_v40, %v4354_v48  ;;  %v4336_v25 = vld [vmem:[%s7217_s2 + $0x2e0] sm:$0xf0] }
 0xa24   :  { %v5062_v48 = vld [vmem:[%s7221_s6 + $0x4] ss:$0 sm:$0xff] }
 0xa25   :  { %v1860_v2 = vpop.f32.mrf.mxu0  ;;  %2115 = vmatpush.bf16.msra.mxu3 %v4355_v35 }
 0xa36   :  { %v1830_v1 = vpop.f32.mrf.mxu2 }
 0xa37   :  { %v1831_v23 = vadd.f32 %v1830_v1, %v1817_v47  ;;  %v4334_v1 = vld [vmem:[%s7217_s2 + $0x2c0] sm:$0xf] }
 0xa38   :  { %v4957_v47 = vld [vmem:[%s7217_s2 + $0x2dc] sm:$0xf0] }
 0xa3e   :  { %v1832_v32 = vpop.f32.mrf.mxu2 }
 0xa3f   :  { %v1833_v63 = vadd.f32 %v1832_v32, %v1819_v4 }
 0xa40   :  { %v1844_v22 = vpop.f32.mrf.mxu3 }
 0xa41   :  { %v1845_v20 = vadd.f32 %v1844_v22, %v1831_v23  ;;  %v4956_v23 = vld [vmem:[%s7217_s2 + $0x2c4] sm:$0xf]  ;;  %v4342_v22 = vld [vmem:[%s7217_s2 + $0x2c8] sm:$0xf] }
 0xa42   :  { %v4339_v32 = vor.u32 %v4956_v23, %v4336_v25 }
 0xa43   :  { %v1859_v49 = vadd.f32 %v1858_v55, %v1845_v20  ;;  %v4335_v55 = vor.u32 %v4957_v47, %v4334_v1  ;;  %v4958_v20 = vld [vmem:[%s7217_s2 + $0x2e4] sm:$0xf0]  ;;  %v5063_v47 = vld [vmem:[%s7221_s6 + $0x5] ss:$0 sm:$0xff] }
 0xa44   :  { %v4343_v4 = vor.u32 %v4958_v20, %v4342_v22  ;;  %2102 = vmatpush.bf16.msrb.mxu2 %v4339_v32 }
 0xa45   :  { %v1863_v51 = vadd.f32 %v1859_v49, %v5891_v5  ;;  %v4322_v49 = vld [vmem:[%s7217_s2 + $0x280] sm:$0xf] }
 0xa46   :  { %2116 = vmatpush.bf16.msra.mxu3 %v4343_v4 }
 0xa47   :  { %1867 = vadd.xlane.f32.xlu2 %v1863_v51 }
 0xa48   :  { %v1846_v36 = vpop.f32.mrf.mxu3 }
 0xa49   :  { %v1847_v30 = vadd.f32 %v1846_v36, %v1833_v63  ;;  %v4954_v63 = vld [vmem:[%s7217_s2 + $0x29c] sm:$0xf0] }
 0xa4a   :  { %v4323_v36 = vor.u32 %v4954_v63, %v4322_v49 }
 0xa4b   :  { %v1861_v53 = vadd.f32 %v1860_v2, %v1847_v30  ;;  %v4324_v30 = vld [vmem:[%s7217_s2 + $0x2a0] sm:$0xf0]  ;;  %v4330_v2 = vld [vmem:[%s7217_s2 + $0x288] sm:$0xf] }
 0xa4d   :  { %v1864_v19 = vadd.f32 %v1861_v53, %v5893_v6  ;;  %v4382_v6 = vld [vmem:[%s7217_s2 + $0x3c0] sm:$0xf]  ;;  %v4955_v53 = vld [vmem:[%s7217_s2 + $0x2a4] sm:$0xf0] }
 0xa4e   :  { %v4383_v43 = vor.u32 %v4969_v60, %v4382_v6  ;;  %v4312_v60 = vld [vmem:[%s7217_s2 + $0x260] sm:$0xf0] }
 0xa4f   :  { %1869 = vadd.xlane.f32.xlu2 %v1864_v19 }
 0xa50   :  { %2084 = vmatpush.bf16.msrb.mxu1 %v4383_v43  ;;  %v4952_v43 = vld [vmem:[%s7217_s2 + $0x264] sm:$0xf0] }
 0xa51   :  { %v4319_v3 = vor.u32 %v4952_v43, %v4318_v12 }
 0xa54   :  { %2085 = vmatpush.bf16.msrb.mxu1 %v4371_v27  ;;  %v4949_v27 = vld [vmem:[%s7217_s2 + $0x224] sm:$0xf0] }
 0xa55   :  { %v4307_v33 = vor.u32 %v4949_v27, %v4306_v9 }
 0xa58   :  { %2086 = vmatpush.bf16.msrb.mxu1 %v4359_v31 }
 0xa5c   :  { %2087 = vmatpush.bf16.msrb.mxu1 %v4347_v44 }
 0xa60   :  { %2088 = vmatpush.bf16.msrb.mxu1 %v4335_v55 }
 0xa64   :  { %2089 = vmatpush.bf16.msrb.mxu1 %v4323_v36 }
 0xaba   :  { %v1868_v0 = vpop.xlane.xlu2 %1867 }
 0xabb   :  { %v1871_v13 = vmul.f32 %v1868_v0, %v5312_v8 }
 0xabd   :  { %v6252_v56 = vsub.f32 %v1863_v51, %v1871_v13  ;;  %v4953_v51 = vld [vmem:[%s7217_s2 + $0x284] sm:$0xf]  ;;  %v4331_v13 = vor.u32 %v4955_v53, %v4330_v2 }
 0xabe   :  { %v4327_v0 = vor.u32 %v4953_v51, %v4324_v30 }
 0xabf   :  { %v1875_v61 = vmul.f32 %v6252_v56, %v6252_v56  ;;  %2117 = vmatpush.bf16.msra.mxu3 %v4331_v13 }
 0xac0   :  { %2103 = vmatpush.bf16.msrb.mxu2 %v4327_v0 }
 0xac1   :  { %1877 = vadd.xlane.f32.xlu2 %v1875_v61  ;;  %v4310_v61 = vld [vmem:[%s7217_s2 + $0x240] sm:$0xf] }
 0xac2   :  { %v1870_v15 = vpop.xlane.xlu2 %1869 }
 0xac3   :  { %v1872_v5 = vmul.f32 %v1870_v15, %v5312_v8  ;;  %v4951_v15 = vld [vmem:[%s7217_s2 + $0x25c] sm:$0xf0]  ;;  %2118 = vmatpush.bf16.msra.mxu3 %v4319_v3 }
 0xac4   :  { %v4311_v6 = vor.u32 %v4951_v15, %v4310_v61 }
 0xac5   :  { %v6257_v50 = vsub.f32 %v1864_v19, %v1872_v5  ;;  %v4950_v5 = vld [vmem:[%s7217_s2 + $0x244] sm:$0xf] }
 0xac6   :  { %v4315_v57 = vor.u32 %v4950_v5, %v4312_v60  ;;  %2090 = vmatpush.bf16.msrb.mxu1 %v4311_v6 }
 0xac7   :  { %v1876_v58 = vmul.f32 %v6257_v50, %v6257_v50  ;;  %2119 = vmatpush.bf16.msra.mxu3 %v4307_v33 }
 0xac8   :  { %2104 = vmatpush.bf16.msrb.mxu2 %v4315_v57 }
 0xac9   :  { %1879 = vadd.xlane.f32.xlu2 %v1876_v58 }
 0xaca   :  { %2091 = vmatpush.bf16.msrb.mxu1 %v4299_v52 }
 0xacc   :  { %2105 = vmatpush.bf16.msrb.mxu2 %v4303_v14 }
 0xb34   :  { %v1878_v19 = vpop.xlane.xlu2 %1877 }
 0xb35   :  { %v1881_v58 = vmul.f32 %v1878_v19, %v5312_v8 }
 0xb37   :  { %v1883_v17 = vadd.f32 1e-12, %v1881_v58 }
 0xb39   :  { %5147 = vrsqrt.f32 %v1883_v17  ;;  %vm1891_vm2 = vweird.f32 %v1883_v17 }
 0xb3c   :  { %v1880_v37 = vpop.xlane.xlu2 %1879 }
 0xb3d   :  { %v1882_v46 = vmul.f32 %v1880_v37, %v5312_v8 }
 0xb3f   :  { %v5148_v62 = vpop.eup %5147  ;;  %v1884_v38 = vadd.f32 1e-12, %v1882_v46 }
 0xb40   :  { %v1886_v10 = vmul.f32 %v5148_v62, %v1883_v17  ;;  %vm1892_vm1 = vweird.f32 %v5148_v62 }
 0xb41   :  { %5149 = vrsqrt.f32 %v1884_v38  ;;  %vm1893_vm3 = vmor %vm1891_vm2, %vm1892_vm1  ;;  %vm1901_vm5 = vweird.f32 %v1884_v38 }
 0xb42   :  { %v1887_v31 = vmul.f32 %v5148_v62, %v1886_v10 }
 0xb44   :  { %v1888_v54 = vmul.f32 0.5, %v1887_v31 }
 0xb46   :  { %v1889_v24 = vsub.f32 1.5, %v1888_v54 }
 0xb47   :  { %v5150_v41 = vpop.eup %5149 }
 0xb48   :  { %v1890_v42 = vmul.f32 %v5148_v62, %v1889_v24  ;;  %v1896_v18 = vmul.f32 %v5150_v41, %v1884_v38  ;;  %vm1902_vm4 = vweird.f32 %v5150_v41 }
 0xb49   :  { %vm1903_vm6 = vmor %vm1901_vm5, %vm1902_vm4 }
 0xb4a   :  { %v1897_v26 = vmul.f32 %v5150_v41, %v1896_v18  ;;  %v1894_v28 = vsel %vm1893_vm3, %v5148_v62, %v1890_v42 }
 0xb4b   :  { %v1905_v16 = vmul.f32 %v1894_v28, %v6252_v56 }
 0xb4c   :  { %v1898_v45 = vmul.f32 0.5, %v1897_v26 }
 0xb4d   :  { %v1908_v1 = vmul.f32 %v5062_v48, %v1905_v16 }
 0xb4e   :  { %v1899_v44 = vsub.f32 1.5, %v1898_v45 }
 0xb4f   :  { %v6415_v55 = vadd.f32 %v5063_v47, %v1908_v1 }
 0xb50   :  { %v1900_v40 = vmul.f32 %v5150_v41, %v1899_v44 }
 0xb52   :  { %v1904_v21 = vsel %vm1903_vm6, %v5150_v41, %v1900_v40 }
 0xb53   :  { %v1906_v35 = vmul.f32 %v1904_v21, %v6257_v50  ;;  %v4295_v50 = vld [vmem:[%s7219_s4 + $0x3] sm:$0x7] }
 0xb54   :  { %v1950_v22 = vperm.slane %v4295_v50, 0  ;;  %v1951_v49 = vperm.slane %v4295_v50, 1  ;;  %v1952_v63 = vperm.slane %v4295_v50, 2 }
 0xb55   :  { %v1909_v23 = vmul.f32 %v5062_v48, %v1906_v35 }
 0xb57   :  { %v6417_v25 = vadd.f32 %v5063_v47, %v1909_v23 }
 0xb59   :  { %v1913_v56 = vpack.c.bf16 %v6417_v25, %v6415_v55 }
 0xb5b   :  { %2092 = vmatmul.bf16.vlgmr.msrb.gmra.mxu1 %v1913_v56  ;;  %2106 = vmatmul.bf16.vlgmr.msrb.gmra.mxu2 %v1913_v56 }
 0xb5c   :  { %2120 = vmatmul.bf16.vlgmr.msra.gmra.mxu3 %v1913_v56 }
 0xbd8   :  { %v2093_v20 = vpop.f32.mrf.mxu1 }
 0xbd9   :  { %v2094_v32 = vadd.f32 %v2093_v20, %v1950_v22 }
 0xbdb   :  { %v2126_v4 = vpack.c.bf16 %v2094_v32, %v2094_v32 }
 0xbdd   :  { %v2238_v51 = vunpack.c.l.b16 %v2126_v4 }
 0xbde   :  { %v2107_v36 = vpop.f32.mrf.mxu2 }
 0xbdf   :  { %v6424_v30 = vpack.c.b16 %v2238_v51, %v2238_v51  ;;  %v2108_v2 = vadd.f32 %v2107_v36, %v1951_v49  ;;  %v2121_v53 = vpop.f32.mrf.mxu3 }
 0xbe0   :  { %v2122_v19 = vadd.f32 %v2121_v53, %v1952_v63  ;;  %v2095_v0 = vpop.f32.mrf.mxu1 }
 0xbe1   :  { %v2128_v13 = vpack.c.bf16 %v2108_v2, %v2108_v2  ;;  %v2096_v61 = vadd.f32 %v2095_v0, %v1950_v22  ;;  %2240 = vrot.lane.b32.xlu0 %v6424_v30, %s5252_s26 }
 0xbe2   :  { %v2130_v15 = vpack.c.bf16 %v2122_v19, %v2122_v19 }
 0xbe3   :  { %v2136_v5 = vsel %vm315_vm7, %v2128_v13, 0  ;;  %v2243_v58 = vunpack.c.l.b16 %v2128_v13  ;;  %v2127_v6 = vpack.c.bf16 %v2096_v61, %v2096_v61 }
 0xbe4   :  { %v2198_v60 = vsel %vm382_vm8, %v2130_v15, 0  ;;  %2145 = vmatpush.bf16.xpose.msrb.mxu0 %v2136_v5  ;;  %v2320_v35 = vunpack.c.l.b16 %v2130_v15 }
 0xbe5   :  { %v6430_v12 = vpack.c.b16 %v2243_v58, %v2243_v58  ;;  %v2267_v43 = vunpack.c.l.b16 %v2127_v6  ;;  %2207 = vmatpush.bf16.msra.mxu1 %v2198_v60 }
 0xbe6   :  { %v2109_v57 = vpop.f32.mrf.mxu2  ;;  %v6458_v23 = vpack.c.b16 %v2320_v35, %v2320_v35 }
 0xbe7   :  { %v6432_v3 = vpack.c.b16 %v2267_v43, %v2267_v43  ;;  %v2110_v7 = vadd.f32 %v2109_v57, %v1951_v49  ;;  %v2123_v59 = vpop.f32.mrf.mxu3  ;;  %2245 = vrot.lane.b32.xlu2 %v6430_v12, %s5252_s26 }
 0xbe8   :  { %v2124_v39 = vadd.f32 %v2123_v59, %v1952_v63 }
 0xbe9   :  { %v2129_v17 = vpack.c.bf16 %v2110_v7, %v2110_v7  ;;  %2269 = vrot.lane.b32.xlu0 %v6432_v3, %s5252_s26 }
 0xbea   :  { %v6438_v29 = vpack.c.bf16 %v2124_v39, %v2124_v39 }
 0xbeb   :  { %v2155_v9 = vsel %vm315_vm7, %v2129_v17, 0  ;;  %v2272_v27 = vunpack.c.l.b16 %v2129_v17  ;;  %4392 = vmatmul.msk.bf16.vlgmr.msrb.gmra.mxu0 %vm315_vm7, %v2126_v4 }
 0xbec   :  { %v2217_v52 = vsel %vm382_vm8, %v6438_v29, 0  ;;  %2164 = vmatpush.bf16.xpose.msra.mxu0 %v2155_v9  ;;  %v2344_v43 = vunpack.c.l.b16 %v6438_v29 }
 0xbed   :  { %v6444_v14 = vpack.c.b16 %v2272_v27, %v2272_v27  ;;  %2226 = vmatpush.bf16.msra.mxu2 %v2217_v52  ;;  %v4414_v52 = vld [vmem:[%s7217_s2 + $0x2cc] sm:$0xf] }
 0xbee   :  { %v6475_v57 = vpack.c.b16 %v2344_v43, %v2344_v43 }
 0xbef   :  { %2274 = vrot.lane.b32.xlu1 %v6444_v14, %s5252_s26 }
 0xbfb   :  { %4393 = vmatmul.msk.bf16.vlgmr.msra.gmra.mxu0 %vm315_vm7, %v2127_v6 }
 0xc41   :  { %v2246_v33 = vpop.permute.xlu2 %2245 }
 0xc42   :  { %v2251_v37 = vsel %vm315_vm7, %v2246_v33, 0  ;;  %v4974_v33 = vld [vmem:[%s7217_s2 + $0x2e8] sm:$0xf0] }
 0xc43   :  { %2260 = vmatpush.bf16.xpose.msrb.mxu3 %v2251_v37 }
 0xc53   :  { %v2241_v46 = vpop.permute.xlu0 %2240 }
 0xc54   :  { %4400 = vmatmul.msk.bf16.vlgmr.msrb.gmra.mxu3 %vm315_vm7, %v2241_v46  ;;  %v4410_v46 = vld [vmem:[%s7217_s2 + $0x28c] sm:$0xf] }
 0xc5b   :  { %v2270_v31 = vpop.permute.xlu0 %2269 }
 0xc61   :  { %v2275_v62 = vpop.permute.xlu1 %2274 }
 0xc62   :  { %v2280_v38 = vsel %vm315_vm7, %v2275_v62, 0  ;;  %v4973_v62 = vld [vmem:[%s7217_s2 + $0x2a8] sm:$0xf0] }
 0xc63   :  { %2289 = vmatpush.bf16.xpose.msrb.mxu0 %v2280_v38  ;;  %v4411_v38 = vor.u32 %v4973_v62, %v4410_v46 }
 0xc68   :  { %v2147_v10 = vpop.f32.mrf.mxu0 }
 0xc69   :  { %v2148_v54 = vadd.f32 %v2147_v10, %v5521_v34 }
 0xc6a   :  { %4401 = vmatmul.msk.bf16.vlgmr.msrb.gmra.mxu0 %vm315_vm7, %v2270_v31 }
 0xc6b   :  { %v2170_v24 = vsel %vm354_vm9, %v2148_v54, -inf }
 0xc6c   :  { %2171 = vmax.xlane.f32.xlu2 %v2170_v24 }
 0xc70   :  { %v2149_v41 = vpop.f32.mrf.mxu0 }
 0xc78   :  { %v2166_v42 = vpop.f32.mrf.mxu0 }
 0xc79   :  { %v2167_v50 = vadd.f32 %v2166_v42, %v5531_v11 }
 0xc7b   :  { %v2173_v22 = vsel %vm354_vm9, %v2167_v50, -inf }
 0xc80   :  { %v2168_v18 = vpop.f32.mrf.mxu0 }
 0xcd7   :  { %v2262_v26 = vpop.f32.mrf.mxu3 }
 0xcd8   :  { %v2263_v28 = vadd.f32 %v2262_v26, %v5521_v34 }
 0xcda   :  { %v2295_v45 = vsel %vm354_vm9, %v2263_v28, -inf }
 0xcdb   :  { %2296 = vmax.xlane.f32.xlu0 %v2295_v45 }
 0xcdf   :  { %v2264_v44 = vpop.f32.mrf.mxu3  ;;  %v2172_v16 = vpop.xlane.xlu2 %2171 }
 0xce0   :  { %v2176_v48 = vsub.f32 %v2148_v54, %v2172_v16 }
 0xce2   :  { %v2178_v40 = vmul.f32 1.442695, %v2176_v48  ;;  %v4423_v48 = vld [vmem:[%s7217_s2 + $0x24c] sm:$0xf] }
 0xce4   :  { %5151 = vpow2.f32 %v2178_v40  ;;  %v4972_v40 = vld [vmem:[%s7217_s2 + $0x268] sm:$0xf0] }
 0xce5   :  { %v4424_v35 = vor.u32 %v4972_v40, %v4423_v48 }
 0xce7   :  { %v2291_v21 = vpop.f32.mrf.mxu0  ;;  %2422 = vmatpush.bf16.msra.mxu0 %v4424_v35 }
 0xce8   :  { %v2292_v58 = vadd.f32 %v2291_v21, %v5531_v11 }
 0xcea   :  { %v5152_v1 = vpop.eup %5151  ;;  %v2298_v60 = vsel %vm354_vm9, %v2292_v58, -inf }
 0xceb   :  { %v2182_v47 = vsel %vm354_vm9, %v5152_v1, 0.0 }
 0xcec   :  { %2183 = vadd.xlane.f32.xlu1 %v2182_v47  ;;  %v4419_v47 = vld [vmem:[%s7217_s2 + $0x20c] sm:$0xf] }
 0xcef   :  { %2322 = vrot.lane.b32.xlu0 %v6458_v23, %s5252_s26  ;;  %v2293_v56 = vpop.f32.mrf.mxu0 }
 0xcf0   :  { %v4971_v56 = vld [vmem:[%s7217_s2 + $0x228] sm:$0xf0] }
 0xd05   :  { %2430 = vrot.lane.b32.xlu1 %v6424_v30, %s5253_s1 }
 0xd19   :  { %2174 = vmax.xlane.f32.xlu0 %v2173_v22 }
 0xd4e   :  { %v2297_v20 = vpop.xlane.xlu0 %2296 }
 0xd4f   :  { %v2301_v32 = vsub.f32 %v2263_v28, %v2297_v20 }
 0xd51   :  { %v2303_v4 = vmul.f32 1.442695, %v2301_v32 }
 0xd53   :  { %5153 = vpow2.f32 %v2303_v4 }
 0xd59   :  { %v5154_v49 = vpop.eup %5153 }
 0xd5a   :  { %v2307_v63 = vsel %vm354_vm9, %v5154_v49, 0.0 }
 0xd5b   :  { %2308 = vadd.xlane.f32.xlu2 %v2307_v63 }
 0xd5f   :  { %v2184_v51 = vpop.xlane.xlu1 %2183 }
 0xd60   :  { %5155 = vrcp.f32 %v2184_v51 }
 0xd61   :  { %v2323_v36 = vpop.permute.xlu0 %2322 }
 0xd62   :  { %v2328_v2 = vsel %vm382_vm8, %v2323_v36, 0 }
 0xd63   :  { %2337 = vmatpush.bf16.msrb.mxu1 %v2328_v2 }
 0xd66   :  { %v5156_v53 = vpop.eup %5155 }
 0xd67   :  { %v2190_v19 = vmul.f32 %v5156_v53, %v5152_v1 }
 0xd69   :  { %v2192_v0 = vpack.c.bf16 %v2190_v19, %v2190_v19 }
 0xd6b   :  { %4394 = vmatmul.msk.bf16.vlgmr.msra.gmra.mxu1 %vm354_vm9, %v2192_v0 }
 0xd73   :  { %2432 = vrot.lane.b32.xlu2 %v6430_v12, %s5253_s1 }
 0xd77   :  { %v2431_v27 = vpop.permute.xlu1 %2430 }
 0xd8c   :  { %v2175_v13 = vpop.xlane.xlu0 %2174 }
 0xd8d   :  { %v2177_v61 = vsub.f32 %v2167_v50, %v2175_v13  ;;  %v4420_v50 = vor.u32 %v4971_v56, %v4419_v47 }
 0xd8f   :  { %v2180_v15 = vmul.f32 1.442695, %v2177_v61  ;;  %2423 = vmatpush.bf16.msra.mxu0 %v4420_v50 }
 0xd91   :  { %5157 = vpow2.f32 %v2180_v15 }
 0xd97   :  { %v5158_v5 = vpop.eup %5157 }
 0xd98   :  { %v2185_v6 = vsel %vm354_vm9, %v5158_v5, 0.0 }
 0xd99   :  { %2186 = vadd.xlane.f32.xlu1 %v2185_v6 }
 0xd9c   :  { %2299 = vmax.xlane.f32.xlu2 %v2298_v60 }
 0xdb2   :  { %2453 = vrot.lane.b32.xlu1 %v6432_v3, %s5253_s1 }
 0xdb4   :  { %2346 = vrot.lane.b32.xlu2 %v6475_v57, %s5252_s26 }
 0xdba   :  { %2500 = vrot.lane.b32.xlu1 %v6458_v23, %s5253_s1 }
 0xdc2   :  { %2580 = vrot.lane.b32.xlu1 %v6430_v12, %s5254_s29 }
 0xdca   :  { %2603 = vrot.lane.b32.xlu1 %v6444_v14, %s5254_s29 }
 0xdce   :  { %v2309_v7 = vpop.xlane.xlu2 %2308 }
 0xdcf   :  { %5159 = vrcp.f32 %v2309_v7 }
 0xdd2   :  { %2578 = vrot.lane.b32.xlu1 %v6424_v30, %s5254_s29 }
 0xdd5   :  { %v5160_v59 = vpop.eup %5159 }
 0xdd6   :  { %v2315_v39 = vmul.f32 %v5160_v59, %v5154_v49  ;;  %v2433_v17 = vpop.permute.xlu2 %2432 }
 0xdd7   :  { %v2438_v29 = vsel %vm315_vm7, %v2433_v17, 0 }
 0xdd8   :  { %v2317_v9 = vpack.c.bf16 %v2315_v39, %v2315_v39  ;;  %2447 = vmatpush.bf16.xpose.msra.mxu1 %v2438_v29 }
 0xdda   :  { %2601 = vrot.lane.b32.xlu1 %v6432_v3, %s5254_s29  ;;  %4402 = vmatmul.msk.bf16.vlgmr.msrb.gmra.mxu1 %vm354_vm9, %v2317_v9  ;;  %v4415_v3 = vor.u32 %v4974_v33, %v4414_v52 }
 0xddc   :  { %2393 = vmatpush.bf16.msra.mxu3 %v4415_v3 }
 0xde0   :  { %2394 = vmatpush.bf16.msra.mxu3 %v4411_v38 }
 0xde2   :  { %2521 = vrot.lane.b32.xlu1 %v6475_v57, %s5253_s1 }
 0xde8   :  { %v6495_v12 = vpop.f32.mrf.mxu1 }
 0xdea   :  { %4426 = vmatmul.msk.bf16.vlgmr.msra.gmra.mxu1 %vm315_vm7, %v2431_v27 }
 0xdf0   :  { %v2211_v30 = vpop.f32.mrf.mxu1 }
 0xe0c   :  { %v2187_v37 = vpop.xlane.xlu1 %2186 }
 0xe0d   :  { %5161 = vrcp.f32 %v2187_v37 }
 0xe0f   :  { %v2300_v10 = vpop.xlane.xlu2 %2299 }
 0xe10   :  { %v2302_v31 = vsub.f32 %v2292_v58, %v2300_v10 }
 0xe12   :  { %v2305_v54 = vmul.f32 1.442695, %v2302_v31 }
 0xe13   :  { %v5162_v24 = vpop.eup %5161 }
 0xe14   :  { %v2191_v41 = vmul.f32 %v5162_v24, %v5158_v5  ;;  %5163 = vpow2.f32 %v2305_v54 }
 0xe16   :  { %v2193_v42 = vpack.c.bf16 %v2191_v41, %v2191_v41 }
 0xe17   :  { %v2347_v18 = vpop.permute.xlu2 %2346 }
 0xe18   :  { %v2352_v26 = vsel %vm382_vm8, %v2347_v18, 0  ;;  %4395 = vmatmul.msk.bf16.vlgmr.msra.gmra.mxu2 %vm354_vm9, %v2193_v42 }
 0xe19   :  { %2361 = vmatpush.bf16.msrb.mxu2 %v2352_v26 }
 0xe1a   :  { %v5164_v28 = vpop.eup %5163 }
 0xe1b   :  { %v2310_v45 = vsel %vm354_vm9, %v5164_v28, 0.0 }
 0xe1c   :  { %2311 = vadd.xlane.f32.xlu0 %v2310_v45 }
 0xe24   :  { %v2454_v44 = vpop.permute.xlu1 %2453 }
 0xe2c   :  { %v2501_v16 = vpop.permute.xlu1 %2500 }
 0xe2d   :  { %v2506_v21 = vsel %vm382_vm8, %v2501_v16, 0 }
 0xe2e   :  { %2515 = vmatpush.bf16.msrb.mxu3 %v2506_v21 }
 0xe30   :  { %2455 = vrot.lane.b32.xlu0 %v6444_v14, %s5253_s1 }
 0xe34   :  { %v2581_v1 = vpop.permute.xlu1 %2580 }
 0xe35   :  { %v2586_v43 = vsel %vm315_vm7, %v2581_v1, 0 }
 0xe3c   :  { %v2604_v22 = vpop.permute.xlu1 %2603 }
 0xe3d   :  { %v2609_v27 = vsel %vm315_vm7, %v2604_v22, 0 }
 0xe44   :  { %v2579_v20 = vpop.permute.xlu1 %2578 }
 0xe4c   :  { %v2602_v32 = vpop.permute.xlu1 %2601 }
 0xe54   :  { %v2522_v4 = vpop.permute.xlu1 %2521 }
 0xe55   :  { %v2527_v49 = vsel %vm382_vm8, %v2522_v4, 0 }
 0xe56   :  { %2536 = vmatpush.bf16.msrb.mxu0 %v2527_v49 }
 0xe57   :  { %v2339_v63 = vpop.f32.mrf.mxu1 }
 0xe5f   :  { %v2341_v14 = vpop.f32.mrf.mxu1 }
 0xe67   :  { %v2449_v51 = vpop.f32.mrf.mxu1 }
 0xe68   :  { %v2450_v36 = vadd.f32 %v2449_v51, %v5521_v34 }
 0xe6a   :  { %v2476_v2 = vsel %vm354_vm9, %v2450_v36, -inf }
 0xe6b   :  { %2477 = vmax.xlane.f32.xlu0 %v2476_v2  ;;  %v4976_v2 = vld [vmem:[%s7217_s2 + $0x368] sm:$0xf0] }
 0xe6f   :  { %v2451_v53 = vpop.f32.mrf.mxu1 }
 0xe8f   :  { %v2312_v19 = vpop.xlane.xlu0 %2311 }
 0xe90   :  { %5165 = vrcp.f32 %v2312_v19 }
 0xe96   :  { %v5166_v0 = vpop.eup %5165 }
 0xe97   :  { %v2316_v13 = vmul.f32 %v5166_v0, %v5164_v28 }
 0xe99   :  { %v2318_v61 = vpack.c.bf16 %v2316_v13, %v2316_v13 }
 0xe9b   :  { %v2228_v15 = vpop.f32.mrf.mxu2  ;;  %4403 = vmatmul.msk.bf16.vlgmr.msrb.gmra.mxu2 %vm354_vm9, %v2318_v61 }
 0xe9c   :  { %v2236_v5 = vpack.c.bf16 %v2228_v15, %v6495_v12 }
 0xe9e   :  { %4425 = vmatmul.msk.bf16.vlgmr.msra.gmra.mxu0 %vm315_vm7, %v2236_v5 }
 0xea2   :  { %v2456_v58 = vpop.permute.xlu0 %2455 }
 0xea3   :  { %v2461_v6 = vsel %vm315_vm7, %v2456_v58, 0  ;;  %v2230_v60 = vpop.f32.mrf.mxu2 }
 0xea4   :  { %2470 = vmatpush.bf16.xpose.msra.mxu2 %v2461_v6  ;;  %v4436_v6 = vld [vmem:[%s7217_s2 + $0x30c] sm:$0xf] }
 0xea5   :  { %v4975_v60 = vld [vmem:[%s7217_s2 + $0x328] sm:$0xf0] }
 0xeab   :  { %4427 = vmatmul.msk.bf16.vlgmr.msra.gmra.mxu2 %vm315_vm7, %v2454_v44 }
 0xeac   :  { %2595 = vmatpush.bf16.xpose.msrb.mxu2 %v2586_v43  ;;  %v4437_v43 = vor.u32 %v4975_v60, %v4436_v6  ;;  %v4596_v60 = vld [vmem:[%s7217_s2 + $0x3b0] sm:$0xf0] }
 0xebb   :  { %4443 = vmatmul.msk.bf16.vlgmr.msrb.gmra.mxu2 %vm315_vm7, %v2579_v20 }
 0xede   :  { %v2478_v7 = vpop.xlane.xlu0 %2477 }
 0xedf   :  { %v2482_v59 = vsub.f32 %v2450_v36, %v2478_v7 }
 0xee1   :  { %v2484_v39 = vmul.f32 1.442695, %v2482_v59 }
 0xee3   :  { %5167 = vpow2.f32 %v2484_v39 }
 0xee9   :  { %v5168_v17 = vpop.eup %5167 }
 0xeea   :  { %v2488_v29 = vsel %vm354_vm9, %v5168_v17, 0.0 }
 0xeeb   :  { %2489 = vadd.xlane.f32.xlu2 %v2488_v29 }
 0xf1b   :  { %v2425_v7 = vpop.f32.mrf.mxu0 }
 0xf1e   :  { %v2363_v9 = vpop.f32.mrf.mxu2 }
 0xf1f   :  { %v2371_v12 = vpack.c.bf16 %v2363_v9, %v2339_v63 }
 0xf21   :  { %4416 = vmatmul.msk.bf16.vlgmr.msra.gmra.mxu3 %vm315_vm7, %v2371_v12 }
 0xf22   :  { %2618 = vmatpush.bf16.xpose.msra.mxu3 %v2609_v27 }
 0xf23   :  { %v2427_v59 = vpop.f32.mrf.mxu0 }
 0xf26   :  { %v2365_v30 = vpop.f32.mrf.mxu2 }
 0xf2e   :  { %v2472_v52 = vpop.f32.mrf.mxu2 }
 0xf2f   :  { %v2473_v33 = vadd.f32 %v2472_v52, %v5531_v11 }
 0xf31   :  { %v2479_v3 = vsel %vm354_vm9, %v2473_v33, -inf }
 0xf32   :  { %2480 = vmax.xlane.f32.xlu2 %v2479_v3 }
 0xf36   :  { %v2474_v37 = vpop.f32.mrf.mxu2 }
 0xf37   :  { %v4457_v37 = vld [vmem:[%s7217_s2 + $0x3cc] sm:$0xf] }
 0xf3e   :  { %v2597_v46 = vpop.f32.mrf.mxu2 }
 0xf3f   :  { %v2598_v62 = vadd.f32 %v2597_v46, %v5521_v34  ;;  %v4978_v46 = vld [vmem:[%s7217_s2 + $0x3e8] sm:$0xf0] }
 0xf41   :  { %v2624_v38 = vsel %vm354_vm9, %v2598_v62, -inf }
 0xf42   :  { %2625 = vmax.xlane.f32.xlu2 %v2624_v38 }
 0xf46   :  { %v2599_v10 = vpop.f32.mrf.mxu2 }
 0xf5e   :  { %v2490_v31 = vpop.xlane.xlu2 %2489 }
 0xf5f   :  { %5169 = vrcp.f32 %v2490_v31 }
 0xf65   :  { %v5170_v54 = vpop.eup %5169 }
 0xf66   :  { %v2496_v24 = vmul.f32 %v5170_v54, %v5168_v17  ;;  %v4453_v54 = vld [vmem:[%s7217_s2 + $0x38c] sm:$0xf] }
 0xf68   :  { %v2498_v41 = vpack.c.bf16 %v2496_v24, %v2496_v24  ;;  %v4977_v24 = vld [vmem:[%s7217_s2 + $0x3a8] sm:$0xf0] }
 0xf6a   :  { %4428 = vmatmul.msk.bf16.vlgmr.msrb.gmra.mxu3 %vm354_vm9, %v2498_v41  ;;  %v4454_v41 = vor.u32 %v4977_v24, %v4453_v54  ;;  %v4997_v54 = vld [vmem:[%s7217_s2 + $0x32c] sm:$0xf0]  ;;  %v4995_v24 = vld [vmem:[%s7217_s2 + $0x314] sm:$0xf] }
 0xf7a   :  { %4444 = vmatmul.msk.bf16.vlgmr.msra.gmra.mxu3 %vm315_vm7, %v2602_v32 }
 0xfa4   :  { %v2396_v21 = vpop.f32.mrf.mxu3 }
 0xfa5   :  { %v2481_v42 = vpop.xlane.xlu2 %2480  ;;  %v2426_v38 = vadd.f32 %v2425_v7, %v2396_v21  ;;  %v5006_v7 = vld [vmem:[%s7217_s2 + $0x3b4] sm:$0xf0] }
 0xfa6   :  { %v2483_v18 = vsub.f32 %v2473_v33, %v2481_v42 }
 0xfa8   :  { %v2486_v26 = vmul.f32 1.442695, %v2483_v18 }
 0xfaa   :  { %5171 = vpow2.f32 %v2486_v26 }
 0xfac   :  { %v6549_v35 = vpop.f32.mrf.mxu3 }
 0xfb0   :  { %v5172_v28 = vpop.eup %5171 }
 0xfb1   :  { %v2491_v34 = vsel %vm354_vm9, %v5172_v28, 0.0 }
 0xfb2   :  { %2492 = vadd.xlane.f32.xlu0 %v2491_v34  ;;  %v5064_v34 = vld [vmem:[%s7221_s6 + $0x8] ss:$0 sm:$0xff] }
 0xfb5   :  { %v2626_v45 = vpop.xlane.xlu2 %2625 }
 0xfb6   :  { %v2630_v44 = vsub.f32 %v2598_v62, %v2626_v45  ;;  %v4458_v62 = vor.u32 %v4978_v46, %v4457_v37 }
 0xfb8   :  { %v2632_v16 = vmul.f32 1.442695, %v2630_v44  ;;  %2716 = vmatpush.bf16.msra.mxu2 %v4458_v62  ;;  %v5000_v62 = vld [vmem:[%s7217_s2 + $0x35c] sm:$0xf] }
 0xfba   :  { %5173 = vpow2.f32 %v2632_v16 }
 0xfbc   :  { %2717 = vmatpush.bf16.msra.mxu2 %v4454_v41 }
 0xfc0   :  { %v5174_v48 = vpop.eup %5173 }
 0xfc1   :  { %v2636_v40 = vsel %vm354_vm9, %v5174_v48, 0.0 }
 0xfc2   :  { %2637 = vadd.xlane.f32.xlu1 %v2636_v40 }
 0xfed   :  { %v2517_v1 = vpop.f32.mrf.mxu3 }
 0xff5   :  { %v2519_v47 = vpop.f32.mrf.mxu3 }
 0xffd   :  { %v2620_v56 = vpop.f32.mrf.mxu3 }
 0xffe   :  { %v2621_v50 = vadd.f32 %v2620_v56, %v5531_v11  ;;  %v4440_v11 = vld [vmem:[%s7217_s2 + $0x34c] sm:$0xf] }
 0xfff   :  { %v4441_v53 = vor.u32 %v4976_v2, %v4440_v11  ;;  %v4612_v11 = vld [vmem:[%s7217_s2 + $0x3f0] sm:$0xf0]  ;;  %v4618_v2 = vld [vmem:[%s7217_s2 + $0x3d8] sm:$0xf] }
0x1000   :  { %v2627_v22 = vsel %vm354_vm9, %v2621_v50, -inf }
0x1001   :  { %2628 = vmax.xlane.f32.xlu0 %v2627_v22  ;;  %2568 = vmatpush.bf16.msrb.mxu1 %v4441_v53 }
0x1005   :  { %v2622_v20 = vpop.f32.mrf.mxu3  ;;  %2569 = vmatpush.bf16.msrb.mxu1 %v4437_v43  ;;  %v4602_v43 = vld [vmem:[%s7217_s2 + $0x398] sm:$0xf] }
0x1015   :  { %2648 = vrot.lane.b32.xlu0 %v6458_v23, %s5254_s29 }
0x1025   :  { %v2493_v32 = vpop.xlane.xlu0 %2492 }
0x1026   :  { %5175 = vrcp.f32 %v2493_v32 }
0x102c   :  { %v5176_v4 = vpop.eup %5175 }
0x102d   :  { %v2497_v49 = vmul.f32 %v5176_v4, %v5172_v28 }
0x102f   :  { %v2499_v63 = vpack.c.bf16 %v2497_v49, %v2497_v49 }
0x1031   :  { %4429 = vmatmul.msk.bf16.vlgmr.msrb.gmra.mxu0 %vm354_vm9, %v2499_v63 }
0x1035   :  { %v2638_v23 = vpop.xlane.xlu1 %2637 }
0x1074   :  { %v2629_v14 = vpop.xlane.xlu0 %2628 }
0x1075   :  { %v2631_v51 = vsub.f32 %v2621_v50, %v2629_v14  ;;  %v5009_v14 = vld [vmem:[%s7217_s2 + $0x3ec] sm:$0xf0] }
0x1077   :  { %v2634_v36 = vmul.f32 1.442695, %v2631_v51  ;;  %v5007_v51 = vld [vmem:[%s7217_s2 + $0x3d4] sm:$0xf] }
0x1078   :  { %v4615_v53 = vor.u32 %v5007_v51, %v4612_v11  ;;  %v4538_v11 = vld [vmem:[%s7217_s2 + $0x298] sm:$0xf] }
0x1079   :  { %5177 = vpow2.f32 %v2634_v36 }
0x107a   :  { %5179 = vrcp.f32 %v2638_v23  ;;  %v5010_v23 = vld [vmem:[%s7217_s2 + $0x3f4] sm:$0xf0] }
0x107f   :  { %v5178_v19 = vpop.eup %5177 }
0x1080   :  { %v2639_v0 = vsel %vm354_vm9, %v5178_v19, 0.0  ;;  %v5180_v13 = vpop.eup %5179 }
0x1081   :  { %2640 = vadd.xlane.f32.xlu2 %v2639_v0  ;;  %v2644_v61 = vmul.f32 %v5180_v13, %v5174_v48  ;;  %v2428_v48 = vadd.f32 %v2427_v59, %v6549_v35  ;;  %v5008_v0 = vld [vmem:[%s7217_s2 + $0x3dc] sm:$0xf] }
0x1082   :  { %v4620_v13 = vld [vmem:[%s7217_s2 + $0x3f8] sm:$0xf0] }
0x1083   :  { %v2646_v58 = vpack.c.bf16 %v2644_v61, %v2644_v61  ;;  %v4623_v61 = vor.u32 %v5008_v0, %v4620_v13  ;;  %v4988_v0 = vld [vmem:[%s7217_s2 + $0x29c] sm:$0xf] }
0x1084   :  { %v4540_v13 = vld [vmem:[%s7217_s2 + $0x2b8] sm:$0xf0] }
0x1085   :  { %3027 = vmatpush.bf16.msrb.mxu2 %v4623_v61 }
0x1087   :  { %v2649_v15 = vpop.permute.xlu0 %2648 }
0x1088   :  { %v2654_v5 = vsel %vm382_vm8, %v2649_v15, 0  ;;  %v4594_v15 = vld [vmem:[%s7217_s2 + $0x390] sm:$0xf] }
0x1089   :  { %2663 = vmatpush.bf16.msra.mxu0 %v2654_v5  ;;  %v5005_v5 = vld [vmem:[%s7217_s2 + $0x3ac] sm:$0xf0] }
0x108a   :  { %v4595_v6 = vor.u32 %v5005_v5, %v4594_v15  ;;  %v4543_v15 = vor.u32 %v4988_v0, %v4540_v13  ;;  %v4514_v5 = vld [vmem:[%s7217_s2 + $0x250] sm:$0xf] }
0x108c   :  { %4445 = vmatmul.msk.bf16.vlgmr.msra.gmra.mxu0 %vm354_vm9, %v2646_v58  ;;  %v5003_v58 = vld [vmem:[%s7217_s2 + $0x394] sm:$0xf] }
0x108d   :  { %2999 = vmatpush.bf16.msrb.mxu0 %v4615_v53  ;;  %v4599_v59 = vor.u32 %v5003_v58, %v4596_v60  ;;  %v4985_v58 = vld [vmem:[%s7217_s2 + $0x26c] sm:$0xf0] }
0x1091   :  { %3000 = vmatpush.bf16.msrb.mxu0 %v4599_v59  ;;  %v4522_v59 = vld [vmem:[%s7217_s2 + $0x258] sm:$0xf] }
0x1099   :  { %2669 = vrot.lane.b32.xlu2 %v6475_v57, %s5254_s29 }
0x10ae   :  { %v2538_v39 = vpop.f32.mrf.mxu0 }
0x10af   :  { %v2546_v17 = vpack.c.bf16 %v2538_v39, %v2517_v1  ;;  %v4603_v39 = vor.u32 %v5006_v7, %v4602_v43  ;;  %v4515_v43 = vor.u32 %v4985_v58, %v4514_v5  ;;  %v4516_v7 = vld [vmem:[%s7217_s2 + $0x270] sm:$0xf0] }
0x10b1   :  { %4442 = vmatmul.msk.bf16.vlgmr.msrb.gmra.mxu1 %vm315_vm7, %v2546_v17  ;;  %v5004_v17 = vld [vmem:[%s7217_s2 + $0x39c] sm:$0xf] }
0x10b6   :  { %v2540_v29 = vpop.f32.mrf.mxu0 }
0x10b7   :  { %v4604_v29 = vld [vmem:[%s7217_s2 + $0x3b8] sm:$0xf0] }
0x10f4   :  { %v2641_v9 = vpop.xlane.xlu2 %2640 }
0x10f5   :  { %5181 = vrcp.f32 %v2641_v9  ;;  %v4607_v9 = vor.u32 %v5004_v17, %v4604_v29  ;;  %v4986_v17 = vld [vmem:[%s7217_s2 + $0x274] sm:$0xf0]  ;;  %v4984_v29 = vld [vmem:[%s7217_s2 + $0x25c] sm:$0xf] }
0x10f7   :  { %3028 = vmatpush.bf16.msrb.mxu2 %v4607_v9  ;;  %v4524_v9 = vld [vmem:[%s7217_s2 + $0x278] sm:$0xf0] }
0x10fb   :  { %v5182_v12 = vpop.eup %5181 }
0x10fc   :  { %v2645_v27 = vmul.f32 %v5182_v12, %v5178_v19  ;;  %v2670_v30 = vpop.permute.xlu2 %2669  ;;  %v4619_v19 = vor.u32 %v5010_v23, %v4618_v2  ;;  %v4578_v12 = vld [vmem:[%s7217_s2 + $0x350] sm:$0xf]  ;;  %v4990_v2 = vld [vmem:[%s7217_s2 + $0x2b4] sm:$0xf0] }
0x10fd   :  { %v2675_v52 = vsel %vm382_vm8, %v2670_v30, 0  ;;  %v4999_v30 = vld [vmem:[%s7217_s2 + $0x354] sm:$0xf] }
0x10fe   :  { %v2647_v33 = vpack.c.bf16 %v2645_v27, %v2645_v27  ;;  %2684 = vmatpush.bf16.msra.mxu1 %v2675_v52  ;;  %v5001_v27 = vld [vmem:[%s7217_s2 + $0x36c] sm:$0xf0] }
0x10ff   :  { %v4579_v52 = vor.u32 %v5001_v27, %v4578_v12  ;;  %v4523_v12 = vor.u32 %v4986_v17, %v4522_v59  ;;  %v4527_v27 = vor.u32 %v4984_v29, %v4524_v9 }
0x1101   :  { %4446 = vmatmul.msk.bf16.vlgmr.msra.gmra.mxu1 %vm354_vm9, %v2647_v33  ;;  %v4580_v33 = vld [vmem:[%s7217_s2 + $0x370] sm:$0xf0] }
0x1102   :  { %3013 = vmatpush.bf16.msrb.mxu1 %v4619_v19  ;;  %v4583_v37 = vor.u32 %v4999_v30, %v4580_v33  ;;  %v4539_v19 = vor.u32 %v4990_v2, %v4538_v11  ;;  %v4498_v30 = vld [vmem:[%s7217_s2 + $0x210] sm:$0xf]  ;;  %v4979_v33 = vld [vmem:[%s7217_s2 + $0x214] sm:$0xf] }
0x1104   :  { %3001 = vmatpush.bf16.msrb.mxu0 %v4583_v37  ;;  %v4506_v37 = vld [vmem:[%s7217_s2 + $0x218] sm:$0xf] }
0x1106   :  { %3014 = vmatpush.bf16.msrb.mxu1 %v4603_v39 }
0x1109   :  { %v2665_v3 = vpop.f32.mrf.mxu0 }
0x1111   :  { %v2667_v57 = vpop.f32.mrf.mxu0 }
0x1112   :  { %v5002_v57 = vld [vmem:[%s7217_s2 + $0x374] sm:$0xf0] }
0x112e   :  { %v2571_v10 = vpop.f32.mrf.mxu1 }
0x112f   :  { %v2576_v31 = vadd.f32 %v2571_v10, %v2426_v38  ;;  %v4588_v38 = vld [vmem:[%s7217_s2 + $0x378] sm:$0xf0] }
0x1130   :  { %v4591_v10 = vor.u32 %v5000_v62, %v4588_v38 }
0x1132   :  { %3029 = vmatpush.bf16.msrb.mxu2 %v4591_v10  ;;  %v4980_v10 = vld [vmem:[%s7217_s2 + $0x21c] sm:$0xf] }
0x1136   :  { %v2573_v42 = vpop.f32.mrf.mxu1 }
0x1137   :  { %v2577_v21 = vadd.f32 %v2573_v42, %v2428_v48  ;;  %v4564_v42 = vld [vmem:[%s7217_s2 + $0x330] sm:$0xf0]  ;;  %v4546_v48 = vld [vmem:[%s7217_s2 + $0x2d0] sm:$0xf] }
0x117e   :  { %v2686_v18 = vpop.f32.mrf.mxu1 }
0x117f   :  { %v2694_v26 = vpack.c.bf16 %v2686_v18, %v2665_v3  ;;  %v4586_v3 = vld [vmem:[%s7217_s2 + $0x358] sm:$0xf] }
0x1180   :  { %v4587_v46 = vor.u32 %v5002_v57, %v4586_v3  ;;  %v4570_v18 = vld [vmem:[%s7217_s2 + $0x318] sm:$0xf]  ;;  %v4500_v57 = vld [vmem:[%s7217_s2 + $0x230] sm:$0xf0] }
0x1181   :  { %4459 = vmatmul.msk.bf16.vlgmr.msra.gmra.mxu2 %vm315_vm7, %v2694_v26  ;;  %v4998_v26 = vld [vmem:[%s7217_s2 + $0x334] sm:$0xf0]  ;;  %v4503_v62 = vor.u32 %v4979_v33, %v4500_v57 }
0x1182   :  { %3015 = vmatpush.bf16.msrb.mxu1 %v4587_v46  ;;  %v4982_v46 = vld [vmem:[%s7217_s2 + $0x234] sm:$0xf0] }
0x1183   :  { %v4507_v38 = vor.u32 %v4982_v46, %v4506_v37 }
0x1186   :  { %v2688_v28 = vpop.f32.mrf.mxu1 }
0x1187   :  { %v4567_v28 = vor.u32 %v4995_v24, %v4564_v42 }
0x1189   :  { %3002 = vmatpush.bf16.msrb.mxu0 %v4567_v28 }
0x1204   :  { %v2719_v45 = vpop.f32.mrf.mxu2 }
0x1205   :  { %v2724_v44 = vadd.f32 %v2719_v45, %v2576_v31  ;;  %v4562_v31 = vld [vmem:[%s7217_s2 + $0x310] sm:$0xf]  ;;  %v4996_v45 = vld [vmem:[%s7217_s2 + $0x31c] sm:$0xf] }
0x1206   :  { %v4563_v41 = vor.u32 %v4997_v54, %v4562_v31  ;;  %v4508_v31 = vld [vmem:[%s7217_s2 + $0x238] sm:$0xf0] }
0x1207   :  { %v2729_v16 = vadd.f32 %v5064_v34, %v2724_v44  ;;  %v4572_v44 = vld [vmem:[%s7217_s2 + $0x338] sm:$0xf0]  ;;  %v4511_v24 = vor.u32 %v4980_v10, %v4508_v31 }
0x1209   :  { %v2731_v40 = vadd.f32 %v2729_v16, %v6415_v55  ;;  %v4575_v16 = vor.u32 %v4996_v45, %v4572_v44 }
0x120b   :  { %2735 = vadd.xlane.f32.xlu0 %v2731_v40  ;;  %3030 = vmatpush.bf16.msrb.mxu2 %v4575_v16 }
0x120c   :  { %v2721_v1 = vpop.f32.mrf.mxu2 }
0x120d   :  { %v2725_v47 = vadd.f32 %v2721_v1, %v2577_v21  ;;  %v4991_v21 = vld [vmem:[%s7217_s2 + $0x2d4] sm:$0xf] }
0x120f   :  { %v2730_v56 = vadd.f32 %v5064_v34, %v2725_v47  ;;  %v4571_v34 = vor.u32 %v4998_v26, %v4570_v18  ;;  %v4548_v47 = vld [vmem:[%s7217_s2 + $0x2f0] sm:$0xf0] }
0x1211   :  { %v2732_v50 = vadd.f32 %v2730_v56, %v6417_v25  ;;  %v4610_v25 = vld [vmem:[%s7217_s2 + $0x3d0] sm:$0xf]  ;;  %3016 = vmatpush.bf16.msrb.mxu1 %v4571_v34  ;;  %v4554_v56 = vld [vmem:[%s7217_s2 + $0x2d8] sm:$0xf] }
0x1212   :  { %v4611_v36 = vor.u32 %v5009_v14, %v4610_v25  ;;  %v4989_v25 = vld [vmem:[%s7217_s2 + $0x2ac] sm:$0xf0]  ;;  %v4987_v14 = vld [vmem:[%s7217_s2 + $0x294] sm:$0xf] }
0x1213   :  { %2737 = vadd.xlane.f32.xlu2 %v2732_v50 }
0x1214   :  { %2985 = vmatpush.bf16.msrb.mxu3 %v4611_v36  ;;  %v4532_v36 = vld [vmem:[%s7217_s2 + $0x2b0] sm:$0xf0] }
0x1215   :  { %v4535_v53 = vor.u32 %v4987_v14, %v4532_v36 }
0x1218   :  { %2986 = vmatpush.bf16.msrb.mxu3 %v4595_v6  ;;  %v4983_v6 = vld [vmem:[%s7217_s2 + $0x254] sm:$0xf] }
0x1219   :  { %v4519_v39 = vor.u32 %v4983_v6, %v4516_v7 }
0x121c   :  { %2987 = vmatpush.bf16.msrb.mxu3 %v4579_v52  ;;  %v4981_v52 = vld [vmem:[%s7217_s2 + $0x22c] sm:$0xf0] }
0x121d   :  { %v4499_v3 = vor.u32 %v4981_v52, %v4498_v30 }
0x1220   :  { %2988 = vmatpush.bf16.msrb.mxu3 %v4563_v41 }
0x127e   :  { %v2736_v22 = vpop.xlane.xlu0 %2735 }
0x127f   :  { %v2739_v20 = vmul.f32 %v2736_v22, %v5312_v8  ;;  %v4551_v22 = vor.u32 %v4991_v21, %v4548_v47 }
0x1281   :  { %v6596_v32 = vsub.f32 %v2731_v40, %v2739_v20  ;;  %v4993_v40 = vld [vmem:[%s7217_s2 + $0x2ec] sm:$0xf0]  ;;  %3003 = vmatpush.bf16.msrb.mxu0 %v4551_v22 }
0x1282   :  { %v4547_v1 = vor.u32 %v4993_v40, %v4546_v48 }
0x1283   :  { %v2743_v4 = vmul.f32 %v6596_v32, %v6596_v32 }
0x1284   :  { %2989 = vmatpush.bf16.msrb.mxu3 %v4547_v1 }
0x1285   :  { %2745 = vadd.xlane.f32.xlu1 %v2743_v4  ;;  %v4992_v4 = vld [vmem:[%s7217_s2 + $0x2dc] sm:$0xf]  ;;  %3004 = vmatpush.bf16.msrb.mxu0 %v4535_v53 }
0x1286   :  { %v2738_v35 = vpop.xlane.xlu2 %2737 }
0x1287   :  { %v2740_v55 = vmul.f32 %v2738_v35, %v5312_v8  ;;  %v4556_v35 = vld [vmem:[%s7217_s2 + $0x2f8] sm:$0xf0] }
0x1289   :  { %v6601_v49 = vsub.f32 %v2732_v50, %v2740_v55  ;;  %v4994_v50 = vld [vmem:[%s7217_s2 + $0x2f4] sm:$0xf0]  ;;  %v4559_v55 = vor.u32 %v4992_v4, %v4556_v35  ;;  %3005 = vmatpush.bf16.msrb.mxu0 %v4519_v39  ;;  %v5066_v4 = vld [vmem:[%s7221_s6 + $0xa] ss:$0 sm:$0xff] }
0x128a   :  { %v4555_v20 = vor.u32 %v4994_v50, %v4554_v56  ;;  %v5065_v56 = vld [vmem:[%s7221_s6 + $0x9] ss:$0 sm:$0xff] }
0x128b   :  { %v2744_v63 = vmul.f32 %v6601_v49, %v6601_v49  ;;  %3031 = vmatpush.bf16.msrb.mxu2 %v4559_v55 }
0x128c   :  { %3017 = vmatpush.bf16.msrb.mxu1 %v4555_v20 }
0x128d   :  { %2747 = vadd.xlane.f32.xlu1 %v2744_v63  ;;  %v4530_v63 = vld [vmem:[%s7217_s2 + $0x290] sm:$0xf]  ;;  %3006 = vmatpush.bf16.msrb.mxu0 %v4503_v62 }
0x128e   :  { %v4531_v51 = vor.u32 %v4989_v25, %v4530_v63 }
0x128f   :  { %3032 = vmatpush.bf16.msrb.mxu2 %v4543_v15 }
0x1290   :  { %2990 = vmatpush.bf16.msrb.mxu3 %v4531_v51  ;;  %3018 = vmatpush.bf16.msrb.mxu1 %v4539_v19 }
0x1293   :  { %3033 = vmatpush.bf16.msrb.mxu2 %v4527_v27 }
0x1294   :  { %2991 = vmatpush.bf16.msrb.mxu3 %v4515_v43  ;;  %3019 = vmatpush.bf16.msrb.mxu1 %v4523_v12 }
0x1297   :  { %3034 = vmatpush.bf16.msrb.mxu2 %v4511_v24 }
0x1298   :  { %2992 = vmatpush.bf16.msrb.mxu3 %v4499_v3  ;;  %3020 = vmatpush.bf16.msrb.mxu1 %v4507_v38 }
0x12f8   :  { %v2746_v23 = vpop.xlane.xlu1 %2745 }
0x12f9   :  { %v2749_v61 = vmul.f32 %v2746_v23, %v5312_v8 }
0x12fb   :  { %v2751_v60 = vadd.f32 1e-12, %v2749_v61 }
0x12fd   :  { %5183 = vrsqrt.f32 %v2751_v60  ;;  %vm2759_vm8 = vweird.f32 %v2751_v60 }
0x1300   :  { %v2748_v54 = vpop.xlane.xlu1 %2747 }
0x1301   :  { %v2750_v41 = vmul.f32 %v2748_v54, %v5312_v8 }
0x1303   :  { %v5184_v42 = vpop.eup %5183  ;;  %v2752_v18 = vadd.f32 1e-12, %v2750_v41 }
0x1304   :  { %v2754_v26 = vmul.f32 %v5184_v42, %v2751_v60  ;;  %vm2760_vm7 = vweird.f32 %v5184_v42 }
0x1305   :  { %5185 = vrsqrt.f32 %v2752_v18  ;;  %vm2761_vm9 = vmor %vm2759_vm8, %vm2760_vm7  ;;  %vm2769_vm11 = vweird.f32 %v2752_v18 }
0x1306   :  { %v2755_v28 = vmul.f32 %v5184_v42, %v2754_v26 }
0x1308   :  { %v2756_v34 = vmul.f32 0.5, %v2755_v28 }
0x130a   :  { %v2757_v45 = vsub.f32 1.5, %v2756_v34 }
0x130b   :  { %v5186_v44 = vpop.eup %5185 }
0x130c   :  { %v2758_v16 = vmul.f32 %v5184_v42, %v2757_v45  ;;  %v2764_v48 = vmul.f32 %v5186_v44, %v2752_v18  ;;  %vm2770_vm10 = vweird.f32 %v5186_v44 }
0x130d   :  { %vm2771_vm12 = vmor %vm2769_vm11, %vm2770_vm10 }
0x130e   :  { %v2765_v40 = vmul.f32 %v5186_v44, %v2764_v48  ;;  %v2762_v21 = vsel %vm2761_vm9, %v5184_v42, %v2758_v16 }
0x130f   :  { %v2773_v50 = vmul.f32 %v2762_v21, %v6596_v32  ;;  %v6816_v32 = vld [vmem:[%s7220_s5 + $0x4] sm:$0xf] }
0x1310   :  { %v2766_v1 = vmul.f32 0.5, %v2765_v40  ;;  %v2818_v36 = vperm.slane %v6816_v32, 1  ;;  %v2817_v0 = vperm.slane %v6816_v32, 0  ;;  %v2820_v61 = vperm.slane %v6816_v32, 3 }
0x1311   :  { %v2776_v35 = vmul.f32 %v5065_v56, %v2773_v50 }
0x1312   :  { %v2767_v47 = vsub.f32 1.5, %v2766_v1 }
0x1313   :  { %v6807_v25 = vadd.f32 %v5066_v4, %v2776_v35 }
0x1314   :  { %v2768_v22 = vmul.f32 %v5186_v44, %v2767_v47 }
0x1316   :  { %v2772_v20 = vsel %vm2771_vm12, %v5186_v44, %v2768_v22 }
0x1317   :  { %v2774_v55 = vmul.f32 %v2772_v20, %v6601_v49  ;;  %v2819_v49 = vperm.slane %v6816_v32, 2 }
0x1319   :  { %v2777_v63 = vmul.f32 %v5065_v56, %v2774_v55 }
0x131b   :  { %v6809_v14 = vadd.f32 %v5066_v4, %v2777_v63 }
0x131d   :  { %v2781_v51 = vpack.c.bf16 %v6809_v14, %v6807_v25 }
0x131f   :  { %2993 = vmatmul.bf16.vlgmr.msrb.gmra.mxu3 %v2781_v51  ;;  %3007 = vmatmul.bf16.vlgmr.msrb.gmra.mxu0 %v2781_v51 }
0x1320   :  { %3021 = vmatmul.bf16.vlgmr.msrb.gmra.mxu1 %v2781_v51  ;;  %3035 = vmatmul.bf16.vlgmr.msrb.gmra.mxu2 %v2781_v51 }
0x139c   :  { %v3008_v11 = vpop.f32.mrf.mxu0 }
0x139d   :  { %v6820_v2 = vadd.f32 %v3008_v11, %v2818_v36  ;;  %v3022_v23 = vpop.f32.mrf.mxu1 }
0x139e   :  { %v6822_v53 = vadd.f32 %v3022_v23, %v2819_v49 }
0x139f   :  { %v6825_v19 = vmul.f32 0.70710677, %v6820_v2  ;;  %v6998_v32 = vmul.f32 0.5, %v6820_v2 }
0x13a0   :  { %v6829_v13 = vmul.f32 0.70710677, %v6822_v53 }
0x13a1   :  { %v6833_v15 = vand.u32 2147483647, %v6825_v19 }
0x13a2   :  { %v6836_v5 = vand.u32 2147483647, %v6829_v13  ;;  %v2994_v58 = vpop.f32.mrf.mxu3 }
0x13a3   :  { %v3066_v6 = vmul.f32 0.3275911, %v6833_v15  ;;  %v6841_v60 = vadd.f32 %v2994_v58, %v2817_v0  ;;  %v3036_v43 = vpop.f32.mrf.mxu2 }
0x13a4   :  { %v3067_v7 = vmul.f32 0.3275911, %v6836_v5  ;;  %v6846_v59 = vadd.f32 %v3036_v43, %v2820_v61  ;;  %v3010_v46 = vpop.f32.mrf.mxu0 }
0x13a5   :  { %v3074_v39 = vadd.f32 1.0, %v3066_v6  ;;  %v6849_v29 = vmul.f32 0.70710677, %v6841_v60  ;;  %v3024_v10 = vpop.f32.mrf.mxu1  ;;  %v6868_v42 = vadd.f32 %v3010_v46, %v2818_v36 }
0x13a6   :  { %v3075_v17 = vadd.f32 1.0, %v3067_v7  ;;  %v6852_v9 = vmul.f32 0.70710677, %v6846_v59  ;;  %v6870_v28 = vadd.f32 %v3024_v10, %v2819_v49 }
0x13a7   :  { %5187 = vrcp.f32 %v3074_v39  ;;  %v6855_v12 = vand.u32 2147483647, %v6849_v29  ;;  %v3105_v54 = vand.u32 2147483647, %v3074_v39  ;;  %v3107_v24 = vand.u32 2147483648, %v3074_v39 }
0x13a8   :  { %5189 = vrcp.f32 %v3075_v17  ;;  %v6858_v27 = vand.u32 2147483647, %v6852_v9  ;;  %v3122_v26 = vand.u32 2147483648, %v3075_v17  ;;  %v3120_v45 = vand.u32 2147483647, %v3075_v17 }
0x13a9   :  { %v3065_v30 = vmul.f32 0.3275911, %v6855_v12  ;;  %vm3101_vm15 = vweird.f32 %v3074_v39  ;;  %v3108_v16 = vor.u32 1.1754944e-38, %v3107_v24  ;;  %vm3116_vm1 = vweird.f32 %v3075_v17 }
0x13aa   :  { %v3068_v33 = vmul.f32 0.3275911, %v6858_v27  ;;  %v6873_v40 = vmul.f32 0.70710677, %v6868_v42  ;;  %vm3106_vm2 = vcmp.eq.f32.partialorder %v3105_v54, 8.507059e+37  ;;  %v3123_v47 = vor.u32 1.1754944e-38, %v3122_v26 }
0x13ab   :  { %v6862_v37 = vadd.f32 1.0, %v3065_v30  ;;  %v6876_v56 = vmul.f32 0.70710677, %v6870_v28  ;;  %vm3121_vm4 = vcmp.eq.f32.partialorder %v3120_v45, 8.507059e+37  ;;  %v3275_v54 = vsub.f32 0.0, %v6836_v5 }
0x13ac   :  { %v6864_v38 = vadd.f32 1.0, %v3068_v33  ;;  %v6890_v49 = vand.u32 2147483647, %v6873_v40 }
0x13ad   :  { %v5188_v52 = vpop.eup %5187  ;;  %5191 = vrcp.f32 %v6862_v37  ;;  %v6893_v58 = vand.u32 2147483647, %v6876_v56  ;;  %v3090_v33 = vand.u32 2147483647, %v6862_v37  ;;  %vm3086_vm6 = vweird.f32 %v6862_v37 }
0x13ae   :  { %v5190_v3 = vpop.eup %5189  ;;  %v3097_v57 = vmul.f32 %v5188_v52, %v3074_v39  ;;  %5193 = vrcp.f32 %v6864_v38  ;;  %vm3102_vm13 = vweird.f32 %v5188_v52  ;;  %v3070_v7 = vmul.f32 0.3275911, %v6890_v49 }
0x13af   :  { %v3112_v62 = vmul.f32 %v5190_v3, %v3075_v17  ;;  %vm3117_vm14 = vweird.f32 %v5190_v3  ;;  %vm3103_vm0 = vmor %vm3101_vm15, %vm3102_vm13  ;;  %v3274_v17 = vsub.f32 0.0, %v6833_v15  ;;  %v3071_v30 = vmul.f32 0.3275911, %v6893_v58 }
0x13b0   :  { %v3098_v31 = vsub.f32 1.0, %v3097_v57  ;;  %vm3118_vm3 = vmor %vm3116_vm1, %vm3117_vm14  ;;  %v6901_v57 = vadd.f32 1.0, %v3070_v7  ;;  %vm3091_vm8 = vcmp.eq.f32.partialorder %v3090_v33, 8.507059e+37  ;;  %v3283_v45 = vmul.f32 %v3275_v54, %v6836_v5 }
0x13b1   :  { %v3113_v41 = vsub.f32 1.0, %v3112_v62  ;;  %v6906_v10 = vadd.f32 1.0, %v3071_v30  ;;  %v3282_v24 = vmul.f32 %v3274_v17, %v6833_v15  ;;  %vm3131_vm10 = vweird.f32 %v6864_v38 }
0x13b2   :  { %v3099_v18 = vmul.f32 %v5188_v52, %v3098_v31  ;;  %5195 = vrcp.f32 %v6901_v57  ;;  %v3135_v15 = vand.u32 2147483647, %v6864_v38  ;;  %vm3161_vm14 = vweird.f32 %v6901_v57 }
0x13b3   :  { %v3114_v34 = vmul.f32 %v5190_v3, %v3113_v41  ;;  %v5192_v21 = vpop.eup %5191  ;;  %5197 = vrcp.f32 %v6906_v10 }
0x13b4   :  { %v3100_v44 = vadd.f32 %v5188_v52, %v3099_v18  ;;  %v6878_v50 = vpop.eup %5193  ;;  %v3082_v4 = vmul.f32 %v5192_v21, %v6862_v37  ;;  %vm3087_vm5 = vweird.f32 %v5192_v21  ;;  %vm3136_vm12 = vcmp.eq.f32.partialorder %v3135_v15, 8.507059e+37 }
0x13b5   :  { %v3115_v48 = vadd.f32 %v5190_v3, %v3114_v34  ;;  %v3127_v63 = vmul.f32 %v6878_v50, %v6864_v38  ;;  %vm3088_vm7 = vmor %vm3086_vm6, %vm3087_vm5  ;;  %vm3132_vm9 = vweird.f32 %v6878_v50  ;;  %vm3322_vm5 = vcmp.ge.f32.partialorder %v6825_v19, 0.0 }
0x13b6   :  { %v3104_v1 = vsel %vm3103_vm0, %v5188_v52, %v3100_v44  ;;  %v3083_v36 = vsub.f32 1.0, %v3082_v4  ;;  %vm3133_vm11 = vmor %vm3131_vm10, %vm3132_vm9  ;;  %vm3323_vm6 = vcmp.ge.f32.partialorder %v6829_v13, 0.0  ;;  %v5037_v13 = vld [vmem:[%s7218_s3 + $0x1d0] sm:$0xff] }
0x13b7   :  { %v6880_v22 = vsel %vm3106_vm2, %v3108_v16, %v3104_v1  ;;  %v3119_v20 = vsel %vm3118_vm3, %v5190_v3, %v3115_v48  ;;  %v3128_v23 = vsub.f32 1.0, %v3127_v63  ;;  %v3092_v3 = vand.u32 2147483648, %v6862_v37 }
0x13b8   :  { %v3202_v35 = vmul.f32 1.0614054, %v6880_v22  ;;  %v6884_v55 = vsel %vm3121_vm4, %v3123_v47, %v3119_v20  ;;  %v3084_v43 = vmul.f32 %v5192_v21, %v3083_v36  ;;  %v3137_v16 = vand.u32 2147483648, %v6864_v38  ;;  %v5196_v1 = vpop.eup %5195 }
0x13b9   :  { %v3203_v51 = vmul.f32 1.0614054, %v6884_v55  ;;  %v3129_v62 = vmul.f32 %v6878_v50, %v3128_v23  ;;  %v3093_v18 = vor.u32 1.1754944e-38, %v3092_v3  ;;  %v3291_v48 = vmul.f32 1.442695, %v3282_v24 }
0x13ba   :  { %v3210_v11 = vadd.f32 -1.4531521, %v3202_v35  ;;  %v3085_v52 = vadd.f32 %v5192_v21, %v3084_v43  ;;  %v3157_v5 = vmul.f32 %v5196_v1, %v6901_v57  ;;  %v3293_v63 = vmul.f32 1.442695, %v3283_v45 }
0x13bb   :  { %v3211_v6 = vadd.f32 -1.4531521, %v3203_v51  ;;  %v3130_v34 = vadd.f32 %v6878_v50, %v3129_v62  ;;  %v3138_v51 = vor.u32 1.1754944e-38, %v3137_v16  ;;  %5199 = vpow2.f32 %v3291_v48 }
0x13bc   :  { %v3218_v39 = vmul.f32 %v3210_v11, %v6880_v22  ;;  %v3089_v41 = vsel %vm3088_vm7, %v5192_v21, %v3085_v52  ;;  %v2996_v21 = vpop.f32.mrf.mxu3  ;;  %v5198_v11 = vpop.eup %5197  ;;  %v3158_v38 = vsub.f32 1.0, %v3157_v5  ;;  %v3167_v23 = vand.u32 2147483648, %v6901_v57 }
0x13bd   :  { %v3219_v46 = vmul.f32 %v3211_v6, %v6884_v55  ;;  %v6916_v44 = vsel %vm3091_vm8, %v3093_v18, %v3089_v41  ;;  %v3134_v4 = vsel %vm3133_vm11, %v6878_v50, %v3130_v34  ;;  %v6927_v36 = vadd.f32 %v2996_v21, %v2817_v0  ;;  %v5034_v18 = vld [vmem:[%s7218_s3 + $0x1b8] sm:$0xff] }
0x13be   :  { %v3226_v31 = vadd.f32 1.4214138, %v3218_v39  ;;  %v3201_v20 = vmul.f32 1.0614054, %v6916_v44  ;;  %v6930_v6 = vsel %vm3136_vm12, %v3138_v51, %v3134_v4  ;;  %v3165_v43 = vand.u32 2147483647, %v6901_v57  ;;  %3652 = vmatpush.bf16.msra.mxu1 %v5034_v18 }
0x13bf   :  { %v3227_v26 = vadd.f32 1.4214138, %v3219_v46  ;;  %v3278_v50 = vsub.f32 0.0, %v6890_v49  ;;  %v3172_v7 = vmul.f32 %v5198_v11, %v6906_v10  ;;  %v3159_v30 = vmul.f32 %v5196_v1, %v3158_v38  ;;  %v5026_v57 = vld [vmem:[%s7218_s3 + $0x178] sm:$0xff] }
0x13c0   :  { %v3234_v37 = vmul.f32 %v3226_v31, %v6880_v22  ;;  %v3209_v17 = vadd.f32 -1.4531521, %v3201_v20  ;;  %vm3162_vm13 = vweird.f32 %v5196_v1  ;;  %v6938_v33 = vmul.f32 0.70710677, %v6927_v36  ;;  %3638 = vmatpush.bf16.msra.mxu0 %v5026_v57 }
0x13c1   :  { %v3235_v47 = vmul.f32 %v3227_v26, %v6884_v55  ;;  %v3173_v52 = vsub.f32 1.0, %v3172_v7  ;;  %v3204_v3 = vmul.f32 1.0614054, %v6930_v6  ;;  %v3160_v46 = vadd.f32 %v5196_v1, %v3159_v30  ;;  %vm3163_vm15 = vmor %vm3161_vm14, %vm3162_vm13  ;;  %v5200_v26 = vpop.eup %5199  ;;  %v3038_v7 = vpop.f32.mrf.mxu2  ;;  %v5018_v30 = vld [vmem:[%s7218_s3 + $0x138] sm:$0xff] }
0x13c2   :  { %v3242_v35 = vadd.f32 -0.28449672, %v3234_v37  ;;  %v3168_v62 = vor.u32 1.1754944e-38, %v3167_v23  ;;  %v3182_v31 = vand.u32 2147483648, %v6906_v10  ;;  %vm3177_vm0 = vweird.f32 %v5198_v11  ;;  %3624 = vmatpush.bf16.msra.mxu3 %v5018_v30 }
0x13c3   :  { %v3243_v39 = vadd.f32 -0.28449672, %v3235_v47  ;;  %v3174_v54 = vmul.f32 %v5198_v11, %v3173_v52  ;;  %v3180_v24 = vand.u32 2147483647, %v6906_v10  ;;  %v6944_v41 = vand.u32 2147483647, %v6938_v33 }
0x13c4   :  { %v3250_v0 = vmul.f32 %v3242_v35, %v6880_v22  ;;  %v3217_v37 = vmul.f32 %v3209_v17, %v6916_v44  ;;  %v3164_v45 = vsel %vm3163_vm15, %v5196_v1, %v3160_v46  ;;  %vm3166_vm1 = vcmp.eq.f32.partialorder %v3165_v43, 8.507059e+37  ;;  %v5033_v35 = vld [vmem:[%s7218_s3 + $0x1b0] sm:$0xff] }
0x13c5   :  { %v3251_v34 = vmul.f32 %v3243_v39, %v6884_v55  ;;  %v6954_v48 = vsel %vm3166_vm1, %v3168_v62, %v3164_v45  ;;  %v3175_v15 = vadd.f32 %v5198_v11, %v3174_v54  ;;  %vm3176_vm2 = vweird.f32 %v6906_v10  ;;  %v5025_v10 = vld [vmem:[%s7218_s3 + $0x170] sm:$0xff]  ;;  %3653 = vmatpush.bf16.msra.mxu1 %v5033_v35 }
0x13c6   :  { %v3258_v16 = vadd.f32 0.2548296, %v3250_v0  ;;  %v3273_v21 = vsub.f32 0.0, %v6855_v12  ;;  %v3206_v47 = vmul.f32 1.0614054, %v6954_v48  ;;  %vm3178_vm3 = vmor %vm3176_vm2, %vm3177_vm0  ;;  %v3183_v20 = vor.u32 1.1754944e-38, %v3182_v31  ;;  %3639 = vmatpush.bf16.msra.mxu0 %v5025_v10 }
0x13c7   :  { %v3069_v4 = vmul.f32 0.3275911, %v6944_v41  ;;  %5201 = vpow2.f32 %v3293_v63  ;;  %v3179_v1 = vsel %vm3178_vm3, %v5198_v11, %v3175_v15  ;;  %vm3181_vm4 = vcmp.eq.f32.partialorder %v3180_v24, 8.507059e+37  ;;  %v5042_v0 = vld [vmem:[%s7218_s3 + $0x1f8] sm:$0xff]  ;;  %v5024_v31 = vld [vmem:[%s7218_s3 + $0x168] sm:$0xff] }
0x13c8   :  { %v3279_v5 = vsub.f32 0.0, %v6893_v58  ;;  %v3259_v51 = vadd.f32 0.2548296, %v3251_v34  ;;  %v3225_v38 = vadd.f32 1.4214138, %v3217_v37  ;;  %v6968_v43 = vsel %vm3181_vm4, %v3183_v20, %v3179_v1  ;;  %3666 = vmatpush.bf16.msra.mxu2 %v5042_v0  ;;  %v5017_v34 = vld [vmem:[%s7218_s3 + $0x130] sm:$0xff] }
0x13c9   :  { %v3214_v23 = vadd.f32 -1.4531521, %v3206_v47  ;;  %v3266_v63 = vmul.f32 %v3258_v16, %v6880_v22  ;;  %v3286_v11 = vmul.f32 %v3278_v50, %v6890_v49  ;;  %v3207_v39 = vmul.f32 1.0614054, %v6968_v43  ;;  %3625 = vmatpush.bf16.msra.mxu3 %v5017_v34  ;;  %v5031_v1 = vld [vmem:[%s7218_s3 + $0x1a0] sm:$0xff] }
0x13ca   :  { %v6973_v17 = vadd.f32 1.0, %v3069_v4  ;;  %v3281_v52 = vmul.f32 %v3273_v21, %v6855_v12  ;;  %v3212_v46 = vadd.f32 -1.4531521, %v3204_v3  ;;  %v3287_v50 = vmul.f32 %v3279_v5, %v6893_v58  ;;  %v5032_v12 = vld [vmem:[%s7218_s3 + $0x1a8] sm:$0xff]  ;;  %3640 = vmatpush.bf16.msra.mxu0 %v5024_v31  ;;  %v5030_v31 = vld [vmem:[%s7218_s3 + $0x198] sm:$0xff] }
0x13cb   :  { %v3222_v22 = vmul.f32 %v3214_v23, %v6954_v48  ;;  %v3215_v49 = vadd.f32 -1.4531521, %v3207_v39  ;;  %v6987_v62 = vadd.f32 %v3038_v7, %v2820_v61  ;;  %v3267_v3 = vmul.f32 %v3259_v51, %v6884_v55  ;;  %3654 = vmatpush.bf16.msra.mxu1 %v5032_v12  ;;  %v5041_v55 = vld [vmem:[%s7218_s3 + $0x1f0] sm:$0xff]  ;;  %v5040_v23 = vld [vmem:[%s7218_s3 + $0x1e8] sm:$0xff] }
0x13cc   :  { %5203 = vrcp.f32 %v6973_v17  ;;  %v3233_v58 = vmul.f32 %v3225_v38, %v6916_v44  ;;  %v7000_v61 = vmul.f32 %v5200_v26, %v3266_v63  ;;  %v3299_v57 = vmul.f32 1.442695, %v3286_v11  ;;  %3667 = vmatpush.bf16.msra.mxu2 %v5041_v55  ;;  %v5016_v38 = vld [vmem:[%s7218_s3 + $0x128] sm:$0xff] }
0x13cd   :  { %v3230_v54 = vadd.f32 1.4214138, %v3222_v22  ;;  %v5202_v24 = vpop.eup %5201  ;;  %v3223_v18 = vmul.f32 %v3215_v49, %v6968_v43  ;;  %v7010_v37 = vmul.f32 0.5, %v6822_v53  ;;  %v3289_v2 = vmul.f32 1.442695, %v3281_v52  ;;  %v5023_v53 = vld [vmem:[%s7218_s3 + $0x160] sm:$0xff]  ;;  %3626 = vmatpush.bf16.msra.mxu3 %v5016_v38 }
0x13ce   :  { %v3220_v26 = vmul.f32 %v3212_v46, %v6930_v6  ;;  %v3301_v15 = vmul.f32 1.442695, %v3287_v50  ;;  %v7015_v21 = vmul.f32 0.70710677, %v6987_v62  ;;  %v7018_v47 = vmul.f32 %v5202_v24, %v3267_v3  ;;  %3641 = vmatpush.bf16.msra.mxu0 %v5023_v53  ;;  %v5022_v52 = vld [vmem:[%s7218_s3 + $0x158] sm:$0xff]  ;;  %v5015_v24 = vld [vmem:[%s7218_s3 + $0x120] sm:$0xff] }
0x13cf   :  { %v3238_v45 = vmul.f32 %v3230_v54, %v6954_v48  ;;  %v3231_v16 = vadd.f32 1.4214138, %v3223_v18  ;;  %v3241_v20 = vadd.f32 -0.28449672, %v3233_v58  ;;  %v3314_v10 = vsub.f32 1.0, %v7000_v61  ;;  %3655 = vmatpush.bf16.msra.mxu1 %v5031_v1  ;;  %v5039_v61 = vld [vmem:[%s7218_s3 + $0x1e0] sm:$0xff] }
0x13d0   :  { %5205 = vpow2.f32 %v3299_v57  ;;  %v7031_v51 = vand.u32 2147483647, %v7015_v21  ;;  %v3228_v7 = vadd.f32 1.4214138, %v3220_v26  ;;  %v3276_v39 = vsub.f32 0.0, %v6858_v27  ;;  %3668 = vmatpush.bf16.msra.mxu2 %v5040_v23  ;;  %v5014_v23 = vld [vmem:[%s7218_s3 + $0x118] sm:$0xff] }
0x13d1   :  { %v3246_v4 = vadd.f32 -0.28449672, %v3238_v45  ;;  %v3239_v35 = vmul.f32 %v3231_v16, %v6968_v43  ;;  %5207 = vpow2.f32 %v3289_v2  ;;  %v3315_v46 = vsub.f32 1.0, %v7018_v47  ;;  %3627 = vmatpush.bf16.msra.mxu3 %v5015_v24  ;;  %v5029_v16 = vld [vmem:[%s7218_s3 + $0x190] sm:$0xff] }
0x13d2   :  { %v7026_v5 = vpop.eup %5203  ;;  %5209 = vpow2.f32 %v3301_v15  ;;  %v3072_v0 = vmul.f32 0.3275911, %v7031_v51  ;;  %v3249_v22 = vmul.f32 %v3241_v20, %v6916_v44  ;;  %v3330_v12 = vsub.f32 0.0, %v3314_v10  ;;  %3642 = vmatpush.bf16.msra.mxu0 %v5022_v52 }
0x13d3   :  { %v3254_v63 = vmul.f32 %v3246_v4, %v6954_v48  ;;  %v3142_v11 = vmul.f32 %v7026_v5, %v6973_v17  ;;  %v3247_v30 = vadd.f32 -0.28449672, %v3239_v35  ;;  %v3152_v58 = vand.u32 2147483648, %v6973_v17  ;;  %3656 = vmatpush.bf16.msra.mxu1 %v5030_v31 }
0x13d4   :  { %v7055_v54 = vadd.f32 1.0, %v3072_v0  ;;  %vm3147_vm7 = vweird.f32 %v7026_v5  ;;  %v3150_v34 = vand.u32 2147483647, %v6973_v17  ;;  %v3236_v2 = vmul.f32 %v3228_v7, %v6930_v6  ;;  %3669 = vmatpush.bf16.msra.mxu2 %v5039_v61 }
0x13d5   :  { %v3262_v49 = vadd.f32 0.2548296, %v3254_v63  ;;  %v3143_v50 = vsub.f32 1.0, %v3142_v11  ;;  %v3255_v3 = vmul.f32 %v3247_v30, %v6968_v43  ;;  %v7069_v26 = vmul.f32 %v3276_v39, %v6858_v27  ;;  %3628 = vmatpush.bf16.msra.mxu3 %v5014_v23  ;;  %v5020_v39 = vld [vmem:[%s7218_s3 + $0x148] sm:$0xff] }
0x13d6   :  { %v5206_v55 = vpop.eup %5205  ;;  %5211 = vrcp.f32 %v7055_v54  ;;  %v3331_v47 = vsub.f32 0.0, %v3315_v46  ;;  %vm3146_vm8 = vweird.f32 %v6973_v17  ;;  %v3338_v53 = vsel %vm3322_vm5, %v3314_v10, %v3330_v12  ;;  %v5038_v17 = vld [vmem:[%s7218_s3 + $0x1d8] sm:$0xff]  ;;  %v5028_v30 = vld [vmem:[%s7218_s3 + $0x188] sm:$0xff]  ;;  %v5013_v12 = vld [vmem:[%s7218_s3 + $0x110] sm:$0xff] }
0x13d7   :  { %v3270_v57 = vmul.f32 %v3262_v49, %v6954_v48  ;;  %v3144_v18 = vmul.f32 %v7026_v5, %v3143_v50  ;;  %v3263_v45 = vadd.f32 0.2548296, %v3255_v3  ;;  %v5021_v48 = vld [vmem:[%s7218_s3 + $0x150] sm:$0xff]  ;;  %v7078_v15 = vpop.eup %5207  ;;  %v3046_v1 = vmul.f32 0.5, %v6868_v42  ;;  %vm3148_vm9 = vmor %vm3146_vm8, %vm3147_vm7  ;;  %3657 = vmatpush.bf16.msra.mxu1 %v5029_v16 }
0x13d8   :  { %v5210_v4 = vpop.eup %5209  ;;  %v3153_v38 = vor.u32 1.1754944e-38, %v3152_v58  ;;  %v3257_v7 = vadd.f32 0.2548296, %v3249_v22  ;;  %vm3151_vm10 = vcmp.eq.f32.partialorder %v3150_v34, 8.507059e+37  ;;  %3643 = vmatpush.bf16.msra.mxu0 %v5021_v48  ;;  %v3244_v42 = vadd.f32 -0.28449672, %v3236_v2  ;;  %3670 = vmatpush.bf16.msra.mxu2 %v5038_v17 }
0x13d9   :  { %v3310_v20 = vmul.f32 %v5206_v55, %v3270_v57  ;;  %v3145_v27 = vadd.f32 %v7026_v5, %v3144_v18  ;;  %v3271_v35 = vmul.f32 %v3263_v45, %v6968_v43  ;;  %v3277_v11 = vsub.f32 0.0, %v6944_v41  ;;  %3629 = vmatpush.bf16.msra.mxu3 %v5013_v12  ;;  %v5019_v18 = vld [vmem:[%s7218_s3 + $0x140] sm:$0xff] }
0x13da   :  { %v3339_v0 = vsel %vm3323_vm6, %v3315_v46, %v3331_v47  ;;  %vm3326_vm11 = vcmp.ge.f32.partialorder %v6873_v40, 0.0  ;;  %v3047_v50 = vmul.f32 0.5, %v6870_v28  ;;  %vm3327_vm12 = vcmp.ge.f32.partialorder %v6876_v56, 0.0 }
0x13db   :  { %v3318_v63 = vsub.f32 1.0, %v3310_v20  ;;  %v3149_v19 = vsel %vm3148_vm9, %v7026_v5, %v3145_v27  ;;  %v3311_v43 = vmul.f32 %v5210_v4, %v3271_v35  ;;  %v3346_v5 = vadd.f32 1.0, %v3338_v53  ;;  %3658 = vmatpush.bf16.msra.mxu1 %v5028_v30  ;;  %v5012_v20 = vld [vmem:[%s7218_s3 + $0x108] sm:$0xff] }
0x13dc   :  { %v7095_v10 = vsel %vm3151_vm10, %v3153_v38, %v3149_v19  ;;  %v5212_v49 = vpop.eup %5211  ;;  %v3265_v46 = vmul.f32 %v3257_v7, %v6916_v44  ;;  %3644 = vmatpush.bf16.msra.mxu0 %v5020_v39  ;;  %v3347_v28 = vadd.f32 1.0, %v3339_v0  ;;  %v3285_v57 = vmul.f32 %v3277_v11, %v6944_v41  ;;  %3671 = vmatpush.bf16.msra.mxu2 %v5037_v13  ;;  %v5027_v44 = vld [vmem:[%s7218_s3 + $0x180] sm:$0xff] }
0x13dd   :  { %v3334_v52 = vsub.f32 0.0, %v3318_v63  ;;  %v3205_v22 = vmul.f32 1.0614054, %v7095_v10  ;;  %v3319_v31 = vsub.f32 1.0, %v3311_v43  ;;  %v3187_v24 = vmul.f32 %v5212_v49, %v7055_v54  ;;  %3630 = vmatpush.bf16.msra.mxu3 %v5012_v20 }
0x13de   :  { %v3354_v34 = vmul.f32 %v3346_v5, %v6998_v32  ;;  %v3252_v55 = vmul.f32 %v3244_v42, %v6930_v6  ;;  %v3195_v16 = vand.u32 2147483647, %v7055_v54  ;;  %v3197_v47 = vand.u32 2147483648, %v7055_v54  ;;  %v5036_v32 = vld [vmem:[%s7218_s3 + $0x1c8] sm:$0xff] }
0x13df   :  { %v3342_v3 = vsel %vm3326_vm11, %v3318_v63, %v3334_v52  ;;  %v3213_v58 = vadd.f32 -1.4531521, %v3205_v22  ;;  %v3335_v61 = vsub.f32 0.0, %v3319_v31  ;;  %v3188_v45 = vsub.f32 1.0, %v3187_v24  ;;  %3659 = vmatpush.bf16.msra.mxu1 %v5027_v44 }
0x13e0   :  { %v3350_v40 = vadd.f32 1.0, %v3342_v3  ;;  %vm3192_vm13 = vweird.f32 %v5212_v49  ;;  %3645 = vmatpush.bf16.msra.mxu0 %v5019_v18  ;;  %v3355_v56 = vmul.f32 %v3347_v28, %v7010_v37  ;;  %v3297_v38 = vmul.f32 1.442695, %v3285_v57  ;;  %3672 = vmatpush.bf16.msra.mxu2 %v5036_v32  ;;  %v5011_v37 = vld [vmem:[%s7218_s3 + $0x100] sm:$0xff] }
0x13e1   :  { %v3221_v2 = vmul.f32 %v3213_v58, %v7095_v10  ;;  %v3343_v41 = vsel %vm3327_vm12, %v3319_v31, %v3335_v61  ;;  %v3189_v53 = vmul.f32 %v5212_v49, %v3188_v45  ;;  %vm3191_vm14 = vweird.f32 %v7055_v54  ;;  %3631 = vmatpush.bf16.msra.mxu3 %v5011_v37 }
0x13e2   :  { %v3358_v48 = vmul.f32 %v3350_v40, %v3046_v1  ;;  %v3351_v27 = vadd.f32 1.0, %v3343_v41  ;;  %v3305_v1 = vmul.f32 %v7078_v15, %v3265_v46  ;;  %v3295_v63 = vmul.f32 1.442695, %v7069_v26  ;;  %vm3193_vm15 = vmor %vm3191_vm14, %vm3192_vm13  ;;  %v5035_v15 = vld [vmem:[%s7218_s3 + $0x1c0] sm:$0xff]  ;;  %s3848_s3 = sshll.u32 %s5255_s12, 4  ;;  %s3849_s3 = int_to_ptr.vmem [resolvable:$true] %s3848_s3 }
0x13e3   :  { %v3229_v4 = vadd.f32 1.4214138, %v3221_v2  ;;  %v3190_v7 = vadd.f32 %v5212_v49, %v3189_v53  ;;  %v3198_v19 = vor.u32 1.1754944e-38, %v3197_v47  ;;  %vm3196_vm0 = vcmp.eq.f32.partialorder %v3195_v16, 8.507059e+37 }
0x13e4   :  { %v3362_v35 = vpack.c.bf16 %v3358_v48, %v3354_v34  ;;  %v3359_v23 = vmul.f32 %v3351_v27, %v3047_v50  ;;  %5213 = vpow2.f32 %v3297_v38  ;;  %v3280_v54 = vsub.f32 0.0, %v7031_v51  ;;  %3673 = vmatpush.bf16.msra.mxu2 %v5035_v15 }
0x13e5   :  { %v3237_v17 = vmul.f32 %v3229_v4, %v7095_v10  ;;  %v3194_v11 = vsel %vm3193_vm15, %v5212_v49, %v3190_v7  ;;  %v3313_v26 = vsub.f32 1.0, %v3305_v1  ;;  %v3260_v30 = vadd.f32 0.2548296, %v3252_v55 }
0x13e6   :  { %3646 = vmatmul.bf16.vlgmr.msra.gmra.mxu0 %v3362_v35  ;;  %v3363_v42 = vpack.c.bf16 %v3359_v23, %v3355_v56  ;;  %v3199_v39 = vsel %vm3196_vm0, %v3198_v19, %v3194_v11  ;;  %5215 = vpow2.f32 %v3295_v63  ;;  %v3288_v50 = vmul.f32 %v3280_v54, %v7031_v51 }
0x13e7   :  { %v3245_v43 = vadd.f32 -0.28449672, %v3237_v17  ;;  %v3208_v0 = vmul.f32 1.0614054, %v3199_v39  ;;  %v3329_v31 = vsub.f32 0.0, %v3313_v26  ;;  %v3268_v49 = vmul.f32 %v3260_v30, %v6930_v6 }
0x13e8   :  { %3660 = vmatmul.bf16.vlgmr.msra.gmra.mxu1 %v3363_v42  ;;  %vm3321_vm1 = vcmp.ge.f32.partialorder %v6849_v29, 0.0  ;;  %v3303_v28 = vmul.f32 1.442695, %v3288_v50  ;;  %vm3325_vm2 = vcmp.ge.f32.partialorder %v6938_v33, 0.0  ;;  %v3041_v2 = vmul.f32 0.5, %v6841_v60 }
0x13e9   :  { %v3253_v5 = vmul.f32 %v3245_v43, %v7095_v10  ;;  %v3216_v22 = vadd.f32 -1.4531521, %v3208_v0  ;;  %v3337_v40 = vsel %vm3321_vm1, %v3313_v26, %v3329_v31  ;;  %v3045_v45 = vmul.f32 0.5, %v6927_v36 }
0x13ea   :  { %v5214_v46 = vpop.eup %5213  ;;  %v3345_v51 = vadd.f32 1.0, %v3337_v40  ;;  %5217 = vpow2.f32 %v3303_v28  ;;  %vm3324_vm3 = vcmp.ge.f32.partialorder %v6852_v9, 0.0  ;;  %vm3328_vm4 = vcmp.ge.f32.partialorder %v7015_v21, 0.0  ;;  %v5067_v9 = vld [vmem:[%s7221_s6 + $0xb] ss:$0 sm:$0xff] }
0x13eb   :  { %v3261_v52 = vadd.f32 0.2548296, %v3253_v5  ;;  %v3224_v13 = vmul.f32 %v3216_v22, %v3199_v39  ;;  %v3044_v36 = vmul.f32 0.5, %v6846_v59  ;;  %v3048_v35 = vmul.f32 0.5, %v6987_v62 }
0x13ec   :  { %v5216_v24 = vpop.eup %5215  ;;  %v3353_v41 = vmul.f32 %v3345_v51, %v3041_v2  ;;  %v5045_v51 = vld [vmem:[%s7222_s7 + $0x10] sm:$0xff]  ;;  %v5044_v2 = vld [vmem:[%s7222_s7 + $0x8] sm:$0xff]  ;;  %vm3815_vm11 = vcmask 1041408  }
0x13ed   :  { %v3269_v12 = vmul.f32 %v3261_v52, %v7095_v10  ;;  %v3232_v58 = vadd.f32 1.4214138, %v3224_v13  ;;  %v3308_v61 = vmul.f32 %v5216_v24, %v3268_v49  ;;  %v5048_v24 = vld [vmem:[%s7222_s7 + $0x28] sm:$0xff] }
0x13ef   :  { %v3309_v3 = vmul.f32 %v5214_v46, %v3269_v12  ;;  %v3240_v18 = vmul.f32 %v3232_v58, %v3199_v39  ;;  %v3316_v6 = vsub.f32 1.0, %v3308_v61 }
0x13f0   :  { %v5218_v32 = vpop.eup %5217 }
0x13f1   :  { %v3317_v57 = vsub.f32 1.0, %v3309_v3  ;;  %v3248_v34 = vadd.f32 -0.28449672, %v3240_v18  ;;  %v3332_v47 = vsub.f32 0.0, %v3316_v6  ;;  %v5046_v18 = vld [vmem:[%s7222_s7 + $0x18] sm:$0xff] }
0x13f3   :  { %v3333_v44 = vsub.f32 0.0, %v3317_v57  ;;  %v3256_v55 = vmul.f32 %v3248_v34, %v3199_v39  ;;  %v3340_v33 = vsel %vm3324_vm3, %v3316_v6, %v3332_v47 }
0x13f4   :  { %v3348_v1 = vadd.f32 1.0, %v3340_v33  ;;  %v5069_v33 = vld [vmem:[%s7221_s6 + $0xd] ss:$0 sm:$0xff] }
0x13f5   :  { %v3341_v10 = vsel %vm3325_vm2, %v3317_v57, %v3333_v44  ;;  %v3264_v29 = vadd.f32 0.2548296, %v3256_v55  ;;  %v5047_v57 = vld [vmem:[%s7222_s7 + $0x20] sm:$0xff] }
0x13f6   :  { %v3349_v48 = vadd.f32 1.0, %v3341_v10  ;;  %v3356_v23 = vmul.f32 %v3348_v1, %v3044_v36 }
0x13f7   :  { %v3272_v20 = vmul.f32 %v3264_v29, %v3199_v39  ;;  %v5043_v29 = vld [vmem:[%s7222_s7] sm:$0xff] }
0x13f8   :  { %v3357_v16 = vmul.f32 %v3349_v48, %v3045_v45 }
0x13f9   :  { %v3312_v4 = vmul.f32 %v5218_v32, %v3272_v20  ;;  %v5068_v32 = vld [vmem:[%s7221_s6 + $0xc] ss:$0 sm:$0xff] }
0x13fa   :  { %v3361_v27 = vpack.c.bf16 %v3357_v16, %v3353_v41 }
0x13fb   :  { %v3320_v53 = vsub.f32 1.0, %v3312_v4 }
0x13fc   :  { %3632 = vmatmul.bf16.vlgmr.msra.gmra.mxu3 %v3361_v27 }
0x13fd   :  { %v3336_v56 = vsub.f32 0.0, %v3320_v53 }
0x13ff   :  { %v3344_v60 = vsel %vm3328_vm4, %v3320_v53, %v3336_v56 }
0x1400   :  { %v3352_v38 = vadd.f32 1.0, %v3344_v60 }
0x1402   :  { %v3360_v17 = vmul.f32 %v3352_v38, %v3048_v35 }
0x1404   :  { %v3364_v7 = vpack.c.bf16 %v3360_v17, %v3356_v23 }
0x1406   :  { %3674 = vmatmul.bf16.vlgmr.msra.gmra.mxu2 %v3364_v7 }
0x1463   :  { %v3647_v37 = vpop.f32.mrf.mxu0 }
0x1465   :  { %v3661_v42 = vpop.f32.mrf.mxu1 }
0x146b   :  { %v3649_v59 = vpop.f32.mrf.mxu0 }
0x146d   :  { %v3663_v30 = vpop.f32.mrf.mxu1 }
0x147f   :  { %v3633_v63 = vpop.f32.mrf.mxu3 }
0x1480   :  { %v3634_v19 = vadd.f32 %v5067_v9, %v3633_v63 }
0x1482   :  { %v3648_v15 = vadd.f32 %v3647_v37, %v3634_v19  ;;  %v5070_v19 = vld [vmem:[%s7223_s8 + $0x2] ss:$0 sm:$0xff] }
0x1484   :  { %v3662_v43 = vadd.f32 %v3661_v42, %v3648_v15 }
0x1487   :  { %v3635_v21 = vpop.f32.mrf.mxu3 }
0x1488   :  { %v3636_v11 = vadd.f32 %v5067_v9, %v3635_v21 }
0x1489   :  { %v3675_v39 = vpop.f32.mrf.mxu2 }
0x148a   :  { %v3676_v62 = vadd.f32 %v3675_v39, %v3662_v43  ;;  %v3650_v54 = vadd.f32 %v3649_v59, %v3636_v11 }
0x148c   :  { %v3680_v26 = vadd.f32 %v3676_v62, %v6807_v25  ;;  %v3664_v5 = vadd.f32 %v3663_v30, %v3650_v54  ;;  %v5050_v25 = vld [vmem:[%s7222_s7 + $0x38] sm:$0xff] }
0x148d   :  { %3800 = vmatpush.bf16.msrb.mxu3 %v5050_v25 }
0x148e   :  { %3684 = vadd.xlane.f32.xlu1 %v3680_v26 }
0x1491   :  { %v3677_v0 = vpop.f32.mrf.mxu2 }
0x1492   :  { %v3678_v52 = vadd.f32 %v3677_v0, %v3664_v5 }
0x1494   :  { %v3681_v22 = vadd.f32 %v3678_v52, %v6809_v14  ;;  %v5049_v14 = vld [vmem:[%s7222_s7 + $0x30] sm:$0xff] }
0x1495   :  { %3801 = vmatpush.bf16.msrb.mxu3 %v5049_v14 }
0x1496   :  { %3686 = vadd.xlane.f32.xlu1 %v3681_v22 }
0x1499   :  { %3802 = vmatpush.bf16.msrb.mxu3 %v5048_v24 }
0x149d   :  { %3803 = vmatpush.bf16.msrb.mxu3 %v5047_v57 }
0x14a1   :  { %3804 = vmatpush.bf16.msrb.mxu3 %v5046_v18 }
0x14a5   :  { %3805 = vmatpush.bf16.msrb.mxu3 %v5045_v51 }
0x14a9   :  { %3806 = vmatpush.bf16.msrb.mxu3 %v5044_v2 }
0x14ad   :  { %3807 = vmatpush.bf16.msrb.mxu3 %v5043_v29 }
0x1501   :  { %v3685_v50 = vpop.xlane.xlu1 %3684 }
0x1502   :  { %v3688_v31 = vmul.f32 %v3685_v50, %v5312_v8 }
0x1504   :  { %v3690_v49 = vsub.f32 %v3680_v26, %v3688_v31 }
0x1506   :  { %v3692_v12 = vmul.f32 %v3690_v49, %v3690_v49 }
0x1508   :  { %3694 = vadd.xlane.f32.xlu0 %v3692_v12 }
0x1509   :  { %v3687_v13 = vpop.xlane.xlu1 %3686 }
0x150a   :  { %v3689_v46 = vmul.f32 %v3687_v13, %v5312_v8 }
0x150c   :  { %v3691_v3 = vsub.f32 %v3681_v22, %v3689_v46 }
0x150e   :  { %v3693_v58 = vmul.f32 %v3691_v3, %v3691_v3 }
0x1510   :  { %3696 = vadd.xlane.f32.xlu1 %v3693_v58 }
0x157b   :  { %v3695_v28 = vpop.xlane.xlu0 %3694 }
0x157c   :  { %v3698_v40 = vmul.f32 %v3695_v28, %v5312_v8 }
0x157e   :  { %v3700_v61 = vadd.f32 1e-12, %v3698_v40 }
0x1580   :  { %5219 = vrsqrt.f32 %v3700_v61  ;;  %vm3708_vm6 = vweird.f32 %v3700_v61 }
0x1583   :  { %v3697_v44 = vpop.xlane.xlu1 %3696 }
0x1584   :  { %v3699_v34 = vmul.f32 %v3697_v44, %v5312_v8 }
0x1586   :  { %v5220_v6 = vpop.eup %5219  ;;  %v3701_v10 = vadd.f32 1e-12, %v3699_v34 }
0x1587   :  { %v3703_v55 = vmul.f32 %v5220_v6, %v3700_v61  ;;  %vm3709_vm5 = vweird.f32 %v5220_v6 }
0x1588   :  { %5221 = vrsqrt.f32 %v3701_v10  ;;  %vm3710_vm7 = vmor %vm3708_vm6, %vm3709_vm5  ;;  %vm3718_vm9 = vweird.f32 %v3701_v10 }
0x1589   :  { %v3704_v45 = vmul.f32 %v5220_v6, %v3703_v55 }
0x158b   :  { %v3705_v48 = vmul.f32 0.5, %v3704_v45 }
0x158d   :  { %v3706_v41 = vsub.f32 1.5, %v3705_v48 }
0x158e   :  { %v5222_v16 = vpop.eup %5221 }
0x158f   :  { %v3707_v47 = vmul.f32 %v5220_v6, %v3706_v41  ;;  %v3713_v20 = vmul.f32 %v5222_v16, %v3701_v10  ;;  %vm3719_vm8 = vweird.f32 %v5222_v16 }
0x1590   :  { %vm3720_vm10 = vmor %vm3718_vm9, %vm3719_vm8 }
0x1591   :  { %v3711_v27 = vsel %vm3710_vm7, %v5220_v6, %v3707_v47  ;;  %v3714_v4 = vmul.f32 %v5222_v16, %v3713_v20 }
0x1592   :  { %v3722_v53 = vmul.f32 %v3711_v27, %v3690_v49  ;;  %v5071_v49 = vld [vmem:[%s7223_s8 + $0x3] ss:$0 sm:$0xff] }
0x1593   :  { %v3715_v56 = vmul.f32 0.5, %v3714_v4 }
0x1594   :  { %v3725_v1 = vmul.f32 %v5068_v32, %v3722_v53 }
0x1595   :  { %v3716_v60 = vsub.f32 1.5, %v3715_v56 }
0x1596   :  { %v3728_v36 = vadd.f32 %v5069_v33, %v3725_v1 }
0x1597   :  { %v3717_v35 = vmul.f32 %v5222_v16, %v3716_v60 }
0x1598   :  { %3730 = vst [vmem:[#allocation2] sm:$0xff] %v3728_v36 }
0x1599   :  { %v3721_v38 = vsel %vm3720_vm10, %v5222_v16, %v3717_v35 }
0x159a   :  { %v3723_v23 = vmul.f32 %v3721_v38, %v3691_v3 }
0x159c   :  { %v3726_v17 = vmul.f32 %v5068_v32, %v3723_v23 }
0x159e   :  { %v3729_v7 = vadd.f32 %v5069_v33, %v3726_v17 }
0x15a0   :  { %3731 = vst [vmem:[#allocation2 + $0x8] sm:$0xff] %v3729_v7 }
0x15a7   :  { %v3732_v9 = vld [vmem:[#allocation2] ss:$8 sm:$0x3] }
0x15a8   :  { %v3733_v63 = vpack.c.bf16 %v3732_v9, %v3732_v9 }
0x15aa   :  { %3808 = vmatmul.bf16.vlgmr.msrb.gmra.mxu3 %v3733_v63 }
0x162d   :  { %v3809_v37 = vpop.f32.mrf.mxu3 }
0x162e   :  { %v3810_v15 = vadd.f32 %v5070_v19, %v3809_v37 }
0x1630   :  { %v3816_v42 = vsel %vm3815_vm11, %v3810_v15, 0.0 }
0x1631   :  { %3817 = vadd.xlane.f32.xlu0 %v3816_v42 }
0x1635   :  { %v3811_v21 = vpop.f32.mrf.mxu3 }
0x16a4   :  { %v3818_v43 = vpop.xlane.xlu0 %3817 }
0x16a5   :  { %v3819_v11 = vmul.f32 %v3818_v43, %v5312_v8 }
0x16a7   :  { %v3820_v59 = vsub.f32 %v3810_v15, %v3819_v11 }
0x16a9   :  { %v3821_v39 = vmul.f32 %v3820_v59, %v3820_v59 }
0x16ab   :  { %v3822_v62 = vsel %vm3815_vm11, %v3821_v39, 0.0 }
0x16ac   :  { %3823 = vadd.xlane.f32.xlu2 %v3822_v62 }
0x171f   :  { %v3824_v54 = vpop.xlane.xlu2 %3823 }
0x1720   :  { %v3825_v26 = vmul.f32 %v3824_v54, %v5312_v8  ;;  %v5072_v8 = vld [vmem:[%s7223_s8 + $0x4] ss:$0 sm:$0xff] }
0x1722   :  { %v3826_v30 = vadd.f32 1e-05, %v3825_v26 }
0x1724   :  { %5223 = vrsqrt.f32 %v3826_v30  ;;  %vm3833_vm13 = vweird.f32 %v3826_v30 }
0x172a   :  { %v5224_v5 = vpop.eup %5223 }
0x172b   :  { %v3828_v0 = vmul.f32 %v5224_v5, %v3826_v30  ;;  %vm3834_vm12 = vweird.f32 %v5224_v5 }
0x172c   :  { %vm3835_vm14 = vmor %vm3833_vm13, %vm3834_vm12 }
0x172d   :  { %v3829_v52 = vmul.f32 %v5224_v5, %v3828_v0 }
0x172f   :  { %v3830_v22 = vmul.f32 0.5, %v3829_v52 }
0x1731   :  { %v3831_v50 = vsub.f32 1.5, %v3830_v22 }
0x1733   :  { %v3832_v31 = vmul.f32 %v5224_v5, %v3831_v50 }
0x1735   :  { %v3836_v12 = vsel %vm3835_vm14, %v5224_v5, %v3832_v31 }
0x1736   :  { %v3837_v13 = vmul.f32 %v3836_v12, %v3820_v59 }
0x1738   :  { %v3839_v46 = vmul.f32 %v5071_v49, %v3837_v13 }
0x173a   :  { %v3841_v3 = vadd.f32 %v5072_v8, %v3839_v46 }
0x173c   :  { %3842 = vst [vmem:[#allocation3] sm:$0x3] %v3841_v3 }
0x173d   :  { %3853 = dma.vmem_to_hbm [thread:$0]  %s3849_s3, 32, %s3851_s14, [#allocation4]  }
0x173e   :  { %5249 = dma.done.wait [#allocation4], 32  }
0x173f   :  { %5250 = vsyncadd [#allocation4], 4294967264 }
0x1740   :  { %3858 = vsyncpa [#allocation4], 1 }

</bundles_post_ra>
